<compile_context>
chip_gen: v7x
topology: tpu7x:2x2x1
jax: 0.10.0
libtpu: 0.0.40
codegen_flags: <defaults>
</compile_context>

<pallas_src>
import functools

import jax
import jax.numpy as jnp
from jax.experimental import pallas as pl
from jax.experimental.pallas import tpu as pltpu

# ----------------------------- config ---------------------------------------
VOCAB = 128
HIDDEN = 32
N_HEADS = 4
HEAD_DIM = HIDDEN // N_HEADS
FFN = 64
N_LAYERS = 2
MAX_POS = 64
WINDOW = 4          # Longformer attention_window (total); one-sided = WINDOW // 2
LN_EPS = 1e-5
NEG_INF = -1e9


# ----------------------------- kernel helpers -------------------------------
def _layernorm(h, g, b):
    mean = jnp.mean(h, axis=-1, keepdims=True)
    var = jnp.mean((h - mean) ** 2, axis=-1, keepdims=True)
    return (h - mean) * jax.lax.rsqrt(var + LN_EPS) * g + b


# ----------------------------- fused encoder kernel -------------------------
def _encoder_kernel(ids_ref,                       # scalar prefetch: [B, S] int32 (SMEM)
                    mask_ref, bias_ref, tok_ref, pos_ref,
                    emb_g_ref, emb_b_ref,
                    wqkv_ref, bqkv_ref, wo_ref, bo_ref,
                    ln1_g_ref, ln1_b_ref,
                    w1_ref, b1_ref, w2_ref, b2_ref,
                    ln2_g_ref, ln2_b_ref,
                    o_ref,
                    *, batch_per_step, out_rows):
    """One grid step processes `batch_per_step` batch elements entirely in VMEM."""
    S = pos_ref.shape[0]
    H = HIDDEN
    Dh = HEAD_DIM
    scale = 1.0 / (Dh ** 0.5)
    gstep = pl.program_id(0)

    # Resident (loop-invariant) tensors, loaded once per grid step.
    col = jax.lax.broadcasted_iota(jnp.int32, (1, VOCAB), 1)
    tok_table = tok_ref[...]                       # [VOCAB, H] f32
    pos_emb = pos_ref[...]                         # [S, H]     f32
    static_bias = bias_ref[...]                    # [S, S]  0 / NEG_INF (band | CLS-global)

    for bi in range(batch_per_step):
        b_glob = gstep * batch_per_step + bi

        # ---- fused embedding gather: one-hot(ids) @ tok_emb on the MXU -----
        onehot = jnp.concatenate(
            [(col == ids_ref[b_glob, s]).astype(jnp.float32) for s in range(S)],
            axis=0)                                # [S, VOCAB]
        x = jnp.dot(onehot, tok_table, preferred_element_type=jnp.float32) + pos_emb
        x = _layernorm(x, emb_g_ref[...], emb_b_ref[...])              # [S, H] f32

        # ---- additive mask: static band/global part & key-padding ----------
        # TODO(synk): HF Longformer takes a global_attention_mask and separate
        # global Q/K/V projections; here CLS-global reuses the local projections.
        add_mask = jnp.where(mask_ref[bi] > 0.0, static_bias, NEG_INF)  # [S, S]

        # ---- transformer layers (unrolled; weights resident in VMEM) -------
        for l in range(N_LAYERS):
            # fused QKV: one bf16 MXU pass, f32 accumulation
            qkv = jnp.dot(x.astype(jnp.bfloat16), wqkv_ref[l],
                          preferred_element_type=jnp.float32) + bqkv_ref[l]   # [S, 3H]
            qkv_b = qkv.astype(jnp.bfloat16)
            qh = jnp.stack([qkv_b[:, h * Dh:(h + 1) * Dh]
                            for h in range(N_HEADS)], axis=0)                 # [nh,S,Dh]
            kh = jnp.stack([qkv_b[:, H + h * Dh:H + (h + 1) * Dh]
                            for h in range(N_HEADS)], axis=0)
            vh = jnp.stack([qkv_b[:, 2 * H + h * Dh:2 * H + (h + 1) * Dh]
                            for h in range(N_HEADS)], axis=0)

            # batched scores / softmax / context over all heads at once
            sc = jnp.einsum('hqd,hkd->hqk', qh, kh,
                            preferred_element_type=jnp.float32) * scale       # [nh,S,S]
            sc = sc + add_mask[None]
            sc = sc - jnp.max(sc, axis=-1, keepdims=True)
            p = jnp.exp(sc)
            p = p * pl.reciprocal(jnp.sum(p, axis=-1, keepdims=True), approx=True)
            ctx = jnp.einsum('hqk,hkd->hqd', p.astype(jnp.bfloat16), vh,
                             preferred_element_type=jnp.float32)              # [nh,S,Dh]

            # single output projection with K = H (instead of per-head K = Dh)
            ctx2d = jnp.concatenate([ctx[h] for h in range(N_HEADS)], axis=-1)  # [S, H]
            attn = jnp.dot(ctx2d.astype(jnp.bfloat16), wo_ref[l],
                           preferred_element_type=jnp.float32) + bo_ref[l]
            x = _layernorm(attn + x, ln1_g_ref[l], ln1_b_ref[l])

            # feed-forward
            h1 = jnp.dot(x.astype(jnp.bfloat16), w1_ref[l],
                         preferred_element_type=jnp.float32) + b1_ref[l]
            # TODO(synk): HF Longformer uses exact (erf) GELU; tanh approximation kept.
            h1 = jax.nn.gelu(h1, approximate=True)
            h2 = jnp.dot(h1.astype(jnp.bfloat16), w2_ref[l],
                         preferred_element_type=jnp.float32) + b2_ref[l]
            x = _layernorm(h2 + x, ln2_g_ref[l], ln2_b_ref[l])

        # cls_only -> store only the CLS row; otherwise the full sequence
        o_ref[bi] = x[:out_rows, :].astype(o_ref.dtype)


# ----------------------------- parameters -----------------------------------
def init_params(key):
    keys = jax.random.split(key, 2 + N_LAYERS * 6)
    params = {
        "tok_emb": 0.02 * jax.random.normal(keys[0], (VOCAB, HIDDEN), jnp.float32),
        "pos_emb": 0.02 * jax.random.normal(keys[1], (MAX_POS, HIDDEN), jnp.float32),
        "emb_ln_g": jnp.ones((1, HIDDEN), jnp.float32),
        "emb_ln_b": jnp.zeros((1, HIDDEN), jnp.float32),
    }
    wqkv, wo, w1, w2 = [], [], [], []
    for l in range(N_LAYERS):
        k = keys[2 + l * 6: 2 + (l + 1) * 6]
        wq = 0.02 * jax.random.normal(k[0], (HIDDEN, HIDDEN), jnp.float32)
        wk = 0.02 * jax.random.normal(k[1], (HIDDEN, HIDDEN), jnp.float32)
        wv = 0.02 * jax.random.normal(k[2], (HIDDEN, HIDDEN), jnp.float32)
        wqkv.append(jnp.concatenate([wq, wk, wv], axis=1))            # [H, 3H]
        wo.append(0.02 * jax.random.normal(k[3], (HIDDEN, HIDDEN), jnp.float32))
        w1.append(0.02 * jax.random.normal(k[4], (HIDDEN, FFN), jnp.float32))
        w2.append(0.02 * jax.random.normal(k[5], (FFN, HIDDEN), jnp.float32))
    params.update({
        # MXU operands in bf16; biases/LN params stay f32 (f32 accumulation in-kernel)
        "wqkv": jnp.stack(wqkv).astype(jnp.bfloat16),                 # [L, H, 3H]
        "bqkv": jnp.zeros((N_LAYERS, 1, 3 * HIDDEN), jnp.float32),
        "wo": jnp.stack(wo).astype(jnp.bfloat16),                     # [L, H, H]
        "bo": jnp.zeros((N_LAYERS, 1, HIDDEN), jnp.float32),
        "ln1_g": jnp.ones((N_LAYERS, 1, HIDDEN), jnp.float32),
        "ln1_b": jnp.zeros((N_LAYERS, 1, HIDDEN), jnp.float32),
        "w1": jnp.stack(w1).astype(jnp.bfloat16),                     # [L, H, F]
        "b1": jnp.zeros((N_LAYERS, 1, FFN), jnp.float32),
        "w2": jnp.stack(w2).astype(jnp.bfloat16),                     # [L, F, H]
        "b2": jnp.zeros((N_LAYERS, 1, HIDDEN), jnp.float32),
        "ln2_g": jnp.ones((N_LAYERS, 1, HIDDEN), jnp.float32),
        "ln2_b": jnp.zeros((N_LAYERS, 1, HIDDEN), jnp.float32),
    })
    return params


# ----------------------------- forward --------------------------------------
def _tensorcores_per_chip():
    """2 on v7x (two TensorCores/chip), else 1 (v5e/v6e/other)."""
    try:
        kind = jax.devices()[0].device_kind.lower()
    except Exception:
        return 1
    return 2 if ("v7" in kind or "7x" in kind) else 1


def longformer_forward(params, input_ids, attention_mask, cls_only=True):
    B, S = input_ids.shape
    H, L, F = HIDDEN, N_LAYERS, FFN
    out_rows = 1 if cls_only else S

    tc = _tensorcores_per_chip()
    grid_size = tc if (tc > 1 and B % tc == 0) else 1   # size-2 parallel grid only on 2-TC chips
    bp = B // grid_size                                  # batch elements per grid step

    mask = attention_mask.astype(jnp.float32).reshape(B, 1, S)        # key-padding mask

    # Static Longformer bias (sliding window | CLS-global): computed once in the
    # wrapper, shared across batch/grid; only the key-padding `where` stays in-kernel.
    idx = jnp.arange(S)
    local = jnp.abs(idx[:, None] - idx[None, :]) <= (WINDOW // 2)
    glob = (idx[:, None] == 0) | (idx[None, :] == 0)
    static_bias = jnp.where(local | glob, 0.0, NEG_INF).astype(jnp.float32)   # [S, S]

    pos = params["pos_emb"][:S]                                       # [S, H]

    def resident(shape):
        return pl.BlockSpec(shape, lambda g, ids, _n=len(shape): (0,) * _n)

    kernel = functools.partial(_encoder_kernel, batch_per_step=bp, out_rows=out_rows)

    out = pl.pallas_call(
        kernel,
        out_shape=jax.ShapeDtypeStruct((B, out_rows, H), jnp.float32),
        grid_spec=pltpu.PrefetchScalarGridSpec(
            num_scalar_prefetch=1,                                    # input_ids -> SMEM
            grid=(grid_size,),
            in_specs=[
                pl.BlockSpec((bp, 1, S), lambda g, ids: (g, 0, 0)),   # key-padding mask
                resident((S, S)),                                     # static band/global bias
                resident((VOCAB, H)),                                 # token embedding table
                resident((S, H)),                                     # position embeddings
                resident((1, H)), resident((1, H)),                   # embedding LN
                resident((L, H, 3 * H)), resident((L, 1, 3 * H)),     # fused QKV
                resident((L, H, H)), resident((L, 1, H)),             # output proj
                resident((L, 1, H)), resident((L, 1, H)),             # LN1
                resident((L, H, F)), resident((L, 1, F)),             # FFN w1
                resident((L, F, H)), resident((L, 1, H)),             # FFN w2
                resident((L, 1, H)), resident((L, 1, H)),             # LN2
            ],
            out_specs=pl.BlockSpec((bp, out_rows, H), lambda g, ids: (g, 0, 0)),
        ),
        compiler_params=pltpu.CompilerParams(
            dimension_semantics=("parallel",)),
    )(input_ids.astype(jnp.int32), mask, static_bias,
      params["tok_emb"], pos,
      params["emb_ln_g"], params["emb_ln_b"],
      params["wqkv"], params["bqkv"], params["wo"], params["bo"],
      params["ln1_g"], params["ln1_b"],
      params["w1"], params["b1"], params["w2"], params["b2"],
      params["ln2_g"], params["ln2_b"])

    return out[:, 0, :] if cls_only else out


# ----------------------------- main ------------------------------------------
if __name__ == "__main__":
    key = jax.random.PRNGKey(0)
    pkey, dkey = jax.random.split(key)
    params = init_params(pkey)

    B, S = 2, 16
    input_ids = jax.random.randint(dkey, (B, S), 0, VOCAB, dtype=jnp.int32)
    # batch 0 fully valid, batch 1 with 4 padded positions at the end
    attention_mask = jnp.concatenate(
        [jnp.ones((1, S), jnp.int32),
         jnp.concatenate([jnp.ones((1, S - 4), jnp.int32),
                          jnp.zeros((1, 4), jnp.int32)], axis=1)],
        axis=0)

    fwd = jax.jit(longformer_forward, static_argnames=("cls_only",))

    cls_emb = jax.block_until_ready(fwd(params, input_ids, attention_mask, cls_only=True))
    assert cls_emb.shape == (B, HIDDEN)
    assert bool(jnp.all(jnp.isfinite(cls_emb)))

    full_seq = jax.block_until_ready(fwd(params, input_ids, attention_mask, cls_only=False))
    assert full_seq.shape == (B, S, HIDDEN)
    assert bool(jnp.all(jnp.isfinite(full_seq)))

    print("KERNEL_OK")
</pallas_src>

<mosaic_0001>
module attributes {stable_mosaic.version = 11 : i64} {
  func.func @_encoder_kernel(%arg0: i32, %arg1: memref<2x16xi32, #tpu.memory_space<smem>>, %arg2: memref<2x1x16xf32, #tpu.memory_space<vmem>>, %arg3: memref<16x16xf32, #tpu.memory_space<vmem>>, %arg4: memref<128x32xf32, #tpu.memory_space<vmem>>, %arg5: memref<16x32xf32, #tpu.memory_space<vmem>>, %arg6: memref<1x32xf32, #tpu.memory_space<vmem>>, %arg7: memref<1x32xf32, #tpu.memory_space<vmem>>, %arg8: memref<2x32x96xbf16, #tpu.memory_space<vmem>>, %arg9: memref<2x1x96xf32, #tpu.memory_space<vmem>>, %arg10: memref<2x32x32xbf16, #tpu.memory_space<vmem>>, %arg11: memref<2x1x32xf32, #tpu.memory_space<vmem>>, %arg12: memref<2x1x32xf32, #tpu.memory_space<vmem>>, %arg13: memref<2x1x32xf32, #tpu.memory_space<vmem>>, %arg14: memref<2x32x64xbf16, #tpu.memory_space<vmem>>, %arg15: memref<2x1x64xf32, #tpu.memory_space<vmem>>, %arg16: memref<2x64x32xbf16, #tpu.memory_space<vmem>>, %arg17: memref<2x1x32xf32, #tpu.memory_space<vmem>>, %arg18: memref<2x1x32xf32, #tpu.memory_space<vmem>>, %arg19: memref<2x1x32xf32, #tpu.memory_space<vmem>>, %arg20: memref<2x1x32xf32, #tpu.memory_space<vmem>>) attributes {dimension_semantics = [#tpu.dimension_semantics<parallel>], iteration_bounds = array<i64: 1>, scalar_prefetch = 1 : i64, scratch_operands = 0 : i64, tpu.core_type = #tpu.core_type<tc>, window_params = [{transform_indices = @transform_0, window_bounds = array<i64: 2, 1, 16>}, {pipeline_mode = #tpu.pipeline_mode<synchronous>, transform_indices = @transform_1, window_bounds = array<i64: 16, 16>}, {pipeline_mode = #tpu.pipeline_mode<synchronous>, transform_indices = @transform_2, window_bounds = array<i64: 128, 32>}, {pipeline_mode = #tpu.pipeline_mode<synchronous>, transform_indices = @transform_3, window_bounds = array<i64: 16, 32>}, {pipeline_mode = #tpu.pipeline_mode<synchronous>, transform_indices = @transform_4, window_bounds = array<i64: 1, 32>}, {pipeline_mode = #tpu.pipeline_mode<synchronous>, transform_indices = @transform_5, window_bounds = array<i64: 1, 32>}, {pipeline_mode = #tpu.pipeline_mode<synchronous>, transform_indices = @transform_6, window_bounds = array<i64: 2, 32, 96>}, {pipeline_mode = #tpu.pipeline_mode<synchronous>, transform_indices = @transform_7, window_bounds = array<i64: 2, 1, 96>}, {pipeline_mode = #tpu.pipeline_mode<synchronous>, transform_indices = @transform_8, window_bounds = array<i64: 2, 32, 32>}, {pipeline_mode = #tpu.pipeline_mode<synchronous>, transform_indices = @transform_9, window_bounds = array<i64: 2, 1, 32>}, {pipeline_mode = #tpu.pipeline_mode<synchronous>, transform_indices = @transform_10, window_bounds = array<i64: 2, 1, 32>}, {pipeline_mode = #tpu.pipeline_mode<synchronous>, transform_indices = @transform_11, window_bounds = array<i64: 2, 1, 32>}, {pipeline_mode = #tpu.pipeline_mode<synchronous>, transform_indices = @transform_12, window_bounds = array<i64: 2, 32, 64>}, {pipeline_mode = #tpu.pipeline_mode<synchronous>, transform_indices = @transform_13, window_bounds = array<i64: 2, 1, 64>}, {pipeline_mode = #tpu.pipeline_mode<synchronous>, transform_indices = @transform_14, window_bounds = array<i64: 2, 64, 32>}, {pipeline_mode = #tpu.pipeline_mode<synchronous>, transform_indices = @transform_15, window_bounds = array<i64: 2, 1, 32>}, {pipeline_mode = #tpu.pipeline_mode<synchronous>, transform_indices = @transform_16, window_bounds = array<i64: 2, 1, 32>}, {pipeline_mode = #tpu.pipeline_mode<synchronous>, transform_indices = @transform_17, window_bounds = array<i64: 2, 1, 32>}, {transform_indices = @transform_18, window_bounds = array<i64: 2, 1, 32>}]} {
    %0 = tpu.iota {dimensions = array<i32: 1>} : vector<1x128xi32>
    %c0 = arith.constant 0 : index
    %c0_0 = arith.constant 0 : index
    %1 = vector.load %arg4[%c0, %c0_0] : memref<128x32xf32, #tpu.memory_space<vmem>>, vector<128x32xf32>
    %c0_1 = arith.constant 0 : index
    %c0_2 = arith.constant 0 : index
    %2 = vector.load %arg5[%c0_1, %c0_2] : memref<16x32xf32, #tpu.memory_space<vmem>>, vector<16x32xf32>
    %c0_3 = arith.constant 0 : index
    %c0_4 = arith.constant 0 : index
    %3 = vector.load %arg3[%c0_3, %c0_4] : memref<16x16xf32, #tpu.memory_space<vmem>>, vector<16x16xf32>
    %c2_i32 = arith.constant 2 : i32
    %4 = arith.muli %arg0, %c2_i32 : i32
    %c0_i32 = arith.constant 0 : i32
    %5 = arith.addi %4, %c0_i32 : i32
    %6 = arith.index_cast %5 : i32 to index
    %c0_5 = arith.constant 0 : index
    %7 = memref.load %arg1[%6, %c0_5] : memref<2x16xi32, #tpu.memory_space<smem>>
    %8 = vector.broadcast %7 : i32 to vector<1x128xi32>
    %9 = arith.cmpi eq, %0, %8 : vector<1x128xi32>
    %10 = arith.extui %9 : vector<1x128xi1> to vector<1x128xi32>
    %11 = arith.sitofp %10 : vector<1x128xi32> to vector<1x128xf32>
    %12 = arith.index_cast %5 : i32 to index
    %c1 = arith.constant 1 : index
    %13 = memref.load %arg1[%12, %c1] : memref<2x16xi32, #tpu.memory_space<smem>>
    %14 = vector.broadcast %13 : i32 to vector<1x128xi32>
    %15 = arith.cmpi eq, %0, %14 : vector<1x128xi32>
    %16 = arith.extui %15 : vector<1x128xi1> to vector<1x128xi32>
    %17 = arith.sitofp %16 : vector<1x128xi32> to vector<1x128xf32>
    %18 = arith.index_cast %5 : i32 to index
    %c2 = arith.constant 2 : index
    %19 = memref.load %arg1[%18, %c2] : memref<2x16xi32, #tpu.memory_space<smem>>
    %20 = vector.broadcast %19 : i32 to vector<1x128xi32>
    %21 = arith.cmpi eq, %0, %20 : vector<1x128xi32>
    %22 = arith.extui %21 : vector<1x128xi1> to vector<1x128xi32>
    %23 = arith.sitofp %22 : vector<1x128xi32> to vector<1x128xf32>
    %24 = arith.index_cast %5 : i32 to index
    %c3 = arith.constant 3 : index
    %25 = memref.load %arg1[%24, %c3] : memref<2x16xi32, #tpu.memory_space<smem>>
    %26 = vector.broadcast %25 : i32 to vector<1x128xi32>
    %27 = arith.cmpi eq, %0, %26 : vector<1x128xi32>
    %28 = arith.extui %27 : vector<1x128xi1> to vector<1x128xi32>
    %29 = arith.sitofp %28 : vector<1x128xi32> to vector<1x128xf32>
    %30 = arith.index_cast %5 : i32 to index
    %c4 = arith.constant 4 : index
    %31 = memref.load %arg1[%30, %c4] : memref<2x16xi32, #tpu.memory_space<smem>>
    %32 = vector.broadcast %31 : i32 to vector<1x128xi32>
    %33 = arith.cmpi eq, %0, %32 : vector<1x128xi32>
    %34 = arith.extui %33 : vector<1x128xi1> to vector<1x128xi32>
    %35 = arith.sitofp %34 : vector<1x128xi32> to vector<1x128xf32>
    %36 = arith.index_cast %5 : i32 to index
    %c5 = arith.constant 5 : index
    %37 = memref.load %arg1[%36, %c5] : memref<2x16xi32, #tpu.memory_space<smem>>
    %38 = vector.broadcast %37 : i32 to vector<1x128xi32>
    %39 = arith.cmpi eq, %0, %38 : vector<1x128xi32>
    %40 = arith.extui %39 : vector<1x128xi1> to vector<1x128xi32>
    %41 = arith.sitofp %40 : vector<1x128xi32> to vector<1x128xf32>
    %42 = arith.index_cast %5 : i32 to index
    %c6 = arith.constant 6 : index
    %43 = memref.load %arg1[%42, %c6] : memref<2x16xi32, #tpu.memory_space<smem>>
    %44 = vector.broadcast %43 : i32 to vector<1x128xi32>
    %45 = arith.cmpi eq, %0, %44 : vector<1x128xi32>
    %46 = arith.extui %45 : vector<1x128xi1> to vector<1x128xi32>
    %47 = arith.sitofp %46 : vector<1x128xi32> to vector<1x128xf32>
    %48 = arith.index_cast %5 : i32 to index
    %c7 = arith.constant 7 : index
    %49 = memref.load %arg1[%48, %c7] : memref<2x16xi32, #tpu.memory_space<smem>>
    %50 = vector.broadcast %49 : i32 to vector<1x128xi32>
    %51 = arith.cmpi eq, %0, %50 : vector<1x128xi32>
    %52 = arith.extui %51 : vector<1x128xi1> to vector<1x128xi32>
    %53 = arith.sitofp %52 : vector<1x128xi32> to vector<1x128xf32>
    %54 = arith.index_cast %5 : i32 to index
    %c8 = arith.constant 8 : index
    %55 = memref.load %arg1[%54, %c8] : memref<2x16xi32, #tpu.memory_space<smem>>
    %56 = vector.broadcast %55 : i32 to vector<1x128xi32>
    %57 = arith.cmpi eq, %0, %56 : vector<1x128xi32>
    %58 = arith.extui %57 : vector<1x128xi1> to vector<1x128xi32>
    %59 = arith.sitofp %58 : vector<1x128xi32> to vector<1x128xf32>
    %60 = arith.index_cast %5 : i32 to index
    %c9 = arith.constant 9 : index
    %61 = memref.load %arg1[%60, %c9] : memref<2x16xi32, #tpu.memory_space<smem>>
    %62 = vector.broadcast %61 : i32 to vector<1x128xi32>
    %63 = arith.cmpi eq, %0, %62 : vector<1x128xi32>
    %64 = arith.extui %63 : vector<1x128xi1> to vector<1x128xi32>
    %65 = arith.sitofp %64 : vector<1x128xi32> to vector<1x128xf32>
    %66 = arith.index_cast %5 : i32 to index
    %c10 = arith.constant 10 : index
    %67 = memref.load %arg1[%66, %c10] : memref<2x16xi32, #tpu.memory_space<smem>>
    %68 = vector.broadcast %67 : i32 to vector<1x128xi32>
    %69 = arith.cmpi eq, %0, %68 : vector<1x128xi32>
    %70 = arith.extui %69 : vector<1x128xi1> to vector<1x128xi32>
    %71 = arith.sitofp %70 : vector<1x128xi32> to vector<1x128xf32>
    %72 = arith.index_cast %5 : i32 to index
    %c11 = arith.constant 11 : index
    %73 = memref.load %arg1[%72, %c11] : memref<2x16xi32, #tpu.memory_space<smem>>
    %74 = vector.broadcast %73 : i32 to vector<1x128xi32>
    %75 = arith.cmpi eq, %0, %74 : vector<1x128xi32>
    %76 = arith.extui %75 : vector<1x128xi1> to vector<1x128xi32>
    %77 = arith.sitofp %76 : vector<1x128xi32> to vector<1x128xf32>
    %78 = arith.index_cast %5 : i32 to index
    %c12 = arith.constant 12 : index
    %79 = memref.load %arg1[%78, %c12] : memref<2x16xi32, #tpu.memory_space<smem>>
    %80 = vector.broadcast %79 : i32 to vector<1x128xi32>
    %81 = arith.cmpi eq, %0, %80 : vector<1x128xi32>
    %82 = arith.extui %81 : vector<1x128xi1> to vector<1x128xi32>
    %83 = arith.sitofp %82 : vector<1x128xi32> to vector<1x128xf32>
    %84 = arith.index_cast %5 : i32 to index
    %c13 = arith.constant 13 : index
    %85 = memref.load %arg1[%84, %c13] : memref<2x16xi32, #tpu.memory_space<smem>>
    %86 = vector.broadcast %85 : i32 to vector<1x128xi32>
    %87 = arith.cmpi eq, %0, %86 : vector<1x128xi32>
    %88 = arith.extui %87 : vector<1x128xi1> to vector<1x128xi32>
    %89 = arith.sitofp %88 : vector<1x128xi32> to vector<1x128xf32>
    %90 = arith.index_cast %5 : i32 to index
    %c14 = arith.constant 14 : index
    %91 = memref.load %arg1[%90, %c14] : memref<2x16xi32, #tpu.memory_space<smem>>
    %92 = vector.broadcast %91 : i32 to vector<1x128xi32>
    %93 = arith.cmpi eq, %0, %92 : vector<1x128xi32>
    %94 = arith.extui %93 : vector<1x128xi1> to vector<1x128xi32>
    %95 = arith.sitofp %94 : vector<1x128xi32> to vector<1x128xf32>
    %96 = arith.index_cast %5 : i32 to index
    %c15 = arith.constant 15 : index
    %97 = memref.load %arg1[%96, %c15] : memref<2x16xi32, #tpu.memory_space<smem>>
    %98 = vector.broadcast %97 : i32 to vector<1x128xi32>
    %99 = arith.cmpi eq, %0, %98 : vector<1x128xi32>
    %100 = arith.extui %99 : vector<1x128xi1> to vector<1x128xi32>
    %101 = arith.sitofp %100 : vector<1x128xi32> to vector<1x128xf32>
    %102 = tpu.concatenate %11, %17, %23, %29, %35, %41, %47, %53, %59, %65, %71, %77, %83, %89, %95, %101 in 0 : vector<1x128xf32>, vector<1x128xf32>, vector<1x128xf32>, vector<1x128xf32>, vector<1x128xf32>, vector<1x128xf32>, vector<1x128xf32>, vector<1x128xf32>, vector<1x128xf32>, vector<1x128xf32>, vector<1x128xf32>, vector<1x128xf32>, vector<1x128xf32>, vector<1x128xf32>, vector<1x128xf32>, vector<1x128xf32> -> vector<16x128xf32>
    %cst = arith.constant dense<0.000000e+00> : vector<16x32xf32>
    %103 = tpu.matmul %102, %1, %cst {dimension_numbers = #tpu.dot_dimension_numbers<[1], [0], [0], [1], [0, 0, 1, 1], [], []>} : vector<16x128xf32>, vector<128x32xf32>, vector<16x32xf32> -> vector<16x32xf32>
    %104 = arith.addf %103, %2 : vector<16x32xf32>
    %c0_6 = arith.constant 0 : index
    %c0_7 = arith.constant 0 : index
    %105 = vector.load %arg6[%c0_6, %c0_7] : memref<1x32xf32, #tpu.memory_space<vmem>>, vector<1x32xf32>
    %c0_8 = arith.constant 0 : index
    %c0_9 = arith.constant 0 : index
    %106 = vector.load %arg7[%c0_8, %c0_9] : memref<1x32xf32, #tpu.memory_space<vmem>>, vector<1x32xf32>
    %cst_10 = arith.constant dense<0.000000e+00> : vector<16xf32>
    %107 = vector.multi_reduction <add>, %104, %cst_10 [1] : vector<16x32xf32> to vector<16xf32>
    %108 = vector.shape_cast %107 : vector<16xf32> to vector<16x1xf32>
    %cst_11 = arith.constant 3.200000e+01 : f32
    %109 = vector.broadcast %cst_11 : f32 to vector<16x1xf32>
    %110 = arith.divf %108, %109 : vector<16x1xf32>
    %111 = vector.broadcast %110 : vector<16x1xf32> to vector<16x32xf32>
    %112 = arith.subf %104, %111 : vector<16x32xf32>
    %113 = arith.mulf %112, %112 : vector<16x32xf32>
    %cst_12 = arith.constant dense<0.000000e+00> : vector<16xf32>
    %114 = vector.multi_reduction <add>, %113, %cst_12 [1] : vector<16x32xf32> to vector<16xf32>
    %115 = vector.shape_cast %114 : vector<16xf32> to vector<16x1xf32>
    %cst_13 = arith.constant 3.200000e+01 : f32
    %116 = vector.broadcast %cst_13 : f32 to vector<16x1xf32>
    %117 = arith.divf %115, %116 : vector<16x1xf32>
    %118 = vector.broadcast %110 : vector<16x1xf32> to vector<16x32xf32>
    %119 = arith.subf %104, %118 : vector<16x32xf32>
    %cst_14 = arith.constant 9.99999974E-6 : f32
    %120 = vector.broadcast %cst_14 : f32 to vector<16x1xf32>
    %121 = arith.addf %117, %120 : vector<16x1xf32>
    %122 = math.rsqrt %121 : vector<16x1xf32>
    %123 = vector.broadcast %122 : vector<16x1xf32> to vector<16x32xf32>
    %124 = arith.mulf %119, %123 : vector<16x32xf32>
    %125 = vector.broadcast %105 : vector<1x32xf32> to vector<16x32xf32>
    %126 = arith.mulf %124, %125 : vector<16x32xf32>
    %127 = vector.broadcast %106 : vector<1x32xf32> to vector<16x32xf32>
    %128 = arith.addf %126, %127 : vector<16x32xf32>
    %c0_15 = arith.constant 0 : index
    %c0_16 = arith.constant 0 : index
    %c0_17 = arith.constant 0 : index
    %129 = vector.load %arg2[%c0_15, %c0_16, %c0_17] : memref<2x1x16xf32, #tpu.memory_space<vmem>>, vector<1x1x16xf32>
    %130 = vector.shape_cast %129 : vector<1x1x16xf32> to vector<1x16xf32>
    %cst_18 = arith.constant 0.000000e+00 : f32
    %131 = vector.broadcast %cst_18 : f32 to vector<1x16xf32>
    %132 = arith.cmpf ogt, %130, %131 : vector<1x16xf32>
    %cst_19 = arith.constant -1.000000e+09 : f32
    %133 = vector.shape_cast %132 : vector<1x16xi1> to vector<1x16xi1>
    %134 = vector.broadcast %133 : vector<1x16xi1> to vector<16x16xi1>
    %135 = vector.broadcast %cst_19 : f32 to vector<16x16xf32>
    %136 = arith.select %134, %3, %135 : vector<16x16xi1>, vector<16x16xf32>
    %137 = arith.truncf %128 : vector<16x32xf32> to vector<16x32xbf16>
    %c0_20 = arith.constant 0 : index
    %c0_21 = arith.constant 0 : index
    %c0_22 = arith.constant 0 : index
    %138 = vector.load %arg8[%c0_20, %c0_21, %c0_22] : memref<2x32x96xbf16, #tpu.memory_space<vmem>>, vector<1x32x96xbf16>
    %139 = vector.shape_cast %138 : vector<1x32x96xbf16> to vector<32x96xbf16>
    %cst_23 = arith.constant dense<0.000000e+00> : vector<16x96xf32>
    %140 = tpu.matmul %137, %139, %cst_23 {dimension_numbers = #tpu.dot_dimension_numbers<[1], [0], [0], [1], [0, 0, 1, 1], [], []>} : vector<16x32xbf16>, vector<32x96xbf16>, vector<16x96xf32> -> vector<16x96xf32>
    %c0_24 = arith.constant 0 : index
    %c0_25 = arith.constant 0 : index
    %c0_26 = arith.constant 0 : index
    %141 = vector.load %arg9[%c0_24, %c0_25, %c0_26] : memref<2x1x96xf32, #tpu.memory_space<vmem>>, vector<1x1x96xf32>
    %142 = vector.shape_cast %141 : vector<1x1x96xf32> to vector<1x96xf32>
    %143 = vector.broadcast %142 : vector<1x96xf32> to vector<16x96xf32>
    %144 = arith.addf %140, %143 : vector<16x96xf32>
    %145 = arith.truncf %144 : vector<16x96xf32> to vector<16x96xbf16>
    %146 = vector.extract_strided_slice %145 {offsets = [0, 0], sizes = [16, 8], strides = [1, 1]} : vector<16x96xbf16> to vector<16x8xbf16>
    %147 = vector.extract_strided_slice %145 {offsets = [0, 8], sizes = [16, 8], strides = [1, 1]} : vector<16x96xbf16> to vector<16x8xbf16>
    %148 = vector.extract_strided_slice %145 {offsets = [0, 16], sizes = [16, 8], strides = [1, 1]} : vector<16x96xbf16> to vector<16x8xbf16>
    %149 = vector.extract_strided_slice %145 {offsets = [0, 24], sizes = [16, 8], strides = [1, 1]} : vector<16x96xbf16> to vector<16x8xbf16>
    %150 = vector.shape_cast %146 : vector<16x8xbf16> to vector<1x16x8xbf16>
    %151 = vector.shape_cast %147 : vector<16x8xbf16> to vector<1x16x8xbf16>
    %152 = vector.shape_cast %148 : vector<16x8xbf16> to vector<1x16x8xbf16>
    %153 = vector.shape_cast %149 : vector<16x8xbf16> to vector<1x16x8xbf16>
    %154 = tpu.concatenate %150, %151, %152, %153 in 0 : vector<1x16x8xbf16>, vector<1x16x8xbf16>, vector<1x16x8xbf16>, vector<1x16x8xbf16> -> vector<4x16x8xbf16>
    %155 = vector.extract_strided_slice %145 {offsets = [0, 32], sizes = [16, 8], strides = [1, 1]} : vector<16x96xbf16> to vector<16x8xbf16>
    %156 = vector.extract_strided_slice %145 {offsets = [0, 40], sizes = [16, 8], strides = [1, 1]} : vector<16x96xbf16> to vector<16x8xbf16>
    %157 = vector.extract_strided_slice %145 {offsets = [0, 48], sizes = [16, 8], strides = [1, 1]} : vector<16x96xbf16> to vector<16x8xbf16>
    %158 = vector.extract_strided_slice %145 {offsets = [0, 56], sizes = [16, 8], strides = [1, 1]} : vector<16x96xbf16> to vector<16x8xbf16>
    %159 = vector.shape_cast %155 : vector<16x8xbf16> to vector<1x16x8xbf16>
    %160 = vector.shape_cast %156 : vector<16x8xbf16> to vector<1x16x8xbf16>
    %161 = vector.shape_cast %157 : vector<16x8xbf16> to vector<1x16x8xbf16>
    %162 = vector.shape_cast %158 : vector<16x8xbf16> to vector<1x16x8xbf16>
    %163 = tpu.concatenate %159, %160, %161, %162 in 0 : vector<1x16x8xbf16>, vector<1x16x8xbf16>, vector<1x16x8xbf16>, vector<1x16x8xbf16> -> vector<4x16x8xbf16>
    %164 = vector.extract_strided_slice %145 {offsets = [0, 64], sizes = [16, 8], strides = [1, 1]} : vector<16x96xbf16> to vector<16x8xbf16>
    %165 = vector.extract_strided_slice %145 {offsets = [0, 72], sizes = [16, 8], strides = [1, 1]} : vector<16x96xbf16> to vector<16x8xbf16>
    %166 = vector.extract_strided_slice %145 {offsets = [0, 80], sizes = [16, 8], strides = [1, 1]} : vector<16x96xbf16> to vector<16x8xbf16>
    %167 = vector.extract_strided_slice %145 {offsets = [0, 88], sizes = [16, 8], strides = [1, 1]} : vector<16x96xbf16> to vector<16x8xbf16>
    %168 = vector.shape_cast %164 : vector<16x8xbf16> to vector<1x16x8xbf16>
    %169 = vector.shape_cast %165 : vector<16x8xbf16> to vector<1x16x8xbf16>
    %170 = vector.shape_cast %166 : vector<16x8xbf16> to vector<1x16x8xbf16>
    %171 = vector.shape_cast %167 : vector<16x8xbf16> to vector<1x16x8xbf16>
    %172 = tpu.concatenate %168, %169, %170, %171 in 0 : vector<1x16x8xbf16>, vector<1x16x8xbf16>, vector<1x16x8xbf16>, vector<1x16x8xbf16> -> vector<4x16x8xbf16>
    "tpu.trace_start"() <{level = 10 : i32, message = "hqd,hkd->hqk"}> : () -> ()
    %cst_27 = arith.constant dense<0.000000e+00> : vector<4x16x16xf32>
    %173 = tpu.matmul %154, %163, %cst_27 {dimension_numbers = #tpu.dot_dimension_numbers<[2], [2], [1], [1], [0, 0, 0, 1, 1, 1], [0], [0]>} : vector<4x16x8xbf16>, vector<4x16x8xbf16>, vector<4x16x16xf32> -> vector<4x16x16xf32>
    "tpu.trace_stop"() : () -> ()
    %cst_28 = arith.constant 0.353553385 : f32
    %174 = vector.broadcast %cst_28 : f32 to vector<4x16x16xf32>
    %175 = arith.mulf %173, %174 : vector<4x16x16xf32>
    %176 = vector.shape_cast %136 : vector<16x16xf32> to vector<1x16x16xf32>
    %177 = vector.broadcast %176 : vector<1x16x16xf32> to vector<4x16x16xf32>
    %178 = arith.addf %175, %177 : vector<4x16x16xf32>
    %cst_29 = arith.constant dense<0xFF800000> : vector<4x16xf32>
    %179 = vector.multi_reduction <maximumf>, %178, %cst_29 [2] : vector<4x16x16xf32> to vector<4x16xf32>
    %180 = vector.shape_cast %179 : vector<4x16xf32> to vector<4x16x1xf32>
    %181 = vector.broadcast %180 : vector<4x16x1xf32> to vector<4x16x16xf32>
    %182 = arith.subf %178, %181 : vector<4x16x16xf32>
    %183 = math.exp %182 : vector<4x16x16xf32>
    %cst_30 = arith.constant dense<0.000000e+00> : vector<4x16xf32>
    %184 = vector.multi_reduction <add>, %183, %cst_30 [2] : vector<4x16x16xf32> to vector<4x16xf32>
    %185 = vector.shape_cast %184 : vector<4x16xf32> to vector<4x16x1xf32>
    %186 = tpu.reciprocal %185 {approx = true} : vector<4x16x1xf32> -> vector<4x16x1xf32>
    %187 = vector.broadcast %186 : vector<4x16x1xf32> to vector<4x16x16xf32>
    %188 = arith.mulf %183, %187 : vector<4x16x16xf32>
    %189 = arith.truncf %188 : vector<4x16x16xf32> to vector<4x16x16xbf16>
    "tpu.trace_start"() <{level = 10 : i32, message = "hqk,hkd->hqd"}> : () -> ()
    %cst_31 = arith.constant dense<0.000000e+00> : vector<4x16x8xf32>
    %190 = tpu.matmul %189, %172, %cst_31 {dimension_numbers = #tpu.dot_dimension_numbers<[2], [1], [1], [2], [0, 0, 0, 1, 1, 2], [0], [0]>} : vector<4x16x16xbf16>, vector<4x16x8xbf16>, vector<4x16x8xf32> -> vector<4x16x8xf32>
    "tpu.trace_stop"() : () -> ()
    %191 = vector.extract_strided_slice %190 {offsets = [0, 0, 0], sizes = [1, 16, 8], strides = [1, 1, 1]} : vector<4x16x8xf32> to vector<1x16x8xf32>
    %192 = vector.shape_cast %191 : vector<1x16x8xf32> to vector<16x8xf32>
    %193 = vector.extract_strided_slice %190 {offsets = [1, 0, 0], sizes = [1, 16, 8], strides = [1, 1, 1]} : vector<4x16x8xf32> to vector<1x16x8xf32>
    %194 = vector.shape_cast %193 : vector<1x16x8xf32> to vector<16x8xf32>
    %195 = vector.extract_strided_slice %190 {offsets = [2, 0, 0], sizes = [1, 16, 8], strides = [1, 1, 1]} : vector<4x16x8xf32> to vector<1x16x8xf32>
    %196 = vector.shape_cast %195 : vector<1x16x8xf32> to vector<16x8xf32>
    %197 = vector.extract_strided_slice %190 {offsets = [3, 0, 0], sizes = [1, 16, 8], strides = [1, 1, 1]} : vector<4x16x8xf32> to vector<1x16x8xf32>
    %198 = vector.shape_cast %197 : vector<1x16x8xf32> to vector<16x8xf32>
    %199 = tpu.concatenate %192, %194, %196, %198 in 1 : vector<16x8xf32>, vector<16x8xf32>, vector<16x8xf32>, vector<16x8xf32> -> vector<16x32xf32>
    %200 = arith.truncf %199 : vector<16x32xf32> to vector<16x32xbf16>
    %c0_32 = arith.constant 0 : index
    %c0_33 = arith.constant 0 : index
    %c0_34 = arith.constant 0 : index
    %201 = vector.load %arg10[%c0_32, %c0_33, %c0_34] : memref<2x32x32xbf16, #tpu.memory_space<vmem>>, vector<1x32x32xbf16>
    %202 = vector.shape_cast %201 : vector<1x32x32xbf16> to vector<32x32xbf16>
    %cst_35 = arith.constant dense<0.000000e+00> : vector<16x32xf32>
    %203 = tpu.matmul %200, %202, %cst_35 {dimension_numbers = #tpu.dot_dimension_numbers<[1], [0], [0], [1], [0, 0, 1, 1], [], []>} : vector<16x32xbf16>, vector<32x32xbf16>, vector<16x32xf32> -> vector<16x32xf32>
    %c0_36 = arith.constant 0 : index
    %c0_37 = arith.constant 0 : index
    %c0_38 = arith.constant 0 : index
    %204 = vector.load %arg11[%c0_36, %c0_37, %c0_38] : memref<2x1x32xf32, #tpu.memory_space<vmem>>, vector<1x1x32xf32>
    %205 = vector.shape_cast %204 : vector<1x1x32xf32> to vector<1x32xf32>
    %206 = vector.broadcast %205 : vector<1x32xf32> to vector<16x32xf32>
    %207 = arith.addf %203, %206 : vector<16x32xf32>
    %208 = arith.addf %207, %128 : vector<16x32xf32>
    %c0_39 = arith.constant 0 : index
    %c0_40 = arith.constant 0 : index
    %c0_41 = arith.constant 0 : index
    %209 = vector.load %arg12[%c0_39, %c0_40, %c0_41] : memref<2x1x32xf32, #tpu.memory_space<vmem>>, vector<1x1x32xf32>
    %210 = vector.shape_cast %209 : vector<1x1x32xf32> to vector<1x32xf32>
    %c0_42 = arith.constant 0 : index
    %c0_43 = arith.constant 0 : index
    %c0_44 = arith.constant 0 : index
    %211 = vector.load %arg13[%c0_42, %c0_43, %c0_44] : memref<2x1x32xf32, #tpu.memory_space<vmem>>, vector<1x1x32xf32>
    %212 = vector.shape_cast %211 : vector<1x1x32xf32> to vector<1x32xf32>
    %cst_45 = arith.constant dense<0.000000e+00> : vector<16xf32>
    %213 = vector.multi_reduction <add>, %208, %cst_45 [1] : vector<16x32xf32> to vector<16xf32>
    %214 = vector.shape_cast %213 : vector<16xf32> to vector<16x1xf32>
    %cst_46 = arith.constant 3.200000e+01 : f32
    %215 = vector.broadcast %cst_46 : f32 to vector<16x1xf32>
    %216 = arith.divf %214, %215 : vector<16x1xf32>
    %217 = vector.broadcast %216 : vector<16x1xf32> to vector<16x32xf32>
    %218 = arith.subf %208, %217 : vector<16x32xf32>
    %219 = arith.mulf %218, %218 : vector<16x32xf32>
    %cst_47 = arith.constant dense<0.000000e+00> : vector<16xf32>
    %220 = vector.multi_reduction <add>, %219, %cst_47 [1] : vector<16x32xf32> to vector<16xf32>
    %221 = vector.shape_cast %220 : vector<16xf32> to vector<16x1xf32>
    %cst_48 = arith.constant 3.200000e+01 : f32
    %222 = vector.broadcast %cst_48 : f32 to vector<16x1xf32>
    %223 = arith.divf %221, %222 : vector<16x1xf32>
    %224 = vector.broadcast %216 : vector<16x1xf32> to vector<16x32xf32>
    %225 = arith.subf %208, %224 : vector<16x32xf32>
    %cst_49 = arith.constant 9.99999974E-6 : f32
    %226 = vector.broadcast %cst_49 : f32 to vector<16x1xf32>
    %227 = arith.addf %223, %226 : vector<16x1xf32>
    %228 = math.rsqrt %227 : vector<16x1xf32>
    %229 = vector.broadcast %228 : vector<16x1xf32> to vector<16x32xf32>
    %230 = arith.mulf %225, %229 : vector<16x32xf32>
    %231 = vector.broadcast %210 : vector<1x32xf32> to vector<16x32xf32>
    %232 = arith.mulf %230, %231 : vector<16x32xf32>
    %233 = vector.broadcast %212 : vector<1x32xf32> to vector<16x32xf32>
    %234 = arith.addf %232, %233 : vector<16x32xf32>
    %235 = arith.truncf %234 : vector<16x32xf32> to vector<16x32xbf16>
    %c0_50 = arith.constant 0 : index
    %c0_51 = arith.constant 0 : index
    %c0_52 = arith.constant 0 : index
    %236 = vector.load %arg14[%c0_50, %c0_51, %c0_52] : memref<2x32x64xbf16, #tpu.memory_space<vmem>>, vector<1x32x64xbf16>
    %237 = vector.shape_cast %236 : vector<1x32x64xbf16> to vector<32x64xbf16>
    %cst_53 = arith.constant dense<0.000000e+00> : vector<16x64xf32>
    %238 = tpu.matmul %235, %237, %cst_53 {dimension_numbers = #tpu.dot_dimension_numbers<[1], [0], [0], [1], [0, 0, 1, 1], [], []>} : vector<16x32xbf16>, vector<32x64xbf16>, vector<16x64xf32> -> vector<16x64xf32>
    %c0_54 = arith.constant 0 : index
    %c0_55 = arith.constant 0 : index
    %c0_56 = arith.constant 0 : index
    %239 = vector.load %arg15[%c0_54, %c0_55, %c0_56] : memref<2x1x64xf32, #tpu.memory_space<vmem>>, vector<1x1x64xf32>
    %240 = vector.shape_cast %239 : vector<1x1x64xf32> to vector<1x64xf32>
    %241 = vector.broadcast %240 : vector<1x64xf32> to vector<16x64xf32>
    %242 = arith.addf %238, %241 : vector<16x64xf32>
    %243 = arith.mulf %242, %242 : vector<16x64xf32>
    %244 = arith.mulf %242, %243 : vector<16x64xf32>
    %cst_57 = arith.constant 4.471500e-02 : f32
    %245 = vector.broadcast %cst_57 : f32 to vector<16x64xf32>
    %246 = arith.mulf %245, %244 : vector<16x64xf32>
    %247 = arith.addf %242, %246 : vector<16x64xf32>
    %cst_58 = arith.constant 0.797884583 : f32
    %248 = vector.broadcast %cst_58 : f32 to vector<16x64xf32>
    %249 = arith.mulf %248, %247 : vector<16x64xf32>
    %250 = math.tanh %249 : vector<16x64xf32>
    %cst_59 = arith.constant 1.000000e+00 : f32
    %251 = vector.broadcast %cst_59 : f32 to vector<16x64xf32>
    %252 = arith.addf %251, %250 : vector<16x64xf32>
    %cst_60 = arith.constant 5.000000e-01 : f32
    %253 = vector.broadcast %cst_60 : f32 to vector<16x64xf32>
    %254 = arith.mulf %253, %252 : vector<16x64xf32>
    %255 = arith.mulf %242, %254 : vector<16x64xf32>
    %256 = arith.truncf %255 : vector<16x64xf32> to vector<16x64xbf16>
    %c0_61 = arith.constant 0 : index
    %c0_62 = arith.constant 0 : index
    %c0_63 = arith.constant 0 : index
    %257 = vector.load %arg16[%c0_61, %c0_62, %c0_63] : memref<2x64x32xbf16, #tpu.memory_space<vmem>>, vector<1x64x32xbf16>
    %258 = vector.shape_cast %257 : vector<1x64x32xbf16> to vector<64x32xbf16>
    %cst_64 = arith.constant dense<0.000000e+00> : vector<16x32xf32>
    %259 = tpu.matmul %256, %258, %cst_64 {dimension_numbers = #tpu.dot_dimension_numbers<[1], [0], [0], [1], [0, 0, 1, 1], [], []>} : vector<16x64xbf16>, vector<64x32xbf16>, vector<16x32xf32> -> vector<16x32xf32>
    %c0_65 = arith.constant 0 : index
    %c0_66 = arith.constant 0 : index
    %c0_67 = arith.constant 0 : index
    %260 = vector.load %arg17[%c0_65, %c0_66, %c0_67] : memref<2x1x32xf32, #tpu.memory_space<vmem>>, vector<1x1x32xf32>
    %261 = vector.shape_cast %260 : vector<1x1x32xf32> to vector<1x32xf32>
    %262 = vector.broadcast %261 : vector<1x32xf32> to vector<16x32xf32>
    %263 = arith.addf %259, %262 : vector<16x32xf32>
    %264 = arith.addf %263, %234 : vector<16x32xf32>
    %c0_68 = arith.constant 0 : index
    %c0_69 = arith.constant 0 : index
    %c0_70 = arith.constant 0 : index
    %265 = vector.load %arg18[%c0_68, %c0_69, %c0_70] : memref<2x1x32xf32, #tpu.memory_space<vmem>>, vector<1x1x32xf32>
    %266 = vector.shape_cast %265 : vector<1x1x32xf32> to vector<1x32xf32>
    %c0_71 = arith.constant 0 : index
    %c0_72 = arith.constant 0 : index
    %c0_73 = arith.constant 0 : index
    %267 = vector.load %arg19[%c0_71, %c0_72, %c0_73] : memref<2x1x32xf32, #tpu.memory_space<vmem>>, vector<1x1x32xf32>
    %268 = vector.shape_cast %267 : vector<1x1x32xf32> to vector<1x32xf32>
    %cst_74 = arith.constant dense<0.000000e+00> : vector<16xf32>
    %269 = vector.multi_reduction <add>, %264, %cst_74 [1] : vector<16x32xf32> to vector<16xf32>
    %270 = vector.shape_cast %269 : vector<16xf32> to vector<16x1xf32>
    %cst_75 = arith.constant 3.200000e+01 : f32
    %271 = vector.broadcast %cst_75 : f32 to vector<16x1xf32>
    %272 = arith.divf %270, %271 : vector<16x1xf32>
    %273 = vector.broadcast %272 : vector<16x1xf32> to vector<16x32xf32>
    %274 = arith.subf %264, %273 : vector<16x32xf32>
    %275 = arith.mulf %274, %274 : vector<16x32xf32>
    %cst_76 = arith.constant dense<0.000000e+00> : vector<16xf32>
    %276 = vector.multi_reduction <add>, %275, %cst_76 [1] : vector<16x32xf32> to vector<16xf32>
    %277 = vector.shape_cast %276 : vector<16xf32> to vector<16x1xf32>
    %cst_77 = arith.constant 3.200000e+01 : f32
    %278 = vector.broadcast %cst_77 : f32 to vector<16x1xf32>
    %279 = arith.divf %277, %278 : vector<16x1xf32>
    %280 = vector.broadcast %272 : vector<16x1xf32> to vector<16x32xf32>
    %281 = arith.subf %264, %280 : vector<16x32xf32>
    %cst_78 = arith.constant 9.99999974E-6 : f32
    %282 = vector.broadcast %cst_78 : f32 to vector<16x1xf32>
    %283 = arith.addf %279, %282 : vector<16x1xf32>
    %284 = math.rsqrt %283 : vector<16x1xf32>
    %285 = vector.broadcast %284 : vector<16x1xf32> to vector<16x32xf32>
    %286 = arith.mulf %281, %285 : vector<16x32xf32>
    %287 = vector.broadcast %266 : vector<1x32xf32> to vector<16x32xf32>
    %288 = arith.mulf %286, %287 : vector<16x32xf32>
    %289 = vector.broadcast %268 : vector<1x32xf32> to vector<16x32xf32>
    %290 = arith.addf %288, %289 : vector<16x32xf32>
    %291 = arith.truncf %290 : vector<16x32xf32> to vector<16x32xbf16>
    %c1_79 = arith.constant 1 : index
    %c0_80 = arith.constant 0 : index
    %c0_81 = arith.constant 0 : index
    %292 = vector.load %arg8[%c1_79, %c0_80, %c0_81] : memref<2x32x96xbf16, #tpu.memory_space<vmem>>, vector<1x32x96xbf16>
    %293 = vector.shape_cast %292 : vector<1x32x96xbf16> to vector<32x96xbf16>
    %cst_82 = arith.constant dense<0.000000e+00> : vector<16x96xf32>
    %294 = tpu.matmul %291, %293, %cst_82 {dimension_numbers = #tpu.dot_dimension_numbers<[1], [0], [0], [1], [0, 0, 1, 1], [], []>} : vector<16x32xbf16>, vector<32x96xbf16>, vector<16x96xf32> -> vector<16x96xf32>
    %c1_83 = arith.constant 1 : index
    %c0_84 = arith.constant 0 : index
    %c0_85 = arith.constant 0 : index
    %295 = vector.load %arg9[%c1_83, %c0_84, %c0_85] : memref<2x1x96xf32, #tpu.memory_space<vmem>>, vector<1x1x96xf32>
    %296 = vector.shape_cast %295 : vector<1x1x96xf32> to vector<1x96xf32>
    %297 = vector.broadcast %296 : vector<1x96xf32> to vector<16x96xf32>
    %298 = arith.addf %294, %297 : vector<16x96xf32>
    %299 = arith.truncf %298 : vector<16x96xf32> to vector<16x96xbf16>
    %300 = vector.extract_strided_slice %299 {offsets = [0, 0], sizes = [16, 8], strides = [1, 1]} : vector<16x96xbf16> to vector<16x8xbf16>
    %301 = vector.extract_strided_slice %299 {offsets = [0, 8], sizes = [16, 8], strides = [1, 1]} : vector<16x96xbf16> to vector<16x8xbf16>
    %302 = vector.extract_strided_slice %299 {offsets = [0, 16], sizes = [16, 8], strides = [1, 1]} : vector<16x96xbf16> to vector<16x8xbf16>
    %303 = vector.extract_strided_slice %299 {offsets = [0, 24], sizes = [16, 8], strides = [1, 1]} : vector<16x96xbf16> to vector<16x8xbf16>
    %304 = vector.shape_cast %300 : vector<16x8xbf16> to vector<1x16x8xbf16>
    %305 = vector.shape_cast %301 : vector<16x8xbf16> to vector<1x16x8xbf16>
    %306 = vector.shape_cast %302 : vector<16x8xbf16> to vector<1x16x8xbf16>
    %307 = vector.shape_cast %303 : vector<16x8xbf16> to vector<1x16x8xbf16>
    %308 = tpu.concatenate %304, %305, %306, %307 in 0 : vector<1x16x8xbf16>, vector<1x16x8xbf16>, vector<1x16x8xbf16>, vector<1x16x8xbf16> -> vector<4x16x8xbf16>
    %309 = vector.extract_strided_slice %299 {offsets = [0, 32], sizes = [16, 8], strides = [1, 1]} : vector<16x96xbf16> to vector<16x8xbf16>
    %310 = vector.extract_strided_slice %299 {offsets = [0, 40], sizes = [16, 8], strides = [1, 1]} : vector<16x96xbf16> to vector<16x8xbf16>
    %311 = vector.extract_strided_slice %299 {offsets = [0, 48], sizes = [16, 8], strides = [1, 1]} : vector<16x96xbf16> to vector<16x8xbf16>
    %312 = vector.extract_strided_slice %299 {offsets = [0, 56], sizes = [16, 8], strides = [1, 1]} : vector<16x96xbf16> to vector<16x8xbf16>
    %313 = vector.shape_cast %309 : vector<16x8xbf16> to vector<1x16x8xbf16>
    %314 = vector.shape_cast %310 : vector<16x8xbf16> to vector<1x16x8xbf16>
    %315 = vector.shape_cast %311 : vector<16x8xbf16> to vector<1x16x8xbf16>
    %316 = vector.shape_cast %312 : vector<16x8xbf16> to vector<1x16x8xbf16>
    %317 = tpu.concatenate %313, %314, %315, %316 in 0 : vector<1x16x8xbf16>, vector<1x16x8xbf16>, vector<1x16x8xbf16>, vector<1x16x8xbf16> -> vector<4x16x8xbf16>
    %318 = vector.extract_strided_slice %299 {offsets = [0, 64], sizes = [16, 8], strides = [1, 1]} : vector<16x96xbf16> to vector<16x8xbf16>
    %319 = vector.extract_strided_slice %299 {offsets = [0, 72], sizes = [16, 8], strides = [1, 1]} : vector<16x96xbf16> to vector<16x8xbf16>
    %320 = vector.extract_strided_slice %299 {offsets = [0, 80], sizes = [16, 8], strides = [1, 1]} : vector<16x96xbf16> to vector<16x8xbf16>
    %321 = vector.extract_strided_slice %299 {offsets = [0, 88], sizes = [16, 8], strides = [1, 1]} : vector<16x96xbf16> to vector<16x8xbf16>
    %322 = vector.shape_cast %318 : vector<16x8xbf16> to vector<1x16x8xbf16>
    %323 = vector.shape_cast %319 : vector<16x8xbf16> to vector<1x16x8xbf16>
    %324 = vector.shape_cast %320 : vector<16x8xbf16> to vector<1x16x8xbf16>
    %325 = vector.shape_cast %321 : vector<16x8xbf16> to vector<1x16x8xbf16>
    %326 = tpu.concatenate %322, %323, %324, %325 in 0 : vector<1x16x8xbf16>, vector<1x16x8xbf16>, vector<1x16x8xbf16>, vector<1x16x8xbf16> -> vector<4x16x8xbf16>
    "tpu.trace_start"() <{level = 10 : i32, message = "hqd,hkd->hqk"}> : () -> ()
    %cst_86 = arith.constant dense<0.000000e+00> : vector<4x16x16xf32>
    %327 = tpu.matmul %308, %317, %cst_86 {dimension_numbers = #tpu.dot_dimension_numbers<[2], [2], [1], [1], [0, 0, 0, 1, 1, 1], [0], [0]>} : vector<4x16x8xbf16>, vector<4x16x8xbf16>, vector<4x16x16xf32> -> vector<4x16x16xf32>
    "tpu.trace_stop"() : () -> ()
    %cst_87 = arith.constant 0.353553385 : f32
    %328 = vector.broadcast %cst_87 : f32 to vector<4x16x16xf32>
    %329 = arith.mulf %327, %328 : vector<4x16x16xf32>
    %330 = vector.shape_cast %136 : vector<16x16xf32> to vector<1x16x16xf32>
    %331 = vector.broadcast %330 : vector<1x16x16xf32> to vector<4x16x16xf32>
    %332 = arith.addf %329, %331 : vector<4x16x16xf32>
    %cst_88 = arith.constant dense<0xFF800000> : vector<4x16xf32>
    %333 = vector.multi_reduction <maximumf>, %332, %cst_88 [2] : vector<4x16x16xf32> to vector<4x16xf32>
    %334 = vector.shape_cast %333 : vector<4x16xf32> to vector<4x16x1xf32>
    %335 = vector.broadcast %334 : vector<4x16x1xf32> to vector<4x16x16xf32>
    %336 = arith.subf %332, %335 : vector<4x16x16xf32>
    %337 = math.exp %336 : vector<4x16x16xf32>
    %cst_89 = arith.constant dense<0.000000e+00> : vector<4x16xf32>
    %338 = vector.multi_reduction <add>, %337, %cst_89 [2] : vector<4x16x16xf32> to vector<4x16xf32>
    %339 = vector.shape_cast %338 : vector<4x16xf32> to vector<4x16x1xf32>
    %340 = tpu.reciprocal %339 {approx = true} : vector<4x16x1xf32> -> vector<4x16x1xf32>
    %341 = vector.broadcast %340 : vector<4x16x1xf32> to vector<4x16x16xf32>
    %342 = arith.mulf %337, %341 : vector<4x16x16xf32>
    %343 = arith.truncf %342 : vector<4x16x16xf32> to vector<4x16x16xbf16>
    "tpu.trace_start"() <{level = 10 : i32, message = "hqk,hkd->hqd"}> : () -> ()
    %cst_90 = arith.constant dense<0.000000e+00> : vector<4x16x8xf32>
    %344 = tpu.matmul %343, %326, %cst_90 {dimension_numbers = #tpu.dot_dimension_numbers<[2], [1], [1], [2], [0, 0, 0, 1, 1, 2], [0], [0]>} : vector<4x16x16xbf16>, vector<4x16x8xbf16>, vector<4x16x8xf32> -> vector<4x16x8xf32>
    "tpu.trace_stop"() : () -> ()
    %345 = vector.extract_strided_slice %344 {offsets = [0, 0, 0], sizes = [1, 16, 8], strides = [1, 1, 1]} : vector<4x16x8xf32> to vector<1x16x8xf32>
    %346 = vector.shape_cast %345 : vector<1x16x8xf32> to vector<16x8xf32>
    %347 = vector.extract_strided_slice %344 {offsets = [1, 0, 0], sizes = [1, 16, 8], strides = [1, 1, 1]} : vector<4x16x8xf32> to vector<1x16x8xf32>
    %348 = vector.shape_cast %347 : vector<1x16x8xf32> to vector<16x8xf32>
    %349 = vector.extract_strided_slice %344 {offsets = [2, 0, 0], sizes = [1, 16, 8], strides = [1, 1, 1]} : vector<4x16x8xf32> to vector<1x16x8xf32>
    %350 = vector.shape_cast %349 : vector<1x16x8xf32> to vector<16x8xf32>
    %351 = vector.extract_strided_slice %344 {offsets = [3, 0, 0], sizes = [1, 16, 8], strides = [1, 1, 1]} : vector<4x16x8xf32> to vector<1x16x8xf32>
    %352 = vector.shape_cast %351 : vector<1x16x8xf32> to vector<16x8xf32>
    %353 = tpu.concatenate %346, %348, %350, %352 in 1 : vector<16x8xf32>, vector<16x8xf32>, vector<16x8xf32>, vector<16x8xf32> -> vector<16x32xf32>
    %354 = arith.truncf %353 : vector<16x32xf32> to vector<16x32xbf16>
    %c1_91 = arith.constant 1 : index
    %c0_92 = arith.constant 0 : index
    %c0_93 = arith.constant 0 : index
    %355 = vector.load %arg10[%c1_91, %c0_92, %c0_93] : memref<2x32x32xbf16, #tpu.memory_space<vmem>>, vector<1x32x32xbf16>
    %356 = vector.shape_cast %355 : vector<1x32x32xbf16> to vector<32x32xbf16>
    %cst_94 = arith.constant dense<0.000000e+00> : vector<16x32xf32>
    %357 = tpu.matmul %354, %356, %cst_94 {dimension_numbers = #tpu.dot_dimension_numbers<[1], [0], [0], [1], [0, 0, 1, 1], [], []>} : vector<16x32xbf16>, vector<32x32xbf16>, vector<16x32xf32> -> vector<16x32xf32>
    %c1_95 = arith.constant 1 : index
    %c0_96 = arith.constant 0 : index
    %c0_97 = arith.constant 0 : index
    %358 = vector.load %arg11[%c1_95, %c0_96, %c0_97] : memref<2x1x32xf32, #tpu.memory_space<vmem>>, vector<1x1x32xf32>
    %359 = vector.shape_cast %358 : vector<1x1x32xf32> to vector<1x32xf32>
    %360 = vector.broadcast %359 : vector<1x32xf32> to vector<16x32xf32>
    %361 = arith.addf %357, %360 : vector<16x32xf32>
    %362 = arith.addf %361, %290 : vector<16x32xf32>
    %c1_98 = arith.constant 1 : index
    %c0_99 = arith.constant 0 : index
    %c0_100 = arith.constant 0 : index
    %363 = vector.load %arg12[%c1_98, %c0_99, %c0_100] : memref<2x1x32xf32, #tpu.memory_space<vmem>>, vector<1x1x32xf32>
    %364 = vector.shape_cast %363 : vector<1x1x32xf32> to vector<1x32xf32>
    %c1_101 = arith.constant 1 : index
    %c0_102 = arith.constant 0 : index
    %c0_103 = arith.constant 0 : index
    %365 = vector.load %arg13[%c1_101, %c0_102, %c0_103] : memref<2x1x32xf32, #tpu.memory_space<vmem>>, vector<1x1x32xf32>
    %366 = vector.shape_cast %365 : vector<1x1x32xf32> to vector<1x32xf32>
    %cst_104 = arith.constant dense<0.000000e+00> : vector<16xf32>
    %367 = vector.multi_reduction <add>, %362, %cst_104 [1] : vector<16x32xf32> to vector<16xf32>
    %368 = vector.shape_cast %367 : vector<16xf32> to vector<16x1xf32>
    %cst_105 = arith.constant 3.200000e+01 : f32
    %369 = vector.broadcast %cst_105 : f32 to vector<16x1xf32>
    %370 = arith.divf %368, %369 : vector<16x1xf32>
    %371 = vector.broadcast %370 : vector<16x1xf32> to vector<16x32xf32>
    %372 = arith.subf %362, %371 : vector<16x32xf32>
    %373 = arith.mulf %372, %372 : vector<16x32xf32>
    %cst_106 = arith.constant dense<0.000000e+00> : vector<16xf32>
    %374 = vector.multi_reduction <add>, %373, %cst_106 [1] : vector<16x32xf32> to vector<16xf32>
    %375 = vector.shape_cast %374 : vector<16xf32> to vector<16x1xf32>
    %cst_107 = arith.constant 3.200000e+01 : f32
    %376 = vector.broadcast %cst_107 : f32 to vector<16x1xf32>
    %377 = arith.divf %375, %376 : vector<16x1xf32>
    %378 = vector.broadcast %370 : vector<16x1xf32> to vector<16x32xf32>
    %379 = arith.subf %362, %378 : vector<16x32xf32>
    %cst_108 = arith.constant 9.99999974E-6 : f32
    %380 = vector.broadcast %cst_108 : f32 to vector<16x1xf32>
    %381 = arith.addf %377, %380 : vector<16x1xf32>
    %382 = math.rsqrt %381 : vector<16x1xf32>
    %383 = vector.broadcast %382 : vector<16x1xf32> to vector<16x32xf32>
    %384 = arith.mulf %379, %383 : vector<16x32xf32>
    %385 = vector.broadcast %364 : vector<1x32xf32> to vector<16x32xf32>
    %386 = arith.mulf %384, %385 : vector<16x32xf32>
    %387 = vector.broadcast %366 : vector<1x32xf32> to vector<16x32xf32>
    %388 = arith.addf %386, %387 : vector<16x32xf32>
    %389 = arith.truncf %388 : vector<16x32xf32> to vector<16x32xbf16>
    %c1_109 = arith.constant 1 : index
    %c0_110 = arith.constant 0 : index
    %c0_111 = arith.constant 0 : index
    %390 = vector.load %arg14[%c1_109, %c0_110, %c0_111] : memref<2x32x64xbf16, #tpu.memory_space<vmem>>, vector<1x32x64xbf16>
    %391 = vector.shape_cast %390 : vector<1x32x64xbf16> to vector<32x64xbf16>
    %cst_112 = arith.constant dense<0.000000e+00> : vector<16x64xf32>
    %392 = tpu.matmul %389, %391, %cst_112 {dimension_numbers = #tpu.dot_dimension_numbers<[1], [0], [0], [1], [0, 0, 1, 1], [], []>} : vector<16x32xbf16>, vector<32x64xbf16>, vector<16x64xf32> -> vector<16x64xf32>
    %c1_113 = arith.constant 1 : index
    %c0_114 = arith.constant 0 : index
    %c0_115 = arith.constant 0 : index
    %393 = vector.load %arg15[%c1_113, %c0_114, %c0_115] : memref<2x1x64xf32, #tpu.memory_space<vmem>>, vector<1x1x64xf32>
    %394 = vector.shape_cast %393 : vector<1x1x64xf32> to vector<1x64xf32>
    %395 = vector.broadcast %394 : vector<1x64xf32> to vector<16x64xf32>
    %396 = arith.addf %392, %395 : vector<16x64xf32>
    %397 = arith.mulf %396, %396 : vector<16x64xf32>
    %398 = arith.mulf %396, %397 : vector<16x64xf32>
    %cst_116 = arith.constant 4.471500e-02 : f32
    %399 = vector.broadcast %cst_116 : f32 to vector<16x64xf32>
    %400 = arith.mulf %399, %398 : vector<16x64xf32>
    %401 = arith.addf %396, %400 : vector<16x64xf32>
    %cst_117 = arith.constant 0.797884583 : f32
    %402 = vector.broadcast %cst_117 : f32 to vector<16x64xf32>
    %403 = arith.mulf %402, %401 : vector<16x64xf32>
    %404 = math.tanh %403 : vector<16x64xf32>
    %cst_118 = arith.constant 1.000000e+00 : f32
    %405 = vector.broadcast %cst_118 : f32 to vector<16x64xf32>
    %406 = arith.addf %405, %404 : vector<16x64xf32>
    %cst_119 = arith.constant 5.000000e-01 : f32
    %407 = vector.broadcast %cst_119 : f32 to vector<16x64xf32>
    %408 = arith.mulf %407, %406 : vector<16x64xf32>
    %409 = arith.mulf %396, %408 : vector<16x64xf32>
    %410 = arith.truncf %409 : vector<16x64xf32> to vector<16x64xbf16>
    %c1_120 = arith.constant 1 : index
    %c0_121 = arith.constant 0 : index
    %c0_122 = arith.constant 0 : index
    %411 = vector.load %arg16[%c1_120, %c0_121, %c0_122] : memref<2x64x32xbf16, #tpu.memory_space<vmem>>, vector<1x64x32xbf16>
    %412 = vector.shape_cast %411 : vector<1x64x32xbf16> to vector<64x32xbf16>
    %cst_123 = arith.constant dense<0.000000e+00> : vector<16x32xf32>
    %413 = tpu.matmul %410, %412, %cst_123 {dimension_numbers = #tpu.dot_dimension_numbers<[1], [0], [0], [1], [0, 0, 1, 1], [], []>} : vector<16x64xbf16>, vector<64x32xbf16>, vector<16x32xf32> -> vector<16x32xf32>
    %c1_124 = arith.constant 1 : index
    %c0_125 = arith.constant 0 : index
    %c0_126 = arith.constant 0 : index
    %414 = vector.load %arg17[%c1_124, %c0_125, %c0_126] : memref<2x1x32xf32, #tpu.memory_space<vmem>>, vector<1x1x32xf32>
    %415 = vector.shape_cast %414 : vector<1x1x32xf32> to vector<1x32xf32>
    %416 = vector.broadcast %415 : vector<1x32xf32> to vector<16x32xf32>
    %417 = arith.addf %413, %416 : vector<16x32xf32>
    %418 = arith.addf %417, %388 : vector<16x32xf32>
    %c1_127 = arith.constant 1 : index
    %c0_128 = arith.constant 0 : index
    %c0_129 = arith.constant 0 : index
    %419 = vector.load %arg18[%c1_127, %c0_128, %c0_129] : memref<2x1x32xf32, #tpu.memory_space<vmem>>, vector<1x1x32xf32>
    %420 = vector.shape_cast %419 : vector<1x1x32xf32> to vector<1x32xf32>
    %c1_130 = arith.constant 1 : index
    %c0_131 = arith.constant 0 : index
    %c0_132 = arith.constant 0 : index
    %421 = vector.load %arg19[%c1_130, %c0_131, %c0_132] : memref<2x1x32xf32, #tpu.memory_space<vmem>>, vector<1x1x32xf32>
    %422 = vector.shape_cast %421 : vector<1x1x32xf32> to vector<1x32xf32>
    %cst_133 = arith.constant dense<0.000000e+00> : vector<16xf32>
    %423 = vector.multi_reduction <add>, %418, %cst_133 [1] : vector<16x32xf32> to vector<16xf32>
    %424 = vector.shape_cast %423 : vector<16xf32> to vector<16x1xf32>
    %cst_134 = arith.constant 3.200000e+01 : f32
    %425 = vector.broadcast %cst_134 : f32 to vector<16x1xf32>
    %426 = arith.divf %424, %425 : vector<16x1xf32>
    %427 = vector.broadcast %426 : vector<16x1xf32> to vector<16x32xf32>
    %428 = arith.subf %418, %427 : vector<16x32xf32>
    %429 = arith.mulf %428, %428 : vector<16x32xf32>
    %cst_135 = arith.constant dense<0.000000e+00> : vector<16xf32>
    %430 = vector.multi_reduction <add>, %429, %cst_135 [1] : vector<16x32xf32> to vector<16xf32>
    %431 = vector.shape_cast %430 : vector<16xf32> to vector<16x1xf32>
    %cst_136 = arith.constant 3.200000e+01 : f32
    %432 = vector.broadcast %cst_136 : f32 to vector<16x1xf32>
    %433 = arith.divf %431, %432 : vector<16x1xf32>
    %434 = vector.broadcast %426 : vector<16x1xf32> to vector<16x32xf32>
    %435 = arith.subf %418, %434 : vector<16x32xf32>
    %cst_137 = arith.constant 9.99999974E-6 : f32
    %436 = vector.broadcast %cst_137 : f32 to vector<16x1xf32>
    %437 = arith.addf %433, %436 : vector<16x1xf32>
    %438 = math.rsqrt %437 : vector<16x1xf32>
    %439 = vector.broadcast %438 : vector<16x1xf32> to vector<16x32xf32>
    %440 = arith.mulf %435, %439 : vector<16x32xf32>
    %441 = vector.broadcast %420 : vector<1x32xf32> to vector<16x32xf32>
    %442 = arith.mulf %440, %441 : vector<16x32xf32>
    %443 = vector.broadcast %422 : vector<1x32xf32> to vector<16x32xf32>
    %444 = arith.addf %442, %443 : vector<16x32xf32>
    %445 = vector.extract_strided_slice %444 {offsets = [0, 0], sizes = [1, 32], strides = [1, 1]} : vector<16x32xf32> to vector<1x32xf32>
    %c0_138 = arith.constant 0 : index
    %c0_139 = arith.constant 0 : index
    %c0_140 = arith.constant 0 : index
    %446 = vector.load %arg20[%c0_138, %c0_139, %c0_140] : memref<2x1x32xf32, #tpu.memory_space<vmem>>, vector<1x1x32xf32>
    %447 = vector.shape_cast %446 : vector<1x1x32xf32> to vector<1x32xf32>
    %448 = vector.shape_cast %445 : vector<1x32xf32> to vector<1x1x32xf32>
    tpu.vector_store %arg20[%c0_138, %c0_139, %c0_140], %448 {strides = array<i32>} : memref<2x1x32xf32, #tpu.memory_space<vmem>>, vector<1x1x32xf32>,
    %c2_i32_141 = arith.constant 2 : i32
    %449 = arith.muli %arg0, %c2_i32_141 : i32
    %c1_i32 = arith.constant 1 : i32
    %450 = arith.addi %449, %c1_i32 : i32
    %451 = arith.index_cast %450 : i32 to index
    %c0_142 = arith.constant 0 : index
    %452 = memref.load %arg1[%451, %c0_142] : memref<2x16xi32, #tpu.memory_space<smem>>
    %453 = vector.broadcast %452 : i32 to vector<1x128xi32>
    %454 = arith.cmpi eq, %0, %453 : vector<1x128xi32>
    %455 = arith.extui %454 : vector<1x128xi1> to vector<1x128xi32>
    %456 = arith.sitofp %455 : vector<1x128xi32> to vector<1x128xf32>
    %457 = arith.index_cast %450 : i32 to index
    %c1_143 = arith.constant 1 : index
    %458 = memref.load %arg1[%457, %c1_143] : memref<2x16xi32, #tpu.memory_space<smem>>
    %459 = vector.broadcast %458 : i32 to vector<1x128xi32>
    %460 = arith.cmpi eq, %0, %459 : vector<1x128xi32>
    %461 = arith.extui %460 : vector<1x128xi1> to vector<1x128xi32>
    %462 = arith.sitofp %461 : vector<1x128xi32> to vector<1x128xf32>
    %463 = arith.index_cast %450 : i32 to index
    %c2_144 = arith.constant 2 : index
    %464 = memref.load %arg1[%463, %c2_144] : memref<2x16xi32, #tpu.memory_space<smem>>
    %465 = vector.broadcast %464 : i32 to vector<1x128xi32>
    %466 = arith.cmpi eq, %0, %465 : vector<1x128xi32>
    %467 = arith.extui %466 : vector<1x128xi1> to vector<1x128xi32>
    %468 = arith.sitofp %467 : vector<1x128xi32> to vector<1x128xf32>
    %469 = arith.index_cast %450 : i32 to index
    %c3_145 = arith.constant 3 : index
    %470 = memref.load %arg1[%469, %c3_145] : memref<2x16xi32, #tpu.memory_space<smem>>
    %471 = vector.broadcast %470 : i32 to vector<1x128xi32>
    %472 = arith.cmpi eq, %0, %471 : vector<1x128xi32>
    %473 = arith.extui %472 : vector<1x128xi1> to vector<1x128xi32>
    %474 = arith.sitofp %473 : vector<1x128xi32> to vector<1x128xf32>
    %475 = arith.index_cast %450 : i32 to index
    %c4_146 = arith.constant 4 : index
    %476 = memref.load %arg1[%475, %c4_146] : memref<2x16xi32, #tpu.memory_space<smem>>
    %477 = vector.broadcast %476 : i32 to vector<1x128xi32>
    %478 = arith.cmpi eq, %0, %477 : vector<1x128xi32>
    %479 = arith.extui %478 : vector<1x128xi1> to vector<1x128xi32>
    %480 = arith.sitofp %479 : vector<1x128xi32> to vector<1x128xf32>
    %481 = arith.index_cast %450 : i32 to index
    %c5_147 = arith.constant 5 : index
    %482 = memref.load %arg1[%481, %c5_147] : memref<2x16xi32, #tpu.memory_space<smem>>
    %483 = vector.broadcast %482 : i32 to vector<1x128xi32>
    %484 = arith.cmpi eq, %0, %483 : vector<1x128xi32>
    %485 = arith.extui %484 : vector<1x128xi1> to vector<1x128xi32>
    %486 = arith.sitofp %485 : vector<1x128xi32> to vector<1x128xf32>
    %487 = arith.index_cast %450 : i32 to index
    %c6_148 = arith.constant 6 : index
    %488 = memref.load %arg1[%487, %c6_148] : memref<2x16xi32, #tpu.memory_space<smem>>
    %489 = vector.broadcast %488 : i32 to vector<1x128xi32>
    %490 = arith.cmpi eq, %0, %489 : vector<1x128xi32>
    %491 = arith.extui %490 : vector<1x128xi1> to vector<1x128xi32>
    %492 = arith.sitofp %491 : vector<1x128xi32> to vector<1x128xf32>
    %493 = arith.index_cast %450 : i32 to index
    %c7_149 = arith.constant 7 : index
    %494 = memref.load %arg1[%493, %c7_149] : memref<2x16xi32, #tpu.memory_space<smem>>
    %495 = vector.broadcast %494 : i32 to vector<1x128xi32>
    %496 = arith.cmpi eq, %0, %495 : vector<1x128xi32>
    %497 = arith.extui %496 : vector<1x128xi1> to vector<1x128xi32>
    %498 = arith.sitofp %497 : vector<1x128xi32> to vector<1x128xf32>
    %499 = arith.index_cast %450 : i32 to index
    %c8_150 = arith.constant 8 : index
    %500 = memref.load %arg1[%499, %c8_150] : memref<2x16xi32, #tpu.memory_space<smem>>
    %501 = vector.broadcast %500 : i32 to vector<1x128xi32>
    %502 = arith.cmpi eq, %0, %501 : vector<1x128xi32>
    %503 = arith.extui %502 : vector<1x128xi1> to vector<1x128xi32>
    %504 = arith.sitofp %503 : vector<1x128xi32> to vector<1x128xf32>
    %505 = arith.index_cast %450 : i32 to index
    %c9_151 = arith.constant 9 : index
    %506 = memref.load %arg1[%505, %c9_151] : memref<2x16xi32, #tpu.memory_space<smem>>
    %507 = vector.broadcast %506 : i32 to vector<1x128xi32>
    %508 = arith.cmpi eq, %0, %507 : vector<1x128xi32>
    %509 = arith.extui %508 : vector<1x128xi1> to vector<1x128xi32>
    %510 = arith.sitofp %509 : vector<1x128xi32> to vector<1x128xf32>
    %511 = arith.index_cast %450 : i32 to index
    %c10_152 = arith.constant 10 : index
    %512 = memref.load %arg1[%511, %c10_152] : memref<2x16xi32, #tpu.memory_space<smem>>
    %513 = vector.broadcast %512 : i32 to vector<1x128xi32>
    %514 = arith.cmpi eq, %0, %513 : vector<1x128xi32>
    %515 = arith.extui %514 : vector<1x128xi1> to vector<1x128xi32>
    %516 = arith.sitofp %515 : vector<1x128xi32> to vector<1x128xf32>
    %517 = arith.index_cast %450 : i32 to index
    %c11_153 = arith.constant 11 : index
    %518 = memref.load %arg1[%517, %c11_153] : memref<2x16xi32, #tpu.memory_space<smem>>
    %519 = vector.broadcast %518 : i32 to vector<1x128xi32>
    %520 = arith.cmpi eq, %0, %519 : vector<1x128xi32>
    %521 = arith.extui %520 : vector<1x128xi1> to vector<1x128xi32>
    %522 = arith.sitofp %521 : vector<1x128xi32> to vector<1x128xf32>
    %523 = arith.index_cast %450 : i32 to index
    %c12_154 = arith.constant 12 : index
    %524 = memref.load %arg1[%523, %c12_154] : memref<2x16xi32, #tpu.memory_space<smem>>
    %525 = vector.broadcast %524 : i32 to vector<1x128xi32>
    %526 = arith.cmpi eq, %0, %525 : vector<1x128xi32>
    %527 = arith.extui %526 : vector<1x128xi1> to vector<1x128xi32>
    %528 = arith.sitofp %527 : vector<1x128xi32> to vector<1x128xf32>
    %529 = arith.index_cast %450 : i32 to index
    %c13_155 = arith.constant 13 : index
    %530 = memref.load %arg1[%529, %c13_155] : memref<2x16xi32, #tpu.memory_space<smem>>
    %531 = vector.broadcast %530 : i32 to vector<1x128xi32>
    %532 = arith.cmpi eq, %0, %531 : vector<1x128xi32>
    %533 = arith.extui %532 : vector<1x128xi1> to vector<1x128xi32>
    %534 = arith.sitofp %533 : vector<1x128xi32> to vector<1x128xf32>
    %535 = arith.index_cast %450 : i32 to index
    %c14_156 = arith.constant 14 : index
    %536 = memref.load %arg1[%535, %c14_156] : memref<2x16xi32, #tpu.memory_space<smem>>
    %537 = vector.broadcast %536 : i32 to vector<1x128xi32>
    %538 = arith.cmpi eq, %0, %537 : vector<1x128xi32>
    %539 = arith.extui %538 : vector<1x128xi1> to vector<1x128xi32>
    %540 = arith.sitofp %539 : vector<1x128xi32> to vector<1x128xf32>
    %541 = arith.index_cast %450 : i32 to index
    %c15_157 = arith.constant 15 : index
    %542 = memref.load %arg1[%541, %c15_157] : memref<2x16xi32, #tpu.memory_space<smem>>
    %543 = vector.broadcast %542 : i32 to vector<1x128xi32>
    %544 = arith.cmpi eq, %0, %543 : vector<1x128xi32>
    %545 = arith.extui %544 : vector<1x128xi1> to vector<1x128xi32>
    %546 = arith.sitofp %545 : vector<1x128xi32> to vector<1x128xf32>
    %547 = tpu.concatenate %456, %462, %468, %474, %480, %486, %492, %498, %504, %510, %516, %522, %528, %534, %540, %546 in 0 : vector<1x128xf32>, vector<1x128xf32>, vector<1x128xf32>, vector<1x128xf32>, vector<1x128xf32>, vector<1x128xf32>, vector<1x128xf32>, vector<1x128xf32>, vector<1x128xf32>, vector<1x128xf32>, vector<1x128xf32>, vector<1x128xf32>, vector<1x128xf32>, vector<1x128xf32>, vector<1x128xf32>, vector<1x128xf32> -> vector<16x128xf32>
    %cst_158 = arith.constant dense<0.000000e+00> : vector<16x32xf32>
    %548 = tpu.matmul %547, %1, %cst_158 {dimension_numbers = #tpu.dot_dimension_numbers<[1], [0], [0], [1], [0, 0, 1, 1], [], []>} : vector<16x128xf32>, vector<128x32xf32>, vector<16x32xf32> -> vector<16x32xf32>
    %549 = arith.addf %548, %2 : vector<16x32xf32>
    %c0_159 = arith.constant 0 : index
    %c0_160 = arith.constant 0 : index
    %550 = vector.load %arg6[%c0_159, %c0_160] : memref<1x32xf32, #tpu.memory_space<vmem>>, vector<1x32xf32>
    %c0_161 = arith.constant 0 : index
    %c0_162 = arith.constant 0 : index
    %551 = vector.load %arg7[%c0_161, %c0_162] : memref<1x32xf32, #tpu.memory_space<vmem>>, vector<1x32xf32>
    %cst_163 = arith.constant dense<0.000000e+00> : vector<16xf32>
    %552 = vector.multi_reduction <add>, %549, %cst_163 [1] : vector<16x32xf32> to vector<16xf32>
    %553 = vector.shape_cast %552 : vector<16xf32> to vector<16x1xf32>
    %cst_164 = arith.constant 3.200000e+01 : f32
    %554 = vector.broadcast %cst_164 : f32 to vector<16x1xf32>
    %555 = arith.divf %553, %554 : vector<16x1xf32>
    %556 = vector.broadcast %555 : vector<16x1xf32> to vector<16x32xf32>
    %557 = arith.subf %549, %556 : vector<16x32xf32>
    %558 = arith.mulf %557, %557 : vector<16x32xf32>
    %cst_165 = arith.constant dense<0.000000e+00> : vector<16xf32>
    %559 = vector.multi_reduction <add>, %558, %cst_165 [1] : vector<16x32xf32> to vector<16xf32>
    %560 = vector.shape_cast %559 : vector<16xf32> to vector<16x1xf32>
    %cst_166 = arith.constant 3.200000e+01 : f32
    %561 = vector.broadcast %cst_166 : f32 to vector<16x1xf32>
    %562 = arith.divf %560, %561 : vector<16x1xf32>
    %563 = vector.broadcast %555 : vector<16x1xf32> to vector<16x32xf32>
    %564 = arith.subf %549, %563 : vector<16x32xf32>
    %cst_167 = arith.constant 9.99999974E-6 : f32
    %565 = vector.broadcast %cst_167 : f32 to vector<16x1xf32>
    %566 = arith.addf %562, %565 : vector<16x1xf32>
    %567 = math.rsqrt %566 : vector<16x1xf32>
    %568 = vector.broadcast %567 : vector<16x1xf32> to vector<16x32xf32>
    %569 = arith.mulf %564, %568 : vector<16x32xf32>
    %570 = vector.broadcast %550 : vector<1x32xf32> to vector<16x32xf32>
    %571 = arith.mulf %569, %570 : vector<16x32xf32>
    %572 = vector.broadcast %551 : vector<1x32xf32> to vector<16x32xf32>
    %573 = arith.addf %571, %572 : vector<16x32xf32>
    %c1_168 = arith.constant 1 : index
    %c0_169 = arith.constant 0 : index
    %c0_170 = arith.constant 0 : index
    %574 = vector.load %arg2[%c1_168, %c0_169, %c0_170] : memref<2x1x16xf32, #tpu.memory_space<vmem>>, vector<1x1x16xf32>
    %575 = vector.shape_cast %574 : vector<1x1x16xf32> to vector<1x16xf32>
    %cst_171 = arith.constant 0.000000e+00 : f32
    %576 = vector.broadcast %cst_171 : f32 to vector<1x16xf32>
    %577 = arith.cmpf ogt, %575, %576 : vector<1x16xf32>
    %cst_172 = arith.constant -1.000000e+09 : f32
    %578 = vector.shape_cast %577 : vector<1x16xi1> to vector<1x16xi1>
    %579 = vector.broadcast %578 : vector<1x16xi1> to vector<16x16xi1>
    %580 = vector.broadcast %cst_172 : f32 to vector<16x16xf32>
    %581 = arith.select %579, %3, %580 : vector<16x16xi1>, vector<16x16xf32>
    %582 = arith.truncf %573 : vector<16x32xf32> to vector<16x32xbf16>
    %c0_173 = arith.constant 0 : index
    %c0_174 = arith.constant 0 : index
    %c0_175 = arith.constant 0 : index
    %583 = vector.load %arg8[%c0_173, %c0_174, %c0_175] : memref<2x32x96xbf16, #tpu.memory_space<vmem>>, vector<1x32x96xbf16>
    %584 = vector.shape_cast %583 : vector<1x32x96xbf16> to vector<32x96xbf16>
    %cst_176 = arith.constant dense<0.000000e+00> : vector<16x96xf32>
    %585 = tpu.matmul %582, %584, %cst_176 {dimension_numbers = #tpu.dot_dimension_numbers<[1], [0], [0], [1], [0, 0, 1, 1], [], []>} : vector<16x32xbf16>, vector<32x96xbf16>, vector<16x96xf32> -> vector<16x96xf32>
    %c0_177 = arith.constant 0 : index
    %c0_178 = arith.constant 0 : index
    %c0_179 = arith.constant 0 : index
    %586 = vector.load %arg9[%c0_177, %c0_178, %c0_179] : memref<2x1x96xf32, #tpu.memory_space<vmem>>, vector<1x1x96xf32>
    %587 = vector.shape_cast %586 : vector<1x1x96xf32> to vector<1x96xf32>
    %588 = vector.broadcast %587 : vector<1x96xf32> to vector<16x96xf32>
    %589 = arith.addf %585, %588 : vector<16x96xf32>
    %590 = arith.truncf %589 : vector<16x96xf32> to vector<16x96xbf16>
    %591 = vector.extract_strided_slice %590 {offsets = [0, 0], sizes = [16, 8], strides = [1, 1]} : vector<16x96xbf16> to vector<16x8xbf16>
    %592 = vector.extract_strided_slice %590 {offsets = [0, 8], sizes = [16, 8], strides = [1, 1]} : vector<16x96xbf16> to vector<16x8xbf16>
    %593 = vector.extract_strided_slice %590 {offsets = [0, 16], sizes = [16, 8], strides = [1, 1]} : vector<16x96xbf16> to vector<16x8xbf16>
    %594 = vector.extract_strided_slice %590 {offsets = [0, 24], sizes = [16, 8], strides = [1, 1]} : vector<16x96xbf16> to vector<16x8xbf16>
    %595 = vector.shape_cast %591 : vector<16x8xbf16> to vector<1x16x8xbf16>
    %596 = vector.shape_cast %592 : vector<16x8xbf16> to vector<1x16x8xbf16>
    %597 = vector.shape_cast %593 : vector<16x8xbf16> to vector<1x16x8xbf16>
    %598 = vector.shape_cast %594 : vector<16x8xbf16> to vector<1x16x8xbf16>
    %599 = tpu.concatenate %595, %596, %597, %598 in 0 : vector<1x16x8xbf16>, vector<1x16x8xbf16>, vector<1x16x8xbf16>, vector<1x16x8xbf16> -> vector<4x16x8xbf16>
    %600 = vector.extract_strided_slice %590 {offsets = [0, 32], sizes = [16, 8], strides = [1, 1]} : vector<16x96xbf16> to vector<16x8xbf16>
    %601 = vector.extract_strided_slice %590 {offsets = [0, 40], sizes = [16, 8], strides = [1, 1]} : vector<16x96xbf16> to vector<16x8xbf16>
    %602 = vector.extract_strided_slice %590 {offsets = [0, 48], sizes = [16, 8], strides = [1, 1]} : vector<16x96xbf16> to vector<16x8xbf16>
    %603 = vector.extract_strided_slice %590 {offsets = [0, 56], sizes = [16, 8], strides = [1, 1]} : vector<16x96xbf16> to vector<16x8xbf16>
    %604 = vector.shape_cast %600 : vector<16x8xbf16> to vector<1x16x8xbf16>
    %605 = vector.shape_cast %601 : vector<16x8xbf16> to vector<1x16x8xbf16>
    %606 = vector.shape_cast %602 : vector<16x8xbf16> to vector<1x16x8xbf16>
    %607 = vector.shape_cast %603 : vector<16x8xbf16> to vector<1x16x8xbf16>
    %608 = tpu.concatenate %604, %605, %606, %607 in 0 : vector<1x16x8xbf16>, vector<1x16x8xbf16>, vector<1x16x8xbf16>, vector<1x16x8xbf16> -> vector<4x16x8xbf16>
    %609 = vector.extract_strided_slice %590 {offsets = [0, 64], sizes = [16, 8], strides = [1, 1]} : vector<16x96xbf16> to vector<16x8xbf16>
    %610 = vector.extract_strided_slice %590 {offsets = [0, 72], sizes = [16, 8], strides = [1, 1]} : vector<16x96xbf16> to vector<16x8xbf16>
    %611 = vector.extract_strided_slice %590 {offsets = [0, 80], sizes = [16, 8], strides = [1, 1]} : vector<16x96xbf16> to vector<16x8xbf16>
    %612 = vector.extract_strided_slice %590 {offsets = [0, 88], sizes = [16, 8], strides = [1, 1]} : vector<16x96xbf16> to vector<16x8xbf16>
    %613 = vector.shape_cast %609 : vector<16x8xbf16> to vector<1x16x8xbf16>
    %614 = vector.shape_cast %610 : vector<16x8xbf16> to vector<1x16x8xbf16>
    %615 = vector.shape_cast %611 : vector<16x8xbf16> to vector<1x16x8xbf16>
    %616 = vector.shape_cast %612 : vector<16x8xbf16> to vector<1x16x8xbf16>
    %617 = tpu.concatenate %613, %614, %615, %616 in 0 : vector<1x16x8xbf16>, vector<1x16x8xbf16>, vector<1x16x8xbf16>, vector<1x16x8xbf16> -> vector<4x16x8xbf16>
    "tpu.trace_start"() <{level = 10 : i32, message = "hqd,hkd->hqk"}> : () -> ()
    %cst_180 = arith.constant dense<0.000000e+00> : vector<4x16x16xf32>
    %618 = tpu.matmul %599, %608, %cst_180 {dimension_numbers = #tpu.dot_dimension_numbers<[2], [2], [1], [1], [0, 0, 0, 1, 1, 1], [0], [0]>} : vector<4x16x8xbf16>, vector<4x16x8xbf16>, vector<4x16x16xf32> -> vector<4x16x16xf32>
    "tpu.trace_stop"() : () -> ()
    %cst_181 = arith.constant 0.353553385 : f32
    %619 = vector.broadcast %cst_181 : f32 to vector<4x16x16xf32>
    %620 = arith.mulf %618, %619 : vector<4x16x16xf32>
    %621 = vector.shape_cast %581 : vector<16x16xf32> to vector<1x16x16xf32>
    %622 = vector.broadcast %621 : vector<1x16x16xf32> to vector<4x16x16xf32>
    %623 = arith.addf %620, %622 : vector<4x16x16xf32>
    %cst_182 = arith.constant dense<0xFF800000> : vector<4x16xf32>
    %624 = vector.multi_reduction <maximumf>, %623, %cst_182 [2] : vector<4x16x16xf32> to vector<4x16xf32>
    %625 = vector.shape_cast %624 : vector<4x16xf32> to vector<4x16x1xf32>
    %626 = vector.broadcast %625 : vector<4x16x1xf32> to vector<4x16x16xf32>
    %627 = arith.subf %623, %626 : vector<4x16x16xf32>
    %628 = math.exp %627 : vector<4x16x16xf32>
    %cst_183 = arith.constant dense<0.000000e+00> : vector<4x16xf32>
    %629 = vector.multi_reduction <add>, %628, %cst_183 [2] : vector<4x16x16xf32> to vector<4x16xf32>
    %630 = vector.shape_cast %629 : vector<4x16xf32> to vector<4x16x1xf32>
    %631 = tpu.reciprocal %630 {approx = true} : vector<4x16x1xf32> -> vector<4x16x1xf32>
    %632 = vector.broadcast %631 : vector<4x16x1xf32> to vector<4x16x16xf32>
    %633 = arith.mulf %628, %632 : vector<4x16x16xf32>
    %634 = arith.truncf %633 : vector<4x16x16xf32> to vector<4x16x16xbf16>
    "tpu.trace_start"() <{level = 10 : i32, message = "hqk,hkd->hqd"}> : () -> ()
    %cst_184 = arith.constant dense<0.000000e+00> : vector<4x16x8xf32>
    %635 = tpu.matmul %634, %617, %cst_184 {dimension_numbers = #tpu.dot_dimension_numbers<[2], [1], [1], [2], [0, 0, 0, 1, 1, 2], [0], [0]>} : vector<4x16x16xbf16>, vector<4x16x8xbf16>, vector<4x16x8xf32> -> vector<4x16x8xf32>
    "tpu.trace_stop"() : () -> ()
    %636 = vector.extract_strided_slice %635 {offsets = [0, 0, 0], sizes = [1, 16, 8], strides = [1, 1, 1]} : vector<4x16x8xf32> to vector<1x16x8xf32>
    %637 = vector.shape_cast %636 : vector<1x16x8xf32> to vector<16x8xf32>
    %638 = vector.extract_strided_slice %635 {offsets = [1, 0, 0], sizes = [1, 16, 8], strides = [1, 1, 1]} : vector<4x16x8xf32> to vector<1x16x8xf32>
    %639 = vector.shape_cast %638 : vector<1x16x8xf32> to vector<16x8xf32>
    %640 = vector.extract_strided_slice %635 {offsets = [2, 0, 0], sizes = [1, 16, 8], strides = [1, 1, 1]} : vector<4x16x8xf32> to vector<1x16x8xf32>
    %641 = vector.shape_cast %640 : vector<1x16x8xf32> to vector<16x8xf32>
    %642 = vector.extract_strided_slice %635 {offsets = [3, 0, 0], sizes = [1, 16, 8], strides = [1, 1, 1]} : vector<4x16x8xf32> to vector<1x16x8xf32>
    %643 = vector.shape_cast %642 : vector<1x16x8xf32> to vector<16x8xf32>
    %644 = tpu.concatenate %637, %639, %641, %643 in 1 : vector<16x8xf32>, vector<16x8xf32>, vector<16x8xf32>, vector<16x8xf32> -> vector<16x32xf32>
    %645 = arith.truncf %644 : vector<16x32xf32> to vector<16x32xbf16>
    %c0_185 = arith.constant 0 : index
    %c0_186 = arith.constant 0 : index
    %c0_187 = arith.constant 0 : index
    %646 = vector.load %arg10[%c0_185, %c0_186, %c0_187] : memref<2x32x32xbf16, #tpu.memory_space<vmem>>, vector<1x32x32xbf16>
    %647 = vector.shape_cast %646 : vector<1x32x32xbf16> to vector<32x32xbf16>
    %cst_188 = arith.constant dense<0.000000e+00> : vector<16x32xf32>
    %648 = tpu.matmul %645, %647, %cst_188 {dimension_numbers = #tpu.dot_dimension_numbers<[1], [0], [0], [1], [0, 0, 1, 1], [], []>} : vector<16x32xbf16>, vector<32x32xbf16>, vector<16x32xf32> -> vector<16x32xf32>
    %c0_189 = arith.constant 0 : index
    %c0_190 = arith.constant 0 : index
    %c0_191 = arith.constant 0 : index
    %649 = vector.load %arg11[%c0_189, %c0_190, %c0_191] : memref<2x1x32xf32, #tpu.memory_space<vmem>>, vector<1x1x32xf32>
    %650 = vector.shape_cast %649 : vector<1x1x32xf32> to vector<1x32xf32>
    %651 = vector.broadcast %650 : vector<1x32xf32> to vector<16x32xf32>
    %652 = arith.addf %648, %651 : vector<16x32xf32>
    %653 = arith.addf %652, %573 : vector<16x32xf32>
    %c0_192 = arith.constant 0 : index
    %c0_193 = arith.constant 0 : index
    %c0_194 = arith.constant 0 : index
    %654 = vector.load %arg12[%c0_192, %c0_193, %c0_194] : memref<2x1x32xf32, #tpu.memory_space<vmem>>, vector<1x1x32xf32>
    %655 = vector.shape_cast %654 : vector<1x1x32xf32> to vector<1x32xf32>
    %c0_195 = arith.constant 0 : index
    %c0_196 = arith.constant 0 : index
    %c0_197 = arith.constant 0 : index
    %656 = vector.load %arg13[%c0_195, %c0_196, %c0_197] : memref<2x1x32xf32, #tpu.memory_space<vmem>>, vector<1x1x32xf32>
    %657 = vector.shape_cast %656 : vector<1x1x32xf32> to vector<1x32xf32>
    %cst_198 = arith.constant dense<0.000000e+00> : vector<16xf32>
    %658 = vector.multi_reduction <add>, %653, %cst_198 [1] : vector<16x32xf32> to vector<16xf32>
    %659 = vector.shape_cast %658 : vector<16xf32> to vector<16x1xf32>
    %cst_199 = arith.constant 3.200000e+01 : f32
    %660 = vector.broadcast %cst_199 : f32 to vector<16x1xf32>
    %661 = arith.divf %659, %660 : vector<16x1xf32>
    %662 = vector.broadcast %661 : vector<16x1xf32> to vector<16x32xf32>
    %663 = arith.subf %653, %662 : vector<16x32xf32>
    %664 = arith.mulf %663, %663 : vector<16x32xf32>
    %cst_200 = arith.constant dense<0.000000e+00> : vector<16xf32>
    %665 = vector.multi_reduction <add>, %664, %cst_200 [1] : vector<16x32xf32> to vector<16xf32>
    %666 = vector.shape_cast %665 : vector<16xf32> to vector<16x1xf32>
    %cst_201 = arith.constant 3.200000e+01 : f32
    %667 = vector.broadcast %cst_201 : f32 to vector<16x1xf32>
    %668 = arith.divf %666, %667 : vector<16x1xf32>
    %669 = vector.broadcast %661 : vector<16x1xf32> to vector<16x32xf32>
    %670 = arith.subf %653, %669 : vector<16x32xf32>
    %cst_202 = arith.constant 9.99999974E-6 : f32
    %671 = vector.broadcast %cst_202 : f32 to vector<16x1xf32>
    %672 = arith.addf %668, %671 : vector<16x1xf32>
    %673 = math.rsqrt %672 : vector<16x1xf32>
    %674 = vector.broadcast %673 : vector<16x1xf32> to vector<16x32xf32>
    %675 = arith.mulf %670, %674 : vector<16x32xf32>
    %676 = vector.broadcast %655 : vector<1x32xf32> to vector<16x32xf32>
    %677 = arith.mulf %675, %676 : vector<16x32xf32>
    %678 = vector.broadcast %657 : vector<1x32xf32> to vector<16x32xf32>
    %679 = arith.addf %677, %678 : vector<16x32xf32>
    %680 = arith.truncf %679 : vector<16x32xf32> to vector<16x32xbf16>
    %c0_203 = arith.constant 0 : index
    %c0_204 = arith.constant 0 : index
    %c0_205 = arith.constant 0 : index
    %681 = vector.load %arg14[%c0_203, %c0_204, %c0_205] : memref<2x32x64xbf16, #tpu.memory_space<vmem>>, vector<1x32x64xbf16>
    %682 = vector.shape_cast %681 : vector<1x32x64xbf16> to vector<32x64xbf16>
    %cst_206 = arith.constant dense<0.000000e+00> : vector<16x64xf32>
    %683 = tpu.matmul %680, %682, %cst_206 {dimension_numbers = #tpu.dot_dimension_numbers<[1], [0], [0], [1], [0, 0, 1, 1], [], []>} : vector<16x32xbf16>, vector<32x64xbf16>, vector<16x64xf32> -> vector<16x64xf32>
    %c0_207 = arith.constant 0 : index
    %c0_208 = arith.constant 0 : index
    %c0_209 = arith.constant 0 : index
    %684 = vector.load %arg15[%c0_207, %c0_208, %c0_209] : memref<2x1x64xf32, #tpu.memory_space<vmem>>, vector<1x1x64xf32>
    %685 = vector.shape_cast %684 : vector<1x1x64xf32> to vector<1x64xf32>
    %686 = vector.broadcast %685 : vector<1x64xf32> to vector<16x64xf32>
    %687 = arith.addf %683, %686 : vector<16x64xf32>
    %688 = arith.mulf %687, %687 : vector<16x64xf32>
    %689 = arith.mulf %687, %688 : vector<16x64xf32>
    %cst_210 = arith.constant 4.471500e-02 : f32
    %690 = vector.broadcast %cst_210 : f32 to vector<16x64xf32>
    %691 = arith.mulf %690, %689 : vector<16x64xf32>
    %692 = arith.addf %687, %691 : vector<16x64xf32>
    %cst_211 = arith.constant 0.797884583 : f32
    %693 = vector.broadcast %cst_211 : f32 to vector<16x64xf32>
    %694 = arith.mulf %693, %692 : vector<16x64xf32>
    %695 = math.tanh %694 : vector<16x64xf32>
    %cst_212 = arith.constant 1.000000e+00 : f32
    %696 = vector.broadcast %cst_212 : f32 to vector<16x64xf32>
    %697 = arith.addf %696, %695 : vector<16x64xf32>
    %cst_213 = arith.constant 5.000000e-01 : f32
    %698 = vector.broadcast %cst_213 : f32 to vector<16x64xf32>
    %699 = arith.mulf %698, %697 : vector<16x64xf32>
    %700 = arith.mulf %687, %699 : vector<16x64xf32>
    %701 = arith.truncf %700 : vector<16x64xf32> to vector<16x64xbf16>
    %c0_214 = arith.constant 0 : index
    %c0_215 = arith.constant 0 : index
    %c0_216 = arith.constant 0 : index
    %702 = vector.load %arg16[%c0_214, %c0_215, %c0_216] : memref<2x64x32xbf16, #tpu.memory_space<vmem>>, vector<1x64x32xbf16>
    %703 = vector.shape_cast %702 : vector<1x64x32xbf16> to vector<64x32xbf16>
    %cst_217 = arith.constant dense<0.000000e+00> : vector<16x32xf32>
    %704 = tpu.matmul %701, %703, %cst_217 {dimension_numbers = #tpu.dot_dimension_numbers<[1], [0], [0], [1], [0, 0, 1, 1], [], []>} : vector<16x64xbf16>, vector<64x32xbf16>, vector<16x32xf32> -> vector<16x32xf32>
    %c0_218 = arith.constant 0 : index
    %c0_219 = arith.constant 0 : index
    %c0_220 = arith.constant 0 : index
    %705 = vector.load %arg17[%c0_218, %c0_219, %c0_220] : memref<2x1x32xf32, #tpu.memory_space<vmem>>, vector<1x1x32xf32>
    %706 = vector.shape_cast %705 : vector<1x1x32xf32> to vector<1x32xf32>
    %707 = vector.broadcast %706 : vector<1x32xf32> to vector<16x32xf32>
    %708 = arith.addf %704, %707 : vector<16x32xf32>
    %709 = arith.addf %708, %679 : vector<16x32xf32>
    %c0_221 = arith.constant 0 : index
    %c0_222 = arith.constant 0 : index
    %c0_223 = arith.constant 0 : index
    %710 = vector.load %arg18[%c0_221, %c0_222, %c0_223] : memref<2x1x32xf32, #tpu.memory_space<vmem>>, vector<1x1x32xf32>
    %711 = vector.shape_cast %710 : vector<1x1x32xf32> to vector<1x32xf32>
    %c0_224 = arith.constant 0 : index
    %c0_225 = arith.constant 0 : index
    %c0_226 = arith.constant 0 : index
    %712 = vector.load %arg19[%c0_224, %c0_225, %c0_226] : memref<2x1x32xf32, #tpu.memory_space<vmem>>, vector<1x1x32xf32>
    %713 = vector.shape_cast %712 : vector<1x1x32xf32> to vector<1x32xf32>
    %cst_227 = arith.constant dense<0.000000e+00> : vector<16xf32>
    %714 = vector.multi_reduction <add>, %709, %cst_227 [1] : vector<16x32xf32> to vector<16xf32>
    %715 = vector.shape_cast %714 : vector<16xf32> to vector<16x1xf32>
    %cst_228 = arith.constant 3.200000e+01 : f32
    %716 = vector.broadcast %cst_228 : f32 to vector<16x1xf32>
    %717 = arith.divf %715, %716 : vector<16x1xf32>
    %718 = vector.broadcast %717 : vector<16x1xf32> to vector<16x32xf32>
    %719 = arith.subf %709, %718 : vector<16x32xf32>
    %720 = arith.mulf %719, %719 : vector<16x32xf32>
    %cst_229 = arith.constant dense<0.000000e+00> : vector<16xf32>
    %721 = vector.multi_reduction <add>, %720, %cst_229 [1] : vector<16x32xf32> to vector<16xf32>
    %722 = vector.shape_cast %721 : vector<16xf32> to vector<16x1xf32>
    %cst_230 = arith.constant 3.200000e+01 : f32
    %723 = vector.broadcast %cst_230 : f32 to vector<16x1xf32>
    %724 = arith.divf %722, %723 : vector<16x1xf32>
    %725 = vector.broadcast %717 : vector<16x1xf32> to vector<16x32xf32>
    %726 = arith.subf %709, %725 : vector<16x32xf32>
    %cst_231 = arith.constant 9.99999974E-6 : f32
    %727 = vector.broadcast %cst_231 : f32 to vector<16x1xf32>
    %728 = arith.addf %724, %727 : vector<16x1xf32>
    %729 = math.rsqrt %728 : vector<16x1xf32>
    %730 = vector.broadcast %729 : vector<16x1xf32> to vector<16x32xf32>
    %731 = arith.mulf %726, %730 : vector<16x32xf32>
    %732 = vector.broadcast %711 : vector<1x32xf32> to vector<16x32xf32>
    %733 = arith.mulf %731, %732 : vector<16x32xf32>
    %734 = vector.broadcast %713 : vector<1x32xf32> to vector<16x32xf32>
    %735 = arith.addf %733, %734 : vector<16x32xf32>
    %736 = arith.truncf %735 : vector<16x32xf32> to vector<16x32xbf16>
    %c1_232 = arith.constant 1 : index
    %c0_233 = arith.constant 0 : index
    %c0_234 = arith.constant 0 : index
    %737 = vector.load %arg8[%c1_232, %c0_233, %c0_234] : memref<2x32x96xbf16, #tpu.memory_space<vmem>>, vector<1x32x96xbf16>
    %738 = vector.shape_cast %737 : vector<1x32x96xbf16> to vector<32x96xbf16>
    %cst_235 = arith.constant dense<0.000000e+00> : vector<16x96xf32>
    %739 = tpu.matmul %736, %738, %cst_235 {dimension_numbers = #tpu.dot_dimension_numbers<[1], [0], [0], [1], [0, 0, 1, 1], [], []>} : vector<16x32xbf16>, vector<32x96xbf16>, vector<16x96xf32> -> vector<16x96xf32>
    %c1_236 = arith.constant 1 : index
    %c0_237 = arith.constant 0 : index
    %c0_238 = arith.constant 0 : index
    %740 = vector.load %arg9[%c1_236, %c0_237, %c0_238] : memref<2x1x96xf32, #tpu.memory_space<vmem>>, vector<1x1x96xf32>
    %741 = vector.shape_cast %740 : vector<1x1x96xf32> to vector<1x96xf32>
    %742 = vector.broadcast %741 : vector<1x96xf32> to vector<16x96xf32>
    %743 = arith.addf %739, %742 : vector<16x96xf32>
    %744 = arith.truncf %743 : vector<16x96xf32> to vector<16x96xbf16>
    %745 = vector.extract_strided_slice %744 {offsets = [0, 0], sizes = [16, 8], strides = [1, 1]} : vector<16x96xbf16> to vector<16x8xbf16>
    %746 = vector.extract_strided_slice %744 {offsets = [0, 8], sizes = [16, 8], strides = [1, 1]} : vector<16x96xbf16> to vector<16x8xbf16>
    %747 = vector.extract_strided_slice %744 {offsets = [0, 16], sizes = [16, 8], strides = [1, 1]} : vector<16x96xbf16> to vector<16x8xbf16>
    %748 = vector.extract_strided_slice %744 {offsets = [0, 24], sizes = [16, 8], strides = [1, 1]} : vector<16x96xbf16> to vector<16x8xbf16>
    %749 = vector.shape_cast %745 : vector<16x8xbf16> to vector<1x16x8xbf16>
    %750 = vector.shape_cast %746 : vector<16x8xbf16> to vector<1x16x8xbf16>
    %751 = vector.shape_cast %747 : vector<16x8xbf16> to vector<1x16x8xbf16>
    %752 = vector.shape_cast %748 : vector<16x8xbf16> to vector<1x16x8xbf16>
    %753 = tpu.concatenate %749, %750, %751, %752 in 0 : vector<1x16x8xbf16>, vector<1x16x8xbf16>, vector<1x16x8xbf16>, vector<1x16x8xbf16> -> vector<4x16x8xbf16>
    %754 = vector.extract_strided_slice %744 {offsets = [0, 32], sizes = [16, 8], strides = [1, 1]} : vector<16x96xbf16> to vector<16x8xbf16>
    %755 = vector.extract_strided_slice %744 {offsets = [0, 40], sizes = [16, 8], strides = [1, 1]} : vector<16x96xbf16> to vector<16x8xbf16>
    %756 = vector.extract_strided_slice %744 {offsets = [0, 48], sizes = [16, 8], strides = [1, 1]} : vector<16x96xbf16> to vector<16x8xbf16>
    %757 = vector.extract_strided_slice %744 {offsets = [0, 56], sizes = [16, 8], strides = [1, 1]} : vector<16x96xbf16> to vector<16x8xbf16>
    %758 = vector.shape_cast %754 : vector<16x8xbf16> to vector<1x16x8xbf16>
    %759 = vector.shape_cast %755 : vector<16x8xbf16> to vector<1x16x8xbf16>
    %760 = vector.shape_cast %756 : vector<16x8xbf16> to vector<1x16x8xbf16>
    %761 = vector.shape_cast %757 : vector<16x8xbf16> to vector<1x16x8xbf16>
    %762 = tpu.concatenate %758, %759, %760, %761 in 0 : vector<1x16x8xbf16>, vector<1x16x8xbf16>, vector<1x16x8xbf16>, vector<1x16x8xbf16> -> vector<4x16x8xbf16>
    %763 = vector.extract_strided_slice %744 {offsets = [0, 64], sizes = [16, 8], strides = [1, 1]} : vector<16x96xbf16> to vector<16x8xbf16>
    %764 = vector.extract_strided_slice %744 {offsets = [0, 72], sizes = [16, 8], strides = [1, 1]} : vector<16x96xbf16> to vector<16x8xbf16>
    %765 = vector.extract_strided_slice %744 {offsets = [0, 80], sizes = [16, 8], strides = [1, 1]} : vector<16x96xbf16> to vector<16x8xbf16>
    %766 = vector.extract_strided_slice %744 {offsets = [0, 88], sizes = [16, 8], strides = [1, 1]} : vector<16x96xbf16> to vector<16x8xbf16>
    %767 = vector.shape_cast %763 : vector<16x8xbf16> to vector<1x16x8xbf16>
    %768 = vector.shape_cast %764 : vector<16x8xbf16> to vector<1x16x8xbf16>
    %769 = vector.shape_cast %765 : vector<16x8xbf16> to vector<1x16x8xbf16>
    %770 = vector.shape_cast %766 : vector<16x8xbf16> to vector<1x16x8xbf16>
    %771 = tpu.concatenate %767, %768, %769, %770 in 0 : vector<1x16x8xbf16>, vector<1x16x8xbf16>, vector<1x16x8xbf16>, vector<1x16x8xbf16> -> vector<4x16x8xbf16>
    "tpu.trace_start"() <{level = 10 : i32, message = "hqd,hkd->hqk"}> : () -> ()
    %cst_239 = arith.constant dense<0.000000e+00> : vector<4x16x16xf32>
    %772 = tpu.matmul %753, %762, %cst_239 {dimension_numbers = #tpu.dot_dimension_numbers<[2], [2], [1], [1], [0, 0, 0, 1, 1, 1], [0], [0]>} : vector<4x16x8xbf16>, vector<4x16x8xbf16>, vector<4x16x16xf32> -> vector<4x16x16xf32>
    "tpu.trace_stop"() : () -> ()
    %cst_240 = arith.constant 0.353553385 : f32
    %773 = vector.broadcast %cst_240 : f32 to vector<4x16x16xf32>
    %774 = arith.mulf %772, %773 : vector<4x16x16xf32>
    %775 = vector.shape_cast %581 : vector<16x16xf32> to vector<1x16x16xf32>
    %776 = vector.broadcast %775 : vector<1x16x16xf32> to vector<4x16x16xf32>
    %777 = arith.addf %774, %776 : vector<4x16x16xf32>
    %cst_241 = arith.constant dense<0xFF800000> : vector<4x16xf32>
    %778 = vector.multi_reduction <maximumf>, %777, %cst_241 [2] : vector<4x16x16xf32> to vector<4x16xf32>
    %779 = vector.shape_cast %778 : vector<4x16xf32> to vector<4x16x1xf32>
    %780 = vector.broadcast %779 : vector<4x16x1xf32> to vector<4x16x16xf32>
    %781 = arith.subf %777, %780 : vector<4x16x16xf32>
    %782 = math.exp %781 : vector<4x16x16xf32>
    %cst_242 = arith.constant dense<0.000000e+00> : vector<4x16xf32>
    %783 = vector.multi_reduction <add>, %782, %cst_242 [2] : vector<4x16x16xf32> to vector<4x16xf32>
    %784 = vector.shape_cast %783 : vector<4x16xf32> to vector<4x16x1xf32>
    %785 = tpu.reciprocal %784 {approx = true} : vector<4x16x1xf32> -> vector<4x16x1xf32>
    %786 = vector.broadcast %785 : vector<4x16x1xf32> to vector<4x16x16xf32>
    %787 = arith.mulf %782, %786 : vector<4x16x16xf32>
    %788 = arith.truncf %787 : vector<4x16x16xf32> to vector<4x16x16xbf16>
    "tpu.trace_start"() <{level = 10 : i32, message = "hqk,hkd->hqd"}> : () -> ()
    %cst_243 = arith.constant dense<0.000000e+00> : vector<4x16x8xf32>
    %789 = tpu.matmul %788, %771, %cst_243 {dimension_numbers = #tpu.dot_dimension_numbers<[2], [1], [1], [2], [0, 0, 0, 1, 1, 2], [0], [0]>} : vector<4x16x16xbf16>, vector<4x16x8xbf16>, vector<4x16x8xf32> -> vector<4x16x8xf32>
    "tpu.trace_stop"() : () -> ()
    %790 = vector.extract_strided_slice %789 {offsets = [0, 0, 0], sizes = [1, 16, 8], strides = [1, 1, 1]} : vector<4x16x8xf32> to vector<1x16x8xf32>
    %791 = vector.shape_cast %790 : vector<1x16x8xf32> to vector<16x8xf32>
    %792 = vector.extract_strided_slice %789 {offsets = [1, 0, 0], sizes = [1, 16, 8], strides = [1, 1, 1]} : vector<4x16x8xf32> to vector<1x16x8xf32>
    %793 = vector.shape_cast %792 : vector<1x16x8xf32> to vector<16x8xf32>
    %794 = vector.extract_strided_slice %789 {offsets = [2, 0, 0], sizes = [1, 16, 8], strides = [1, 1, 1]} : vector<4x16x8xf32> to vector<1x16x8xf32>
    %795 = vector.shape_cast %794 : vector<1x16x8xf32> to vector<16x8xf32>
    %796 = vector.extract_strided_slice %789 {offsets = [3, 0, 0], sizes = [1, 16, 8], strides = [1, 1, 1]} : vector<4x16x8xf32> to vector<1x16x8xf32>
    %797 = vector.shape_cast %796 : vector<1x16x8xf32> to vector<16x8xf32>
    %798 = tpu.concatenate %791, %793, %795, %797 in 1 : vector<16x8xf32>, vector<16x8xf32>, vector<16x8xf32>, vector<16x8xf32> -> vector<16x32xf32>
    %799 = arith.truncf %798 : vector<16x32xf32> to vector<16x32xbf16>
    %c1_244 = arith.constant 1 : index
    %c0_245 = arith.constant 0 : index
    %c0_246 = arith.constant 0 : index
    %800 = vector.load %arg10[%c1_244, %c0_245, %c0_246] : memref<2x32x32xbf16, #tpu.memory_space<vmem>>, vector<1x32x32xbf16>
    %801 = vector.shape_cast %800 : vector<1x32x32xbf16> to vector<32x32xbf16>
    %cst_247 = arith.constant dense<0.000000e+00> : vector<16x32xf32>
    %802 = tpu.matmul %799, %801, %cst_247 {dimension_numbers = #tpu.dot_dimension_numbers<[1], [0], [0], [1], [0, 0, 1, 1], [], []>} : vector<16x32xbf16>, vector<32x32xbf16>, vector<16x32xf32> -> vector<16x32xf32>
    %c1_248 = arith.constant 1 : index
    %c0_249 = arith.constant 0 : index
    %c0_250 = arith.constant 0 : index
    %803 = vector.load %arg11[%c1_248, %c0_249, %c0_250] : memref<2x1x32xf32, #tpu.memory_space<vmem>>, vector<1x1x32xf32>
    %804 = vector.shape_cast %803 : vector<1x1x32xf32> to vector<1x32xf32>
    %805 = vector.broadcast %804 : vector<1x32xf32> to vector<16x32xf32>
    %806 = arith.addf %802, %805 : vector<16x32xf32>
    %807 = arith.addf %806, %735 : vector<16x32xf32>
    %c1_251 = arith.constant 1 : index
    %c0_252 = arith.constant 0 : index
    %c0_253 = arith.constant 0 : index
    %808 = vector.load %arg12[%c1_251, %c0_252, %c0_253] : memref<2x1x32xf32, #tpu.memory_space<vmem>>, vector<1x1x32xf32>
    %809 = vector.shape_cast %808 : vector<1x1x32xf32> to vector<1x32xf32>
    %c1_254 = arith.constant 1 : index
    %c0_255 = arith.constant 0 : index
    %c0_256 = arith.constant 0 : index
    %810 = vector.load %arg13[%c1_254, %c0_255, %c0_256] : memref<2x1x32xf32, #tpu.memory_space<vmem>>, vector<1x1x32xf32>
    %811 = vector.shape_cast %810 : vector<1x1x32xf32> to vector<1x32xf32>
    %cst_257 = arith.constant dense<0.000000e+00> : vector<16xf32>
    %812 = vector.multi_reduction <add>, %807, %cst_257 [1] : vector<16x32xf32> to vector<16xf32>
    %813 = vector.shape_cast %812 : vector<16xf32> to vector<16x1xf32>
    %cst_258 = arith.constant 3.200000e+01 : f32
    %814 = vector.broadcast %cst_258 : f32 to vector<16x1xf32>
    %815 = arith.divf %813, %814 : vector<16x1xf32>
    %816 = vector.broadcast %815 : vector<16x1xf32> to vector<16x32xf32>
    %817 = arith.subf %807, %816 : vector<16x32xf32>
    %818 = arith.mulf %817, %817 : vector<16x32xf32>
    %cst_259 = arith.constant dense<0.000000e+00> : vector<16xf32>
    %819 = vector.multi_reduction <add>, %818, %cst_259 [1] : vector<16x32xf32> to vector<16xf32>
    %820 = vector.shape_cast %819 : vector<16xf32> to vector<16x1xf32>
    %cst_260 = arith.constant 3.200000e+01 : f32
    %821 = vector.broadcast %cst_260 : f32 to vector<16x1xf32>
    %822 = arith.divf %820, %821 : vector<16x1xf32>
    %823 = vector.broadcast %815 : vector<16x1xf32> to vector<16x32xf32>
    %824 = arith.subf %807, %823 : vector<16x32xf32>
    %cst_261 = arith.constant 9.99999974E-6 : f32
    %825 = vector.broadcast %cst_261 : f32 to vector<16x1xf32>
    %826 = arith.addf %822, %825 : vector<16x1xf32>
    %827 = math.rsqrt %826 : vector<16x1xf32>
    %828 = vector.broadcast %827 : vector<16x1xf32> to vector<16x32xf32>
    %829 = arith.mulf %824, %828 : vector<16x32xf32>
    %830 = vector.broadcast %809 : vector<1x32xf32> to vector<16x32xf32>
    %831 = arith.mulf %829, %830 : vector<16x32xf32>
    %832 = vector.broadcast %811 : vector<1x32xf32> to vector<16x32xf32>
    %833 = arith.addf %831, %832 : vector<16x32xf32>
    %834 = arith.truncf %833 : vector<16x32xf32> to vector<16x32xbf16>
    %c1_262 = arith.constant 1 : index
    %c0_263 = arith.constant 0 : index
    %c0_264 = arith.constant 0 : index
    %835 = vector.load %arg14[%c1_262, %c0_263, %c0_264] : memref<2x32x64xbf16, #tpu.memory_space<vmem>>, vector<1x32x64xbf16>
    %836 = vector.shape_cast %835 : vector<1x32x64xbf16> to vector<32x64xbf16>
    %cst_265 = arith.constant dense<0.000000e+00> : vector<16x64xf32>
    %837 = tpu.matmul %834, %836, %cst_265 {dimension_numbers = #tpu.dot_dimension_numbers<[1], [0], [0], [1], [0, 0, 1, 1], [], []>} : vector<16x32xbf16>, vector<32x64xbf16>, vector<16x64xf32> -> vector<16x64xf32>
    %c1_266 = arith.constant 1 : index
    %c0_267 = arith.constant 0 : index
    %c0_268 = arith.constant 0 : index
    %838 = vector.load %arg15[%c1_266, %c0_267, %c0_268] : memref<2x1x64xf32, #tpu.memory_space<vmem>>, vector<1x1x64xf32>
    %839 = vector.shape_cast %838 : vector<1x1x64xf32> to vector<1x64xf32>
    %840 = vector.broadcast %839 : vector<1x64xf32> to vector<16x64xf32>
    %841 = arith.addf %837, %840 : vector<16x64xf32>
    %842 = arith.mulf %841, %841 : vector<16x64xf32>
    %843 = arith.mulf %841, %842 : vector<16x64xf32>
    %cst_269 = arith.constant 4.471500e-02 : f32
    %844 = vector.broadcast %cst_269 : f32 to vector<16x64xf32>
    %845 = arith.mulf %844, %843 : vector<16x64xf32>
    %846 = arith.addf %841, %845 : vector<16x64xf32>
    %cst_270 = arith.constant 0.797884583 : f32
    %847 = vector.broadcast %cst_270 : f32 to vector<16x64xf32>
    %848 = arith.mulf %847, %846 : vector<16x64xf32>
    %849 = math.tanh %848 : vector<16x64xf32>
    %cst_271 = arith.constant 1.000000e+00 : f32
    %850 = vector.broadcast %cst_271 : f32 to vector<16x64xf32>
    %851 = arith.addf %850, %849 : vector<16x64xf32>
    %cst_272 = arith.constant 5.000000e-01 : f32
    %852 = vector.broadcast %cst_272 : f32 to vector<16x64xf32>
    %853 = arith.mulf %852, %851 : vector<16x64xf32>
    %854 = arith.mulf %841, %853 : vector<16x64xf32>
    %855 = arith.truncf %854 : vector<16x64xf32> to vector<16x64xbf16>
    %c1_273 = arith.constant 1 : index
    %c0_274 = arith.constant 0 : index
    %c0_275 = arith.constant 0 : index
    %856 = vector.load %arg16[%c1_273, %c0_274, %c0_275] : memref<2x64x32xbf16, #tpu.memory_space<vmem>>, vector<1x64x32xbf16>
    %857 = vector.shape_cast %856 : vector<1x64x32xbf16> to vector<64x32xbf16>
    %cst_276 = arith.constant dense<0.000000e+00> : vector<16x32xf32>
    %858 = tpu.matmul %855, %857, %cst_276 {dimension_numbers = #tpu.dot_dimension_numbers<[1], [0], [0], [1], [0, 0, 1, 1], [], []>} : vector<16x64xbf16>, vector<64x32xbf16>, vector<16x32xf32> -> vector<16x32xf32>
    %c1_277 = arith.constant 1 : index
    %c0_278 = arith.constant 0 : index
    %c0_279 = arith.constant 0 : index
    %859 = vector.load %arg17[%c1_277, %c0_278, %c0_279] : memref<2x1x32xf32, #tpu.memory_space<vmem>>, vector<1x1x32xf32>
    %860 = vector.shape_cast %859 : vector<1x1x32xf32> to vector<1x32xf32>
    %861 = vector.broadcast %860 : vector<1x32xf32> to vector<16x32xf32>
    %862 = arith.addf %858, %861 : vector<16x32xf32>
    %863 = arith.addf %862, %833 : vector<16x32xf32>
    %c1_280 = arith.constant 1 : index
    %c0_281 = arith.constant 0 : index
    %c0_282 = arith.constant 0 : index
    %864 = vector.load %arg18[%c1_280, %c0_281, %c0_282] : memref<2x1x32xf32, #tpu.memory_space<vmem>>, vector<1x1x32xf32>
    %865 = vector.shape_cast %864 : vector<1x1x32xf32> to vector<1x32xf32>
    %c1_283 = arith.constant 1 : index
    %c0_284 = arith.constant 0 : index
    %c0_285 = arith.constant 0 : index
    %866 = vector.load %arg19[%c1_283, %c0_284, %c0_285] : memref<2x1x32xf32, #tpu.memory_space<vmem>>, vector<1x1x32xf32>
    %867 = vector.shape_cast %866 : vector<1x1x32xf32> to vector<1x32xf32>
    %cst_286 = arith.constant dense<0.000000e+00> : vector<16xf32>
    %868 = vector.multi_reduction <add>, %863, %cst_286 [1] : vector<16x32xf32> to vector<16xf32>
    %869 = vector.shape_cast %868 : vector<16xf32> to vector<16x1xf32>
    %cst_287 = arith.constant 3.200000e+01 : f32
    %870 = vector.broadcast %cst_287 : f32 to vector<16x1xf32>
    %871 = arith.divf %869, %870 : vector<16x1xf32>
    %872 = vector.broadcast %871 : vector<16x1xf32> to vector<16x32xf32>
    %873 = arith.subf %863, %872 : vector<16x32xf32>
    %874 = arith.mulf %873, %873 : vector<16x32xf32>
    %cst_288 = arith.constant dense<0.000000e+00> : vector<16xf32>
    %875 = vector.multi_reduction <add>, %874, %cst_288 [1] : vector<16x32xf32> to vector<16xf32>
    %876 = vector.shape_cast %875 : vector<16xf32> to vector<16x1xf32>
    %cst_289 = arith.constant 3.200000e+01 : f32
    %877 = vector.broadcast %cst_289 : f32 to vector<16x1xf32>
    %878 = arith.divf %876, %877 : vector<16x1xf32>
    %879 = vector.broadcast %871 : vector<16x1xf32> to vector<16x32xf32>
    %880 = arith.subf %863, %879 : vector<16x32xf32>
    %cst_290 = arith.constant 9.99999974E-6 : f32
    %881 = vector.broadcast %cst_290 : f32 to vector<16x1xf32>
    %882 = arith.addf %878, %881 : vector<16x1xf32>
    %883 = math.rsqrt %882 : vector<16x1xf32>
    %884 = vector.broadcast %883 : vector<16x1xf32> to vector<16x32xf32>
    %885 = arith.mulf %880, %884 : vector<16x32xf32>
    %886 = vector.broadcast %865 : vector<1x32xf32> to vector<16x32xf32>
    %887 = arith.mulf %885, %886 : vector<16x32xf32>
    %888 = vector.broadcast %867 : vector<1x32xf32> to vector<16x32xf32>
    %889 = arith.addf %887, %888 : vector<16x32xf32>
    %890 = vector.extract_strided_slice %889 {offsets = [0, 0], sizes = [1, 32], strides = [1, 1]} : vector<16x32xf32> to vector<1x32xf32>
    %c1_291 = arith.constant 1 : index
    %c0_292 = arith.constant 0 : index
    %c0_293 = arith.constant 0 : index
    %891 = vector.load %arg20[%c1_291, %c0_292, %c0_293] : memref<2x1x32xf32, #tpu.memory_space<vmem>>, vector<1x1x32xf32>
    %892 = vector.shape_cast %891 : vector<1x1x32xf32> to vector<1x32xf32>
    %893 = vector.shape_cast %890 : vector<1x32xf32> to vector<1x1x32xf32>
    tpu.vector_store %arg20[%c1_291, %c0_292, %c0_293], %893 {strides = array<i32>} : memref<2x1x32xf32, #tpu.memory_space<vmem>>, vector<1x1x32xf32>,
    return
  }
  func.func @transform_0(%arg0: i32, %arg1: memref<2x16xi32, #tpu.memory_space<smem>>) -> (i32, i32, i32) {
    %c0_i32 = arith.constant 0 : i32
    %c0_i32_0 = arith.constant 0 : i32
    %c0_i32_1 = arith.constant 0 : i32
    return %arg0, %c0_i32, %c0_i32_0 : i32, i32, i32
  }
  func.func @transform_1(%arg0: i32, %arg1: memref<2x16xi32, #tpu.memory_space<smem>>) -> (i32, i32) {
    %c0_i32 = arith.constant 0 : i32
    %c0_i32_0 = arith.constant 0 : i32
    %c0_i32_1 = arith.constant 0 : i32
    return %c0_i32, %c0_i32_0 : i32, i32
  }
  func.func @transform_2(%arg0: i32, %arg1: memref<2x16xi32, #tpu.memory_space<smem>>) -> (i32, i32) {
    %c0_i32 = arith.constant 0 : i32
    %c0_i32_0 = arith.constant 0 : i32
    %c0_i32_1 = arith.constant 0 : i32
    return %c0_i32, %c0_i32_0 : i32, i32
  }
  func.func @transform_3(%arg0: i32, %arg1: memref<2x16xi32, #tpu.memory_space<smem>>) -> (i32, i32) {
    %c0_i32 = arith.constant 0 : i32
    %c0_i32_0 = arith.constant 0 : i32
    %c0_i32_1 = arith.constant 0 : i32
    return %c0_i32, %c0_i32_0 : i32, i32
  }
  func.func @transform_4(%arg0: i32, %arg1: memref<2x16xi32, #tpu.memory_space<smem>>) -> (i32, i32) {
    %c0_i32 = arith.constant 0 : i32
    %c0_i32_0 = arith.constant 0 : i32
    %c0_i32_1 = arith.constant 0 : i32
    return %c0_i32, %c0_i32_0 : i32, i32
  }
  func.func @transform_5(%arg0: i32, %arg1: memref<2x16xi32, #tpu.memory_space<smem>>) -> (i32, i32) {
    %c0_i32 = arith.constant 0 : i32
    %c0_i32_0 = arith.constant 0 : i32
    %c0_i32_1 = arith.constant 0 : i32
    return %c0_i32, %c0_i32_0 : i32, i32
  }
  func.func @transform_6(%arg0: i32, %arg1: memref<2x16xi32, #tpu.memory_space<smem>>) -> (i32, i32, i32) {
    %c0_i32 = arith.constant 0 : i32
    %c0_i32_0 = arith.constant 0 : i32
    %c0_i32_1 = arith.constant 0 : i32
    %c0_i32_2 = arith.constant 0 : i32
    return %c0_i32, %c0_i32_0, %c0_i32_1 : i32, i32, i32
  }
  func.func @transform_7(%arg0: i32, %arg1: memref<2x16xi32, #tpu.memory_space<smem>>) -> (i32, i32, i32) {
    %c0_i32 = arith.constant 0 : i32
    %c0_i32_0 = arith.constant 0 : i32
    %c0_i32_1 = arith.constant 0 : i32
    %c0_i32_2 = arith.constant 0 : i32
    return %c0_i32, %c0_i32_0, %c0_i32_1 : i32, i32, i32
  }
  func.func @transform_8(%arg0: i32, %arg1: memref<2x16xi32, #tpu.memory_space<smem>>) -> (i32, i32, i32) {
    %c0_i32 = arith.constant 0 : i32
    %c0_i32_0 = arith.constant 0 : i32
    %c0_i32_1 = arith.constant 0 : i32
    %c0_i32_2 = arith.constant 0 : i32
    return %c0_i32, %c0_i32_0, %c0_i32_1 : i32, i32, i32
  }
  func.func @transform_9(%arg0: i32, %arg1: memref<2x16xi32, #tpu.memory_space<smem>>) -> (i32, i32, i32) {
    %c0_i32 = arith.constant 0 : i32
    %c0_i32_0 = arith.constant 0 : i32
    %c0_i32_1 = arith.constant 0 : i32
    %c0_i32_2 = arith.constant 0 : i32
    return %c0_i32, %c0_i32_0, %c0_i32_1 : i32, i32, i32
  }
  func.func @transform_10(%arg0: i32, %arg1: memref<2x16xi32, #tpu.memory_space<smem>>) -> (i32, i32, i32) {
    %c0_i32 = arith.constant 0 : i32
    %c0_i32_0 = arith.constant 0 : i32
    %c0_i32_1 = arith.constant 0 : i32
    %c0_i32_2 = arith.constant 0 : i32
    return %c0_i32, %c0_i32_0, %c0_i32_1 : i32, i32, i32
  }
  func.func @transform_11(%arg0: i32, %arg1: memref<2x16xi32, #tpu.memory_space<smem>>) -> (i32, i32, i32) {
    %c0_i32 = arith.constant 0 : i32
    %c0_i32_0 = arith.constant 0 : i32
    %c0_i32_1 = arith.constant 0 : i32
    %c0_i32_2 = arith.constant 0 : i32
    return %c0_i32, %c0_i32_0, %c0_i32_1 : i32, i32, i32
  }
  func.func @transform_12(%arg0: i32, %arg1: memref<2x16xi32, #tpu.memory_space<smem>>) -> (i32, i32, i32) {
    %c0_i32 = arith.constant 0 : i32
    %c0_i32_0 = arith.constant 0 : i32
    %c0_i32_1 = arith.constant 0 : i32
    %c0_i32_2 = arith.constant 0 : i32
    return %c0_i32, %c0_i32_0, %c0_i32_1 : i32, i32, i32
  }
  func.func @transform_13(%arg0: i32, %arg1: memref<2x16xi32, #tpu.memory_space<smem>>) -> (i32, i32, i32) {
    %c0_i32 = arith.constant 0 : i32
    %c0_i32_0 = arith.constant 0 : i32
    %c0_i32_1 = arith.constant 0 : i32
    %c0_i32_2 = arith.constant 0 : i32
    return %c0_i32, %c0_i32_0, %c0_i32_1 : i32, i32, i32
  }
  func.func @transform_14(%arg0: i32, %arg1: memref<2x16xi32, #tpu.memory_space<smem>>) -> (i32, i32, i32) {
    %c0_i32 = arith.constant 0 : i32
    %c0_i32_0 = arith.constant 0 : i32
    %c0_i32_1 = arith.constant 0 : i32
    %c0_i32_2 = arith.constant 0 : i32
    return %c0_i32, %c0_i32_0, %c0_i32_1 : i32, i32, i32
  }
  func.func @transform_15(%arg0: i32, %arg1: memref<2x16xi32, #tpu.memory_space<smem>>) -> (i32, i32, i32) {
    %c0_i32 = arith.constant 0 : i32
    %c0_i32_0 = arith.constant 0 : i32
    %c0_i32_1 = arith.constant 0 : i32
    %c0_i32_2 = arith.constant 0 : i32
    return %c0_i32, %c0_i32_0, %c0_i32_1 : i32, i32, i32
  }
  func.func @transform_16(%arg0: i32, %arg1: memref<2x16xi32, #tpu.memory_space<smem>>) -> (i32, i32, i32) {
    %c0_i32 = arith.constant 0 : i32
    %c0_i32_0 = arith.constant 0 : i32
    %c0_i32_1 = arith.constant 0 : i32
    %c0_i32_2 = arith.constant 0 : i32
    return %c0_i32, %c0_i32_0, %c0_i32_1 : i32, i32, i32
  }
  func.func @transform_17(%arg0: i32, %arg1: memref<2x16xi32, #tpu.memory_space<smem>>) -> (i32, i32, i32) {
    %c0_i32 = arith.constant 0 : i32
    %c0_i32_0 = arith.constant 0 : i32
    %c0_i32_1 = arith.constant 0 : i32
    %c0_i32_2 = arith.constant 0 : i32
    return %c0_i32, %c0_i32_0, %c0_i32_1 : i32, i32, i32
  }
  func.func @transform_18(%arg0: i32, %arg1: memref<2x16xi32, #tpu.memory_space<smem>>) -> (i32, i32, i32) {
    %c0_i32 = arith.constant 0 : i32
    %c0_i32_0 = arith.constant 0 : i32
    %c0_i32_1 = arith.constant 0 : i32
    return %arg0, %c0_i32, %c0_i32_0 : i32, i32, i32
  }
}

</mosaic_0001>

<bundles_post_ra>
// kernel: longformer_forward.1
= control target key start
LH: loop header
LB: loop body
LE: loop exit
PB: predicated region body
PF: predicated region fallthrough
CT: control target
= control target key end

     0   :  { %s6721_s0 = inlined_call_operand.vmem [shape: s32[2,16], index: 0, kind: input, shape index: {}]   ;;  %s6722_s1 = inlined_call_operand.vmem [shape: f32[2,1,16], index: 1, kind: input, shape index: {}]   ;;  %s6723_s2 = inlined_call_operand.vmem [shape: f32[16,16], index: 2, kind: input, shape index: {}]   ;;  %s6724_s3 = inlined_call_operand.vmem [shape: f32[128,32], index: 3, kind: input, shape index: {}]   ;;  %s6725_s4 = inlined_call_operand.vmem [shape: f32[16,32], index: 4, kind: input, shape index: {}]   ;;  %s6726_s5 = inlined_call_operand.vmem [shape: f32[1,32], index: 5, kind: input, shape index: {}]   ;;  %s6727_s6 = inlined_call_operand.vmem [shape: f32[1,32], index: 6, kind: input, shape index: {}]   ;;  %s6728_s7 = inlined_call_operand.vmem [shape: bf16[2,32,96], index: 7, kind: input, shape index: {}]   ;;  %s6729_s8 = inlined_call_operand.vmem [shape: f32[2,1,96], index: 8, kind: input, shape index: {}]   ;;  %s6730_s9 = inlined_call_operand.vmem [shape: bf16[2,32,32], index: 9, kind: input, shape index: {}]   ;;  %s6731_s10 = inlined_call_operand.vmem [shape: f32[2,1,32], index: 10, kind: input, shape index: {}]   ;;  %s6732_s11 = inlined_call_operand.vmem [shape: f32[2,1,32], index: 11, kind: input, shape index: {}]   ;;  %s6733_s12 = inlined_call_operand.vmem [shape: f32[2,1,32], index: 12, kind: input, shape index: {}]   ;;  %s6734_s13 = inlined_call_operand.vmem [shape: bf16[2,32,64], index: 13, kind: input, shape index: {}]   ;;  %s6735_s14 = inlined_call_operand.vmem [shape: f32[2,1,64], index: 14, kind: input, shape index: {}]   ;;  %s6736_s15 = inlined_call_operand.vmem [shape: bf16[2,64,32], index: 15, kind: input, shape index: {}]   ;;  %s6737_s16 = inlined_call_operand.vmem [shape: f32[2,1,32], index: 16, kind: input, shape index: {}]   ;;  %s6738_s17 = inlined_call_operand.vmem [shape: f32[2,1,32], index: 17, kind: input, shape index: {}]   ;;  %s6739_s18 = inlined_call_operand.vmem [shape: f32[2,1,32], index: 18, kind: input, shape index: {}]   ;;  %s6740_s19 = inlined_call_operand.hbm [shape: f32[2,1,32], index: 19, kind: output, shape index: {}]  }
   0x1   :  { %6758 = sst [smem:[#allocation8_spill]] %s6721_s0 }
   0x2   :  { %6759 = sst [smem:[#allocation9_spill]] %s6722_s1  ;;  %s6763_s20 = sld [smem:[#allocation8_spill]] }
   0x3   :  { %6760 = sst [smem:[#allocation10_spill]] %s6723_s2 }
   0x4   :  { %6761 = sst [smem:[#allocation11_spill]] %s6724_s3 }
   0x5   :  { %6762 = sst [smem:[#allocation12_spill]] %s6733_s12 }
   0x8   :  { %s24_s12 = sshll.u32 %s6763_s20, 4  ;;  %s25_s12 = int_to_ptr.vmem [resolvable:$true] %s24_s12 }
   0x9   :  { %s5462_s21 = scalar_lea.vmem %s25_s12, 32  ;;  %p5467_p1 = scmp.lt.s32.totalorder %s25_s12, %s25_s12 }
   0xa   :  { %p5463_p0 = scmp.ne.s32.totalorder %s25_s12, %s5462_s21  ;;  %p5468_p2 = scmp.lt.s32.totalorder %s5462_s21, %s5462_s21 }
   0xc   :  { %p5469_p3 = por %p5468_p2, %p5467_p1 }
   0xe   :  { %p5470_p4 = pnand %p5469_p3, %p5463_p0 }
  0x10   :  { %5473 = shalt.err (!%p5470_p4)  }
  0x11   :  { %s5500_s1 = smov [#allocation3]  }
  0x12   :  { %27 = dma.vmem_to_smem %s25_s12, 32, %s5500_s1, [#allocation2] }
  0x13   :  { %5496 = dma.done.wait [#allocation2], 32 }
  0x14   :  { %5497 = vsyncadd [#allocation2], 4294967264 }
  0x15   :  { %29 = sfence }
  0x16   :  { %s6764_s23 = sld [smem:[#allocation11_spill]]  ;;  %v68_v3 = vlaneseq  ;;  %s5626_s27 = sld [smem:[#allocation3]]  ;;  %v5501_v8 = vmov 0.0   ;;  %vm187_vm0 = vcmask 1040384   ;;  %vm189_vm1 = vcmask 1041408  }
  0x17   :  { %s5639_s21 = sld [smem:[#allocation3 + $0x1]]  ;;  %4729 = vmatprep.subr.bf16.mxu1 %v5501_v8  ;;  %s5653_s26 = sld [smem:[#allocation3 + $0x2]]  ;;  %vm191_vm2 = vcmask 1042432   ;;  %vm193_vm4 = vcmask 1043456   ;;  %vm195_vm5 = vcmask 1044480   ;;  %vm197_vm7 = vcmask 1045504  }
  0x18   :  { %v5666_v16 = vand.u32 127, %v68_v3  ;;  %s5668_s1 = sld [smem:[#allocation3 + $0x3]]  ;;  %s5671_s22 = sld [smem:[#allocation3 + $0x4]]  ;;  %vm199_vm9 = vcmask 1046528  }
  0x19   :  { %s5678_s2 = sld [smem:[#allocation3 + $0x5]]  ;;  %s5680_s24 = sld [smem:[#allocation3 + $0x6]] }
  0x1a   :  { %s5687_s25 = sld [smem:[#allocation3 + $0x7]]  ;;  %s5689_s3 = sld [smem:[#allocation3 + $0x8]] }
  0x1b   :  { %s5693_s12 = sld [smem:[#allocation3 + $0x9]]  ;;  %s5695_s28 = sld [smem:[#allocation3 + $0xa]] }
  0x1c   :  { %v70_v0 = vld [vmem:[%s6764_s23] sm:$0xff]  ;;  %v71_v1 = vld [vmem:[%s6764_s23 + $0x8] sm:$0xff]  ;;  %v72_v2 = vld [vmem:[%s6764_s23 + $0x10] sm:$0xff]  ;;  %v93_v21 = vstv %s5626_s27  ;;  %s5701_s27 = sld [smem:[#allocation3 + $0xb]]  ;;  %s5703_s29 = sld [smem:[#allocation3 + $0xc]] }
  0x1d   :  { %v5628_v4 = vpack.c.bf16 %v71_v1, %v70_v0  ;;  %v73_v5 = vld [vmem:[%s6764_s23 + $0x18] sm:$0xff]  ;;  %v74_v6 = vld [vmem:[%s6764_s23 + $0x20] sm:$0xff]  ;;  %v75_v7 = vld [vmem:[%s6764_s23 + $0x28] sm:$0xff]  ;;  %vm94_vm3 = vcmp.eq.s32.totalorder %v5666_v16, %v93_v21  ;;  %v99_v22 = vstv %s5639_s21  ;;  %s5709_s21 = sld [smem:[#allocation3 + $0xd]]  ;;  %s5711_s0 = sld [smem:[#allocation3 + $0xe]] }
  0x1e   :  { %v5642_v9 = vpack.c.bf16 %v73_v5, %v72_v2  ;;  %v76_v10 = vld [vmem:[%s6764_s23 + $0x30] sm:$0xff]  ;;  %v77_v11 = vld [vmem:[%s6764_s23 + $0x38] sm:$0xff]  ;;  %v78_v12 = vld [vmem:[%s6764_s23 + $0x40] sm:$0xff]  ;;  %v5674_v17 = vpack.c.bf16 %v75_v7, %v74_v6  ;;  %v4294_v23 = vsel %vm94_vm3, 1.0, %v5501_v8  ;;  %vm100_vm6 = vcmp.eq.s32.totalorder %v5666_v16, %v99_v22 }
  0x1f   :  { %5101 = vmatprep.subr.bf16.mxu0 %v5628_v4  ;;  %v79_v13 = vld [vmem:[%s6764_s23 + $0x48] sm:$0xff]  ;;  %v80_v14 = vld [vmem:[%s6764_s23 + $0x50] sm:$0xff]  ;;  %v81_v15 = vld [vmem:[%s6764_s23 + $0x58] sm:$0xff]  ;;  %v5676_v18 = vpack.c.bf16 %v77_v11, %v76_v10  ;;  %v105_v24 = vstv %s5653_s26  ;;  %v4296_v25 = vsel %vm100_vm6, 1.0, %v5501_v8  ;;  %s5717_s26 = sld [smem:[#allocation3 + $0xf]] }
  0x20   :  { %5103 = vmatpush3.bf16.msra.mxu0 %v5628_v4  ;;  %v5682_v19 = vpack.c.bf16 %v79_v13, %v78_v12  ;;  %v5684_v20 = vpack.c.bf16 %v81_v15, %v80_v14  ;;  %vm106_vm8 = vcmp.eq.s32.totalorder %v5666_v16, %v105_v24  ;;  %v111_v26 = vstv %s5668_s1  ;;  %v82_v44 = vld [vmem:[%s6764_s23 + $0x60] sm:$0xff]  ;;  %v83_v45 = vld [vmem:[%s6764_s23 + $0x68] sm:$0xff]  ;;  %v84_v57 = vld [vmem:[%s6764_s23 + $0x70] sm:$0xff] }
  0x21   :  { %5105 = vmatprep.subr.bf16.mxu0 %v5642_v9  ;;  %v4298_v27 = vsel %vm106_vm8, 1.0, %v5501_v8  ;;  %vm112_vm10 = vcmp.eq.s32.totalorder %v5666_v16, %v111_v26  ;;  %v117_v28 = vstv %s5671_s22  ;;  %v188_v29 = vsel %vm187_vm0, %v4294_v23, %v4296_v25  ;;  %v85_v62 = vld [vmem:[%s6764_s23 + $0x78] sm:$0xff] }
  0x22   :  { %v4300_v30 = vsel %vm112_vm10, 1.0, %v5501_v8  ;;  %vm118_vm11 = vcmp.eq.s32.totalorder %v5666_v16, %v117_v28  ;;  %v123_v31 = vstv %s5678_s2  ;;  %v129_v32 = vstv %s5680_s24 }
  0x23   :  { %v4302_v33 = vsel %vm118_vm11, 1.0, %v5501_v8  ;;  %vm124_vm12 = vcmp.eq.s32.totalorder %v5666_v16, %v123_v31  ;;  %vm130_vm13 = vcmp.eq.s32.totalorder %v5666_v16, %v129_v32  ;;  %v135_v34 = vstv %s5687_s25 }
  0x24   :  { %5107 = vmatpush3.bf16.msra.mxu0 %v5642_v9  ;;  %v4304_v35 = vsel %vm124_vm12, 1.0, %v5501_v8  ;;  %v4306_v36 = vsel %vm130_vm13, 1.0, %v5501_v8  ;;  %vm136_vm14 = vcmp.eq.s32.totalorder %v5666_v16, %v135_v34  ;;  %v190_v37 = vsel %vm189_vm1, %v188_v29, %v4298_v27 }
  0x25   :  { %5109 = vmatprep.subr.bf16.mxu0 %v5674_v17  ;;  %v4308_v38 = vsel %vm136_vm14, 1.0, %v5501_v8  ;;  %v192_v39 = vsel %vm191_vm2, %v190_v37, %v4300_v30  ;;  %v141_v40 = vstv %s5689_s3  ;;  %v147_v41 = vstv %s5693_s12 }
  0x26   :  { %v194_v42 = vsel %vm193_vm4, %v192_v39, %v4302_v33  ;;  %vm142_vm15 = vcmp.eq.s32.totalorder %v5666_v16, %v141_v40  ;;  %vm148_vm3 = vcmp.eq.s32.totalorder %v5666_v16, %v147_v41  ;;  %v153_v43 = vstv %s5695_s28 }
  0x27   :  { %v196_v46 = vsel %vm195_vm5, %v194_v42, %v4304_v35  ;;  %v4310_v47 = vsel %vm142_vm15, 1.0, %v5501_v8  ;;  %v4312_v48 = vsel %vm148_vm3, 1.0, %v5501_v8  ;;  %vm154_vm6 = vcmp.eq.s32.totalorder %v5666_v16, %v153_v43 }
  0x28   :  { %5111 = vmatpush3.bf16.msra.mxu0 %v5674_v17  ;;  %v198_v49 = vsel %vm197_vm7, %v196_v46, %v4306_v36  ;;  %v4314_v50 = vsel %vm154_vm6, 1.0, %v5501_v8  ;;  %v159_v51 = vstv %s5701_s27  ;;  %v165_v52 = vstv %s5703_s29 }
  0x29   :  { %5113 = vmatprep.subr.bf16.mxu0 %v5676_v18  ;;  %v200_v53 = vsel %vm199_vm9, %v198_v49, %v4308_v38  ;;  %vm160_vm8 = vcmp.eq.s32.totalorder %v5666_v16, %v159_v51  ;;  %vm166_vm10 = vcmp.eq.s32.totalorder %v5666_v16, %v165_v52  ;;  %v171_v54 = vstv %s5709_s21 }
  0x2a   :  { %4726 = vmatprep.mubr.f32.mxu0 %v200_v53  ;;  %v4316_v55 = vsel %vm160_vm8, 1.0, %v5501_v8  ;;  %vm172_vm11 = vcmp.eq.s32.totalorder %v5666_v16, %v171_v54  ;;  %v177_v56 = vstv %s5711_s0  ;;  %v4318_v58 = vsel %vm166_vm10, 1.0, %v5501_v8 }
  0x2b   :  { %vm178_vm12 = vcmp.eq.s32.totalorder %v5666_v16, %v177_v56  ;;  %v183_v59 = vstv %s5717_s26  ;;  %v201_v60 = vsel %vm187_vm0, %v4310_v47, %v4312_v48  ;;  %v5773_v61 = vpack.c.bf16 %v83_v45, %v82_v44 }
  0x2c   :  { %5115 = vmatpush3.bf16.msra.mxu0 %v5676_v18  ;;  %v4320_v63 = vsel %vm172_vm11, 1.0, %v5501_v8  ;;  %vm184_vm13 = vcmp.eq.s32.totalorder %v5666_v16, %v183_v59  ;;  %v202_v0 = vsel %vm189_vm1, %v201_v60, %v4314_v50  ;;  %v4322_v1 = vsel %vm178_vm12, 1.0, %v5501_v8 }
  0x2d   :  { %5117 = vmatprep.subr.bf16.mxu0 %v5682_v19  ;;  %v4324_v2 = vsel %vm184_vm13, 1.0, %v5501_v8  ;;  %v203_v5 = vsel %vm191_vm2, %v202_v0, %v4316_v55  ;;  %v5787_v7 = vpack.c.bf16 %v85_v62, %v84_v57 }
  0x2e   :  { %v204_v6 = vsel %vm193_vm4, %v203_v5, %v4318_v58 }
  0x2f   :  { %v205_v10 = vsel %vm195_vm5, %v204_v6, %v4320_v63 }
  0x30   :  { %5119 = vmatpush3.bf16.msra.mxu0 %v5682_v19  ;;  %v206_v11 = vsel %vm197_vm7, %v205_v10, %v4322_v1 }
  0x31   :  { %5121 = vmatprep.subr.bf16.mxu0 %v5684_v20  ;;  %v207_v12 = vsel %vm199_vm9, %v206_v11, %v4324_v2 }
  0x34   :  { %5123 = vmatpush3.bf16.msra.mxu0 %v5684_v20 }
  0x35   :  { %5125 = vmatprep.subr.bf16.mxu0 %v5773_v61 }
  0x38   :  { %5127 = vmatpush3.bf16.msra.mxu0 %v5773_v61 }
  0x39   :  { %5129 = vmatprep.subr.bf16.mxu0 %v5787_v7 }
  0x3c   :  { %5131 = vmatpush3.bf16.msra.mxu0 %v5787_v7 }
  0x3d   :  { %4767 = vmatprep.subr.bf16.mxu0 %v5501_v8 }
  0x3f   :  { %4727 = vmatmul.mubr.f32.vlgmr.msra.gmra.mrb[0].mxu0 %v207_v12 }
  0x40   :  { %30 = vsyncpa [#allocation5], 0  ;;  %v86_v13 = vld [vmem:[%s6725_s4] sm:$0xff]  ;;  %v87_v15 = vld [vmem:[%s6725_s4 + $0x8] sm:$0xff]  ;;  %vm285_vm14 = vcmask 261120   ;;  %vm5502_vm15 = vmmov 0  }
  0x41   :  { %v5238_v36 = vld [vmem:[%s6728_s7] sm:$0xff]   ;;  %4733 = vmatprep.mubr.msk.bf16.mxu1 %vm5502_vm15, %v5501_v8  ;;  %4769 = vmatprep.mubr.msk.bf16.mxu0 %vm5502_vm15, %v5501_v8  ;;  %v5239_v37 = vld [vmem:[%s6728_s7 + $0x8] sm:$0xff]   ;;  %s5503_s25 = smov 112   ;;  %s5504_s3 = smov 120   ;;  %vm417_vm3 = vcmask 64512   ;;  %vm628_vm10 = vcmask 130048  }
  0x42   :  { %4730 = vmatpush3.bf16.msra.mxu1 %v5238_v36  ;;  %v4325_v46 = vld [vmem:[%s6726_s5] ss:$0 sm:$0xff]  ;;  %s6755_s23 = smov 104   ;;  %s6753_s12 = smov 96   ;;  %vm6757_vm11 = vcmask 195584   ;;  %vm1180_vm12 = vcmask 523264  }
  0x43   :  { %4731 = vmatprep.subr.bf16.mxu1 %v5501_v8  ;;  %v4326_v50 = vld [vmem:[%s6727_s6] ss:$0 sm:$0xff]  ;;  %s6765_s29 = sld [smem:[#allocation9_spill]]  ;;  %s6766_s26 = sld [smem:[#allocation10_spill]] }
  0x44   :  { %v4327_v55 = vld [vmem:[%s6729_s8] ss:$0 sm:$0xff]  ;;  %s6751_s1 = smov 64   ;;  %s6749_s27 = smov 8  }
  0x45   :  { %s6747_s21 = smov 16   ;;  %s6745_s0 = smov 24  }
  0x46   :  { %4732 = vmatpush3.bf16.msra.mxu1 %v5239_v37  ;;  %s6767_s24 = sld [smem:[#allocation12_spill]]  ;;  %s6768_s22 = smov 16  }
  0x47   :  { %4737 = vmatprep.subr.bf16.mxu1 %v5501_v8  ;;  %s6769_s2 = smov 24   ;;  %s4415_s28 = sld [smem:[#allocation3 + $0x80]] }
  0x48   :  { %s4425_s30 = sld [smem:[#allocation3 + $0x85]] }
 0x112   :  { %v4728_v14 = vpop.f32.mrb[0].mxu0 }
 0x113   :  { %v274_v21 = vpop.f32.mrb[1].mxu0  ;;  %v280_v23 = vadd.f32 %v4728_v14, %v87_v15 }
 0x114   :  { %v275_v22 = vadd.f32 %v274_v21, %v86_v13  ;;  %v329_v21 = vld [vmem:[%s6765_s29] sm:$0x1] }
 0x115   :  { %v289_v25 = vsel %vm285_vm14, %v280_v23, 0.0  ;;  %vm330_vm6 = vcmp.gt.f32.partialorder %v329_v21, 0.0 }
 0x116   :  { %v286_v24 = vsel %vm285_vm14, %v275_v22, 0.0 }
 0x117   :  { %287 = vadd.xlane.f32.xlu0 %v286_v24  ;;  %v5507_v24 = vmov 0  }
 0x11b   :  { %290 = vadd.xlane.f32.xlu0 %v289_v25  ;;  %v331_v25 = vsel %vm330_vm6, 1, %v5507_v24 }
 0x1a4   :  { %v288_v26 = vpop.xlane.xlu0 %287 }
 0x1a5   :  { %v293_v27 = vmul.f32 0.03125, %v288_v26 }
 0x1a7   :  { %v295_v28 = vsub.f32 %v275_v22, %v293_v27  ;;  %v5886_v22 = vshrl.u32 %v68_v3, 7  ;;  %v88_v27 = vld [vmem:[%s6766_s26] sm:$0xff] }
 0x1a8   :  { %v291_v29 = vpop.xlane.xlu0 %290 }
 0x1a9   :  { %v294_v30 = vmul.f32 0.03125, %v291_v29  ;;  %v297_v31 = vmul.f32 %v295_v28, %v295_v28 }
 0x1ab   :  { %v296_v32 = vsub.f32 %v280_v23, %v294_v30  ;;  %v299_v33 = vsel %vm285_vm14, %v297_v31, 0.0  ;;  %v334_v23 = vsub.s32 0, %v5886_v22 }
 0x1ac   :  { %300 = vadd.xlane.f32.xlu1 %v299_v33 }
 0x1ad   :  { %v298_v34 = vmul.f32 %v296_v32, %v296_v32  ;;  %v335_v26 = vrot.slane %v331_v25, %v334_v23 }
 0x1af   :  { %v302_v35 = vsel %vm285_vm14, %v298_v34, 0.0  ;;  %vm336_vm8 = vcmp.eq.s32.totalorder %v335_v26, 1 }
 0x1b0   :  { %303 = vadd.xlane.f32.xlu1 %v302_v35  ;;  %v5898_v29 = vsel %vm336_vm8, %v88_v27, -1e+09 }
 0x239   :  { %v301_v38 = vpop.xlane.xlu1 %300 }
 0x23a   :  { %v305_v39 = vmul.f32 0.03125, %v301_v38 }
 0x23c   :  { %v307_v40 = vadd.f32 1e-05, %v305_v39 }
 0x23d   :  { %v304_v41 = vpop.xlane.xlu1 %303 }
 0x23e   :  { %5278 = vrsqrt.f32 %v307_v40  ;;  %v306_v42 = vmul.f32 0.03125, %v304_v41 }
 0x240   :  { %v308_v43 = vadd.f32 1e-05, %v306_v42 }
 0x242   :  { %5280 = vrsqrt.f32 %v308_v43 }
 0x248   :  { %v5279_v44 = vpop.eup %5278 }
 0x249   :  { %v311_v45 = vmul.f32 %v5279_v44, %v295_v28  ;;  %v89_v28 = vld [vmem:[%s6766_s26 + $0x8] sm:$0xff] }
 0x24a   :  { %v5900_v33 = vsel %vm336_vm8, %v89_v28, -1e+09 }
 0x24b   :  { %v319_v49 = vmul.f32 %v4325_v46, %v311_v45 }
 0x24c   :  { %v5281_v47 = vpop.eup %5280 }
 0x24d   :  { %v312_v48 = vmul.f32 %v5281_v47, %v296_v32  ;;  %v5824_v52 = vadd.f32 %v4326_v50, %v319_v49 }
 0x24f   :  { %v320_v51 = vmul.f32 %v4325_v46, %v312_v48 }
 0x251   :  { %v5826_v53 = vadd.f32 %v4326_v50, %v320_v51 }
 0x253   :  { %v339_v54 = vpack.c.bf16 %v5826_v53, %v5824_v52 }
 0x255   :  { %4734 = vmatmul.mubr.msk.bf16.vlgmr.msra.gmra.mrb[0].mxu1 %vm285_vm14, %v339_v54 }
 0x256   :  { %4739 = vmatprep.mubr.msk.bf16.mxu1 %vm5502_vm15, %v5501_v8 }
 0x328   :  { %v400_v56 = vpop.f32.mrb[0].mxu1 }
 0x329   :  { %v4735_v57 = vpop.f32.mrb[1].mxu1  ;;  %v401_v59 = vadd.f32 %v4327_v55, %v400_v56 }
 0x32a   :  { %v403_v58 = vpop.f32.mrb[2].mxu1 }
 0x32b   :  { %v404_v60 = vadd.f32 %v4327_v55, %v403_v58  ;;  %v4736_v62 = vpop.f32.mrb[3].mxu1 }
 0x32d   :  { %v5836_v63 = vpack.c.bf16 %v404_v60, %v401_v59 }
 0x32f   :  { %411 = vrot.lane.b32.xlu1 %v5836_v63, %s5503_s25  ;;  %409 = vrot.lane.b32.xlu0 %v5836_v63, %s5504_s3 }
 0x333   :  { %413 = vrot.lane.b32.xlu1 %v5836_v63, %s6755_s23 }
 0x337   :  { %415 = vrot.lane.b32.xlu1 %v5836_v63, %s6753_s12 }
 0x3a1   :  { %v5846_v0 = vpop.permute.xlu1 %411  ;;  %v5848_v1 = vpop.permute.xlu0 %409 }
 0x3a2   :  { %514 = vrot.lane.b32.xlu1 %v5846_v0, %s6753_s12  ;;  %465 = vrot.lane.b32.xlu0 %v5848_v1, %s6753_s12 }
 0x3a5   :  { %v5854_v2 = vpop.permute.xlu1 %413 }
 0x3a6   :  { %563 = vrot.lane.b32.xlu0 %v5854_v2, %s6753_s12 }
 0x3a9   :  { %v416_v5 = vpop.permute.xlu1 %415 }
 0x3aa   :  { %v422_v6 = vsel %vm417_vm3, %v416_v5, 0 }
 0x3ab   :  { %4738 = vmatpush3.bf16.xpose.msra.mxu1 %v422_v6 }
 0x3ac   :  { %4743 = vmatprep.subr.bf16.mxu1 %v5501_v8 }
 0x3b2   :  { %4740 = vmatmul.mubr.msk.bf16.vlgmr.msra.gmra.mrb[4].mxu1 %vm417_vm3, %v5836_v63 }
 0x3b3   :  { %4745 = vmatprep.mubr.msk.bf16.mxu1 %vm5502_vm15, %v5501_v8 }
 0x414   :  { %v466_v10 = vpop.permute.xlu0 %465  ;;  %v515_v12 = vpop.permute.xlu1 %514 }
 0x415   :  { %v471_v11 = vsel %vm417_vm3, %v466_v10, 0  ;;  %v520_v13 = vsel %vm417_vm3, %v515_v12, 0 }
 0x416   :  { %4744 = vmatpush3.bf16.xpose.msra.mxu1 %v471_v11 }
 0x417   :  { %4749 = vmatprep.subr.bf16.mxu1 %v5501_v8 }
 0x418   :  { %v564_v14 = vpop.permute.xlu0 %563 }
 0x419   :  { %v569_v15 = vsel %vm417_vm3, %v564_v14, 0 }
 0x41d   :  { %4746 = vmatmul.mubr.msk.bf16.vlgmr.msra.gmra.mrb[8].mxu1 %vm417_vm3, %v5848_v1 }
 0x41e   :  { %4750 = vmatpush3.bf16.xpose.msra.mxu1 %v520_v13  ;;  %4751 = vmatprep.mubr.msk.bf16.mxu1 %vm5502_vm15, %v5501_v8 }
 0x41f   :  { %4755 = vmatprep.subr.bf16.mxu1 %v5501_v8 }
 0x425   :  { %4752 = vmatmul.mubr.msk.bf16.vlgmr.msra.gmra.mrb[12].mxu1 %vm417_vm3, %v5846_v0 }
 0x426   :  { %4756 = vmatpush3.bf16.xpose.msra.mxu1 %v569_v15  ;;  %4757 = vmatprep.mubr.msk.bf16.mxu1 %vm5502_vm15, %v5501_v8 }
 0x427   :  { %4761 = vmatprep.subr.bf16.mxu1 %v5501_v8 }
 0x42d   :  { %4758 = vmatmul.mubr.msk.bf16.vlgmr.msra.gmra.mrb[16].mxu1 %vm417_vm3, %v5854_v2 }
 0x42e   :  { %4763 = vmatprep.mubr.msk.bf16.mxu1 %vm5502_vm15, %v5501_v8 }
 0x485   :  { %v458_v3 = vpop.f32.mrb[4].mxu1 }
 0x486   :  { %v612_v30 = vmul.f32 0.35355338, %v458_v3  ;;  %v4741_v31 = vpop.f32.mrb[5].mxu1 }
 0x487   :  { %v461_v32 = vpop.f32.mrb[6].mxu1 }
 0x488   :  { %v613_v34 = vmul.f32 0.35355338, %v461_v32  ;;  %v4742_v35 = vpop.f32.mrb[7].mxu1  ;;  %v620_v36 = vadd.f32 %v612_v30, %v5898_v29 }
 0x48a   :  { %v629_v37 = vsel %vm628_vm10, %v620_v36, -inf  ;;  %v621_v38 = vadd.f32 %v613_v34, %v5900_v33 }
 0x48b   :  { %630 = vmax.xlane.f32.xlu1 %v629_v37 }
 0x48c   :  { %v632_v39 = vsel %vm628_vm10, %v621_v38, -inf }
 0x48d   :  { %633 = vmax.xlane.f32.xlu0 %v632_v39 }
 0x4f0   :  { %v507_v40 = vpop.f32.mrb[8].mxu1 }
 0x4f1   :  { %v614_v41 = vmul.f32 0.35355338, %v507_v40  ;;  %v4747_v42 = vpop.f32.mrb[9].mxu1 }
 0x4f2   :  { %v510_v43 = vpop.f32.mrb[10].mxu1 }
 0x4f3   :  { %v615_v44 = vmul.f32 0.35355338, %v510_v43  ;;  %v4748_v45 = vpop.f32.mrb[11].mxu1  ;;  %v622_v46 = vadd.f32 %v614_v41, %v5898_v29 }
 0x4f5   :  { %v635_v47 = vsel %vm628_vm10, %v622_v46, -inf  ;;  %v623_v48 = vadd.f32 %v615_v44, %v5900_v33 }
 0x4f6   :  { %636 = vmax.xlane.f32.xlu0 %v635_v47 }
 0x4f7   :  { %v638_v54 = vsel %vm628_vm10, %v623_v48, -inf }
 0x4f8   :  { %v556_v49 = vpop.f32.mrb[12].mxu1 }
 0x4f9   :  { %v616_v50 = vmul.f32 0.35355338, %v556_v49  ;;  %v4753_v51 = vpop.f32.mrb[13].mxu1 }
 0x4fa   :  { %639 = vmax.xlane.f32.xlu0 %v638_v54  ;;  %v559_v55 = vpop.f32.mrb[14].mxu1 }
 0x4fb   :  { %v617_v56 = vmul.f32 0.35355338, %v559_v55  ;;  %v4754_v57 = vpop.f32.mrb[15].mxu1  ;;  %v624_v58 = vadd.f32 %v616_v50, %v5898_v29 }
 0x4fd   :  { %v641_v59 = vsel %vm628_vm10, %v624_v58, -inf  ;;  %v625_v60 = vadd.f32 %v617_v56, %v5900_v33 }
 0x4fe   :  { %642 = vmax.xlane.f32.xlu1 %v641_v59 }
 0x4ff   :  { %v644_v62 = vsel %vm628_vm10, %v625_v60, -inf }
 0x500   :  { %645 = vmax.xlane.f32.xlu0 %v644_v62  ;;  %v605_v5 = vpop.f32.mrb[16].mxu1 }
 0x501   :  { %v618_v6 = vmul.f32 0.35355338, %v605_v5  ;;  %v4759_v10 = vpop.f32.mrb[17].mxu1 }
 0x502   :  { %v608_v11 = vpop.f32.mrb[18].mxu1 }
 0x503   :  { %v619_v12 = vmul.f32 0.35355338, %v608_v11  ;;  %v4760_v13 = vpop.f32.mrb[19].mxu1  ;;  %v626_v14 = vadd.f32 %v618_v6, %v5898_v29 }
 0x505   :  { %v647_v15 = vsel %vm628_vm10, %v626_v14, -inf  ;;  %v627_v21 = vadd.f32 %v619_v12, %v5900_v33 }
 0x506   :  { %648 = vmax.xlane.f32.xlu1 %v647_v15 }
 0x507   :  { %v650_v25 = vsel %vm628_vm10, %v627_v21, -inf }
 0x508   :  { %651 = vmax.xlane.f32.xlu0 %v650_v25 }
 0x517   :  { %721 = vrot.lane.b32.xlu1 %v5836_v63, %s6751_s1 }
 0x518   :  { %v631_v3 = vpop.xlane.xlu1 %630 }
 0x519   :  { %v653_v30 = vsub.f32 %v620_v36, %v631_v3 }
 0x51a   :  { %v634_v26 = vpop.xlane.xlu0 %633 }
 0x51b   :  { %v654_v27 = vsub.f32 %v621_v38, %v634_v26  ;;  %v661_v32 = vmul.f32 1.442695, %v653_v30 }
 0x51d   :  { %v663_v28 = vmul.f32 1.442695, %v654_v27 }
 0x51f   :  { %5282 = vpow2.f32 %v663_v28 }
 0x520   :  { %5284 = vpow2.f32 %v661_v32 }
 0x529   :  { %v5283_v31 = vpop.eup %5282 }
 0x52a   :  { %v680_v34 = vsel %vm628_vm10, %v5283_v31, 0.0  ;;  %v5285_v35 = vpop.eup %5284 }
 0x52b   :  { %681 = vadd.xlane.f32.xlu0 %v680_v34  ;;  %v677_v37 = vsel %vm628_vm10, %v5285_v35, 0.0 }
 0x53b   :  { %678 = vadd.xlane.f32.xlu1 %v677_v37 }
 0x583   :  { %v637_v39 = vpop.xlane.xlu0 %636 }
 0x584   :  { %v655_v40 = vsub.f32 %v622_v46, %v637_v39 }
 0x586   :  { %v665_v41 = vmul.f32 1.442695, %v655_v40 }
 0x587   :  { %v640_v63 = vpop.xlane.xlu0 %639 }
 0x588   :  { %5286 = vpow2.f32 %v665_v41  ;;  %v656_v38 = vsub.f32 %v623_v48, %v640_v63 }
 0x58a   :  { %v667_v42 = vmul.f32 1.442695, %v656_v38 }
 0x58b   :  { %v643_v43 = vpop.xlane.xlu1 %642 }
 0x58c   :  { %5288 = vpow2.f32 %v667_v42  ;;  %v657_v36 = vsub.f32 %v624_v58, %v643_v43 }
 0x58d   :  { %v646_v44 = vpop.xlane.xlu0 %645 }
 0x58e   :  { %v669_v45 = vmul.f32 1.442695, %v657_v36  ;;  %v658_v47 = vsub.f32 %v625_v60, %v646_v44 }
 0x590   :  { %5290 = vpow2.f32 %v669_v45  ;;  %v671_v49 = vmul.f32 1.442695, %v658_v47 }
 0x592   :  { %v5922_v50 = vpop.eup %5286  ;;  %5292 = vpow2.f32 %v671_v49 }
 0x593   :  { %v649_v51 = vpop.xlane.xlu1 %648  ;;  %v683_v46 = vsel %vm628_vm10, %v5922_v50, 0.0 }
 0x594   :  { %v659_v54 = vsub.f32 %v626_v14, %v649_v51  ;;  %684 = vadd.xlane.f32.xlu1 %v683_v46 }
 0x595   :  { %v652_v55 = vpop.xlane.xlu0 %651 }
 0x596   :  { %v5289_v48 = vpop.eup %5288  ;;  %v673_v56 = vmul.f32 1.442695, %v659_v54  ;;  %v660_v57 = vsub.f32 %v627_v21, %v652_v55 }
 0x597   :  { %v722_v59 = vpop.permute.xlu1 %721  ;;  %v686_v58 = vsel %vm628_vm10, %v5289_v48, 0.0 }
 0x598   :  { %5294 = vpow2.f32 %v673_v56  ;;  %v675_v60 = vmul.f32 1.442695, %v660_v57  ;;  %4762 = vmatpush3.bf16.msra.mxu1 %v722_v59  ;;  %687 = vadd.xlane.f32.xlu0 %v686_v58  ;;  %v5240_v57 = vld [vmem:[%s6730_s9] sm:$0xff]  }
 0x599   :  { %4773 = vmatprep.subr.bf16.mxu1 %v5501_v8 }
 0x59a   :  { %v5291_v62 = vpop.eup %5290  ;;  %5296 = vpow2.f32 %v675_v60  ;;  %v5241_v60 = vld [vmem:[%s6730_s9 + $0x8] sm:$0xff]  }
 0x59b   :  { %v689_v5 = vsel %vm628_vm10, %v5291_v62, 0.0 }
 0x59c   :  { %v5293_v6 = vpop.eup %5292  ;;  %690 = vadd.xlane.f32.xlu1 %v689_v5 }
 0x59d   :  { %v692_v10 = vsel %vm628_vm10, %v5293_v6, 0.0 }
 0x59e   :  { %693 = vadd.xlane.f32.xlu0 %v692_v10 }
 0x5a2   :  { %v5295_v11 = vpop.eup %5294 }
 0x5a3   :  { %v695_v12 = vsel %vm628_vm10, %v5295_v11, 0.0 }
 0x5a4   :  { %v5297_v13 = vpop.eup %5296  ;;  %696 = vadd.xlane.f32.xlu1 %v695_v12 }
 0x5a5   :  { %v698_v14 = vsel %vm628_vm10, %v5297_v13, 0.0 }
 0x5a6   :  { %699 = vadd.xlane.f32.xlu0 %v698_v14 }
 0x5b5   :  { %815 = vrot.lane.b32.xlu1 %v5846_v0, %s6751_s1 }
 0x5b8   :  { %v682_v15 = vpop.xlane.xlu0 %681 }
 0x5b9   :  { %862 = vrot.lane.b32.xlu1 %v5854_v2, %s6751_s1  ;;  %5298 = vrcp.f32 %v682_v15 }
 0x5bc   :  { %768 = vrot.lane.b32.xlu0 %v5848_v1, %s6751_s1 }
 0x5c3   :  { %v5299_v25 = vpop.eup %5298 }
 0x5c4   :  { %v710_v27 = vmul.f32 %v5299_v25, %v5283_v31 }
 0x5c8   :  { %v679_v21 = vpop.xlane.xlu1 %678 }
 0x5c9   :  { %5300 = vrcp.f32 %v679_v21 }
 0x5d3   :  { %v5301_v26 = vpop.eup %5300 }
 0x5d4   :  { %v709_v28 = vmul.f32 %v5301_v26, %v5285_v35 }
 0x5d6   :  { %v717_v3 = vpack.c.bf16 %v710_v27, %v709_v28 }
 0x5d8   :  { %4764 = vmatmul.mubr.msk.bf16.vlgmr.msra.gmra.mrb[20].mxu1 %vm628_vm10, %v717_v3 }
 0x5d9   :  { %4775 = vmatprep.mubr.msk.bf16.mxu1 %vm5502_vm15, %v5501_v8 }
 0x621   :  { %v685_v0 = vpop.xlane.xlu1 %684 }
 0x625   :  { %v688_v30 = vpop.xlane.xlu0 %687 }
 0x626   :  { %5302 = vrcp.f32 %v688_v30 }
 0x627   :  { %5304 = vrcp.f32 %v685_v0 }
 0x629   :  { %v691_v2 = vpop.xlane.xlu1 %690 }
 0x62a   :  { %5306 = vrcp.f32 %v691_v2 }
 0x62b   :  { %v694_v1 = vpop.xlane.xlu0 %693 }
 0x62c   :  { %5308 = vrcp.f32 %v694_v1 }
 0x630   :  { %v5303_v34 = vpop.eup %5302 }
 0x631   :  { %v697_v32 = vpop.xlane.xlu1 %696  ;;  %v5305_v37 = vpop.eup %5304  ;;  %v712_v39 = vmul.f32 %v5303_v34, %v5289_v48 }
 0x632   :  { %5310 = vrcp.f32 %v697_v32  ;;  %v711_v63 = vmul.f32 %v5305_v37, %v5922_v50 }
 0x633   :  { %v700_v31 = vpop.xlane.xlu0 %699 }
 0x634   :  { %v5307_v35 = vpop.eup %5306  ;;  %5312 = vrcp.f32 %v700_v31  ;;  %v718_v36 = vpack.c.bf16 %v712_v39, %v711_v63 }
 0x635   :  { %v816_v40 = vpop.permute.xlu1 %815  ;;  %v713_v38 = vmul.f32 %v5307_v35, %v5291_v62 }
 0x636   :  { %v5309_v41 = vpop.eup %5308  ;;  %4774 = vmatpush3.bf16.msra.mxu1 %v816_v40 }
 0x637   :  { %v714_v42 = vmul.f32 %v5309_v41, %v5293_v6  ;;  %v769_v43 = vpop.permute.xlu0 %768  ;;  %4785 = vmatprep.subr.bf16.mxu1 %v5501_v8 }
 0x638   :  { %4768 = vmatpush3.bf16.msra.mxu0 %v769_v43 }
 0x639   :  { %v719_v44 = vpack.c.bf16 %v714_v42, %v713_v38  ;;  %4779 = vmatprep.subr.bf16.mxu0 %v5501_v8  ;;  %v863_v45 = vpop.permute.xlu1 %862  ;;  %v4339_v42 = vld [vmem:[%s6731_s10] ss:$0 sm:$0xff] }
 0x63b   :  { %4770 = vmatmul.mubr.msk.bf16.vlgmr.msra.gmra.mrb[4].mxu0 %vm628_vm10, %v718_v36  ;;  %4776 = vmatmul.mubr.msk.bf16.vlgmr.msra.gmra.mrb[24].mxu1 %vm628_vm10, %v719_v44 }
 0x63c   :  { %v5311_v47 = vpop.eup %5310  ;;  %4780 = vmatpush3.bf16.msra.mxu0 %v863_v45  ;;  %4781 = vmatprep.mubr.msk.bf16.mxu0 %vm5502_vm15, %v5501_v8 }
 0x63d   :  { %4789 = vmatprep.mubr.msk.bf16.mxu1 %vm5502_vm15, %v5501_v8  ;;  %4793 = vmatprep.subr.bf16.mxu0 %v5501_v8  ;;  %v715_v50 = vmul.f32 %v5311_v47, %v5295_v11 }
 0x63e   :  { %v5313_v49 = vpop.eup %5312  ;;  %4786 = vmatpush3.bf16.msra.mxu1 %v5240_v57 }
 0x63f   :  { %v716_v51 = vmul.f32 %v5313_v49, %v5297_v13  ;;  %4787 = vmatprep.subr.bf16.mxu1 %v5501_v8 }
 0x641   :  { %v720_v46 = vpack.c.bf16 %v716_v51, %v715_v50 }
 0x642   :  { %4788 = vmatpush3.bf16.msra.mxu1 %v5241_v60 }
 0x643   :  { %4782 = vmatmul.mubr.msk.bf16.vlgmr.msra.gmra.mrb[8].mxu0 %vm628_vm10, %v720_v46  ;;  %4801 = vmatprep.subr.bf16.mxu1 %v5501_v8 }
 0x644   :  { %4797 = vmatprep.mubr.msk.bf16.mxu0 %vm5502_vm15, %v5501_v8 }
 0x6ab   :  { %v761_v54 = vpop.f32.mrb[20].mxu1 }
 0x6ac   :  { %v4765_v55 = vpop.f32.mrb[21].mxu1 }
 0x6ad   :  { %v764_v48 = vpop.f32.mrb[22].mxu1 }
 0x6ae   :  { %v4766_v56 = vpop.f32.mrb[23].mxu1 }
 0x70e   :  { %v808_v59 = vpop.f32.mrb[4].mxu0  ;;  %v855_v58 = vpop.f32.mrb[24].mxu1 }
 0x70f   :  { %v4771_v62 = vpop.f32.mrb[5].mxu0  ;;  %v4777_v5 = vpop.f32.mrb[25].mxu1 }
 0x710   :  { %v811_v6 = vpop.f32.mrb[6].mxu0  ;;  %v858_v10 = vpop.f32.mrb[26].mxu1 }
 0x711   :  { %v5178_v11 = vpack.i.bf16 %v811_v6, %v808_v59  ;;  %v5183_v12 = vpack.i.bf16 %v858_v10, %v855_v58  ;;  %v4772_v13 = vpop.f32.mrb[7].mxu0  ;;  %v4778_v14 = vpop.f32.mrb[27].mxu1  ;;  %v5243_v6 = vld [vmem:[%s6734_s13 + $0x8] sm:$0xff]  }
 0x713   :  { %5179 = vrot.lane.b32.xlu1 %v5178_v11, %s6749_s27  ;;  %5184 = vrot.lane.b32.xlu0 %v5183_v12, %s6747_s21  ;;  %s4445_s21 = sld [smem:[#allocation3 + $0x8f]] }
 0x716   :  { %v902_v15 = vpop.f32.mrb[8].mxu0 }
 0x717   :  { %v4783_v21 = vpop.f32.mrb[9].mxu0 }
 0x718   :  { %v905_v25 = vpop.f32.mrb[10].mxu0 }
 0x719   :  { %v5188_v26 = vpack.i.bf16 %v905_v25, %v902_v15  ;;  %v4784_v27 = vpop.f32.mrb[11].mxu0 }
 0x71b   :  { %5189 = vrot.lane.b32.xlu1 %v5188_v26, %s6745_s0  ;;  %v4343_v26 = vld [vmem:[%s6732_s11] ss:$0 sm:$0xff]  ;;  %s4431_s0 = sld [smem:[#allocation3 + $0x88]] }
 0x785   :  { %v5180_v28 = vpop.permute.xlu1 %5179  ;;  %v5185_v30 = vpop.permute.xlu0 %5184 }
 0x786   :  { %v5182_v3 = vunpack.i.h.bf16 %v5180_v28  ;;  %v5181_v0 = vunpack.i.l.bf16 %v5180_v28  ;;  %v5187_v2 = vunpack.i.h.bf16 %v5185_v30  ;;  %v5186_v1 = vunpack.i.l.bf16 %v5185_v30 }
 0x788   :  { %v933_v32 = vsel %vm417_vm3, %v761_v54, %v5181_v0  ;;  %v934_v34 = vsel %vm417_vm3, %v764_v48, %v5182_v3  ;;  %v4344_v0 = vld [vmem:[%s6767_s24] ss:$0 sm:$0xff] }
 0x789   :  { %v936_v39 = vsel %vm628_vm10, %v934_v34, %v5187_v2  ;;  %v935_v40 = vsel %vm628_vm10, %v933_v32, %v5186_v1  ;;  %v5244_v34 = vld [vmem:[%s6736_s15] sm:$0xff]  }
 0x78d   :  { %v5190_v37 = vpop.permute.xlu1 %5189 }
 0x78e   :  { %v5192_v31 = vunpack.i.h.bf16 %v5190_v37  ;;  %v5191_v35 = vunpack.i.l.bf16 %v5190_v37  ;;  %v5245_v37 = vld [vmem:[%s6736_s15 + $0x8] sm:$0xff]  }
 0x790   :  { %v938_v41 = vsel %vm6757_vm11, %v935_v40, %v5191_v35  ;;  %v939_v63 = vsel %vm6757_vm11, %v936_v39, %v5192_v31  ;;  %v5246_v31 = vld [vmem:[%s6736_s15 + $0x10] sm:$0xff]   ;;  %v5247_v35 = vld [vmem:[%s6736_s15 + $0x18] sm:$0xff]   ;;  %v4345_v39 = vld [vmem:[%s6735_s14] ss:$0 sm:$0xff] }
 0x791   :  { %v940_v38 = vpack.c.bf16 %v939_v63, %v938_v41 }
 0x793   :  { %4790 = vmatmul.mubr.msk.bf16.vlgmr.msra.gmra.mrb[28].mxu1 %vm285_vm14, %v940_v38 }
 0x794   :  { %4809 = vmatprep.mubr.msk.bf16.mxu1 %vm5502_vm15, %v5501_v8  ;;  %4802 = vmatpush3.bf16.msra.mxu1 %v5244_v34 }
 0x795   :  { %4803 = vmatprep.subr.bf16.mxu1 %v5501_v8 }
 0x798   :  { %4804 = vmatpush3.bf16.msra.mxu1 %v5245_v37 }
 0x799   :  { %4805 = vmatprep.subr.bf16.mxu1 %v5501_v8 }
 0x79c   :  { %4806 = vmatpush3.bf16.msra.mxu1 %v5246_v31 }
 0x79d   :  { %4807 = vmatprep.subr.bf16.mxu1 %v5501_v8 }
 0x7a0   :  { %4808 = vmatpush3.bf16.msra.mxu1 %v5247_v35  ;;  %v5249_v35 = vld [vmem:[%s6728_s7 + $0x18] sm:$0xff]  }
 0x7a1   :  { %4827 = vmatprep.subr.bf16.mxu1 %v5501_v8 }
 0x866   :  { %v1001_v43 = vpop.f32.mrb[28].mxu1 }
 0x867   :  { %v1002_v36 = vadd.f32 %v4339_v42, %v1001_v43  ;;  %v4791_v44 = vpop.f32.mrb[29].mxu1 }
 0x868   :  { %v1004_v45 = vpop.f32.mrb[30].mxu1 }
 0x869   :  { %v1005_v47 = vadd.f32 %v4339_v42, %v1004_v45  ;;  %v4792_v49 = vpop.f32.mrb[31].mxu1  ;;  %v1008_v50 = vadd.f32 %v1002_v36, %v5824_v52 }
 0x86b   :  { %v1012_v51 = vsel %vm285_vm14, %v1008_v50, 0.0  ;;  %v1009_v46 = vadd.f32 %v1005_v47, %v5826_v53  ;;  %v5242_v53 = vld [vmem:[%s6734_s13] sm:$0xff]  }
 0x86c   :  { %1013 = vadd.xlane.f32.xlu0 %v1012_v51  ;;  %4794 = vmatpush3.bf16.msra.mxu0 %v5242_v53  ;;  %v4349_v53 = vld [vmem:[%s6737_s16] ss:$0 sm:$0xff] }
 0x86d   :  { %v1015_v54 = vsel %vm285_vm14, %v1009_v46, 0.0  ;;  %4795 = vmatprep.subr.bf16.mxu0 %v5501_v8 }
 0x86e   :  { %1016 = vadd.xlane.f32.xlu1 %v1015_v54 }
 0x870   :  { %4796 = vmatpush3.bf16.msra.mxu0 %v5243_v6 }
 0x871   :  { %4813 = vmatprep.subr.bf16.mxu0 %v5501_v8 }
 0x8f9   :  { %v1014_v55 = vpop.xlane.xlu0 %1013 }
 0x8fa   :  { %v1018_v48 = vmul.f32 0.03125, %v1014_v55 }
 0x8fb   :  { %v1017_v56 = vpop.xlane.xlu1 %1016 }
 0x8fc   :  { %v1020_v57 = vsub.f32 %v1008_v50, %v1018_v48  ;;  %v1019_v59 = vmul.f32 0.03125, %v1017_v56 }
 0x8fe   :  { %v1021_v58 = vsub.f32 %v1009_v46, %v1019_v59  ;;  %v1022_v60 = vmul.f32 %v1020_v57, %v1020_v57 }
 0x900   :  { %v1024_v62 = vsel %vm285_vm14, %v1022_v60, 0.0  ;;  %v1023_v5 = vmul.f32 %v1021_v58, %v1021_v58 }
 0x901   :  { %1025 = vadd.xlane.f32.xlu0 %v1024_v62 }
 0x902   :  { %v1027_v52 = vsel %vm285_vm14, %v1023_v5, 0.0 }
 0x905   :  { %1028 = vadd.xlane.f32.xlu0 %v1027_v52 }
 0x98e   :  { %v1026_v10 = vpop.xlane.xlu0 %1025 }
 0x98f   :  { %v1030_v11 = vmul.f32 0.03125, %v1026_v10 }
 0x991   :  { %v1032_v12 = vadd.f32 1e-05, %v1030_v11 }
 0x992   :  { %v1029_v13 = vpop.xlane.xlu0 %1028 }
 0x993   :  { %5314 = vrsqrt.f32 %v1032_v12  ;;  %v1031_v14 = vmul.f32 0.03125, %v1029_v13 }
 0x995   :  { %v1033_v15 = vadd.f32 1e-05, %v1031_v14 }
 0x997   :  { %5316 = vrsqrt.f32 %v1033_v15 }
 0x99d   :  { %v5315_v21 = vpop.eup %5314 }
 0x99e   :  { %v1036_v25 = vmul.f32 %v5315_v21, %v1020_v57 }
 0x9a0   :  { %v1044_v28 = vmul.f32 %v4343_v26, %v1036_v25 }
 0x9a1   :  { %v5317_v27 = vpop.eup %5316 }
 0x9a2   :  { %v1037_v3 = vmul.f32 %v5317_v27, %v1021_v58  ;;  %v1052_v2 = vadd.f32 %v4344_v0, %v1044_v28 }
 0x9a4   :  { %v1045_v30 = vmul.f32 %v4343_v26, %v1037_v3 }
 0x9a6   :  { %v1053_v1 = vadd.f32 %v4344_v0, %v1045_v30 }
 0x9a8   :  { %v1054_v32 = vpack.c.bf16 %v1053_v1, %v1052_v2 }
 0x9aa   :  { %4798 = vmatmul.mubr.msk.bf16.vlgmr.msra.gmra.mrb[12].mxu0 %vm285_vm14, %v1054_v32 }
 0x9ab   :  { %4817 = vmatprep.mubr.msk.bf16.mxu0 %vm5502_vm15, %v5501_v8 }
 0xa7d   :  { %v1115_v40 = vpop.f32.mrb[12].mxu0 }
 0xa7e   :  { %v1116_v41 = vadd.f32 %v4345_v39, %v1115_v40  ;;  %v4799_v63 = vpop.f32.mrb[13].mxu0 }
 0xa7f   :  { %v1118_v38 = vpop.f32.mrb[14].mxu0 }
 0xa80   :  { %v1122_v42 = vmul.f32 %v1116_v41, %v1116_v41  ;;  %v1119_v43 = vadd.f32 %v4345_v39, %v1118_v38  ;;  %v4800_v36 = vpop.f32.mrb[15].mxu0 }
 0xa81   :  { %v4355_v36 = vld [vmem:[%s6738_s17] ss:$0 sm:$0xff] }
 0xa82   :  { %v1124_v44 = vmul.f32 %v1122_v42, %v1116_v41  ;;  %v1123_v45 = vmul.f32 %v1119_v43, %v1119_v43 }
 0xa84   :  { %v1126_v47 = vmul.f32 0.044715, %v1124_v44  ;;  %v1125_v49 = vmul.f32 %v1123_v45, %v1119_v43 }
 0xa86   :  { %v1128_v50 = vadd.f32 %v1126_v47, %v1116_v41  ;;  %v1127_v51 = vmul.f32 0.044715, %v1125_v49 }
 0xa88   :  { %v1130_v46 = vmul.f32 0.7978846, %v1128_v50  ;;  %v1129_v54 = vadd.f32 %v1127_v51, %v1119_v43  ;;  %v4356_v50 = vld [vmem:[%s6739_s18] ss:$0 sm:$0xff] }
 0xa8a   :  { %5318 = vtanh.f32 %v1130_v46  ;;  %v1131_v55 = vmul.f32 0.7978846, %v1129_v54 }
 0xa8c   :  { %5320 = vtanh.f32 %v1131_v55 }
 0xa94   :  { %v5319_v48 = vpop.eup %5318 }
 0xa95   :  { %v1134_v56 = vadd.f32 1.0, %v5319_v48  ;;  %v4362_v48 = vld [vmem:[%s6729_s8 + $0x1] ss:$0 sm:$0xff] }
 0xa96   :  { %v5321_v57 = vpop.eup %5320 }
 0xa97   :  { %v1136_v59 = vmul.f32 0.5, %v1134_v56  ;;  %v1135_v58 = vadd.f32 1.0, %v5321_v57 }
 0xa99   :  { %v1137_v60 = vmul.f32 0.5, %v1135_v58  ;;  %v1138_v62 = vmul.f32 %v1136_v59, %v1116_v41 }
 0xa9b   :  { %v1139_v5 = vmul.f32 %v1137_v60, %v1119_v43 }
 0xa9d   :  { %v1140_v52 = vpack.c.bf16 %v1139_v5, %v1138_v62 }
 0xa9f   :  { %4810 = vmatmul.mubr.msk.bf16.vlgmr.msra.gmra.mrb[32].mxu1 %vm1180_vm12, %v1140_v52 }
 0xaa0   :  { %4829 = vmatprep.mubr.msk.bf16.mxu1 %vm5502_vm15, %v5501_v8 }
 0xb72   :  { %v1218_v6 = vpop.f32.mrb[32].mxu1 }
 0xb73   :  { %v1219_v10 = vadd.f32 %v4349_v53, %v1218_v6  ;;  %v4811_v11 = vpop.f32.mrb[33].mxu1 }
 0xb74   :  { %v1221_v12 = vpop.f32.mrb[34].mxu1 }
 0xb75   :  { %v1222_v13 = vadd.f32 %v4349_v53, %v1221_v12  ;;  %v4812_v14 = vpop.f32.mrb[35].mxu1  ;;  %v1225_v15 = vadd.f32 %v1219_v10, %v1052_v2 }
 0xb77   :  { %v1229_v21 = vsel %vm285_vm14, %v1225_v15, 0.0  ;;  %v1226_v25 = vadd.f32 %v1222_v13, %v1053_v1  ;;  %v5248_v1 = vld [vmem:[%s6728_s7 + $0x10] sm:$0xff]  }
 0xb78   :  { %1230 = vadd.xlane.f32.xlu0 %v1229_v21  ;;  %4814 = vmatpush3.bf16.msra.mxu0 %v5248_v1 }
 0xb79   :  { %v1232_v26 = vsel %vm285_vm14, %v1226_v25, 0.0  ;;  %4815 = vmatprep.subr.bf16.mxu0 %v5501_v8 }
 0xb7a   :  { %1233 = vadd.xlane.f32.xlu1 %v1232_v26 }
 0xb7c   :  { %4816 = vmatpush3.bf16.msra.mxu0 %v5249_v35 }
 0xb7d   :  { %4821 = vmatprep.subr.bf16.mxu0 %v5501_v8 }
 0xc05   :  { %v1231_v27 = vpop.xlane.xlu0 %1230 }
 0xc06   :  { %v1235_v28 = vmul.f32 0.03125, %v1231_v27 }
 0xc07   :  { %v1234_v3 = vpop.xlane.xlu1 %1233 }
 0xc08   :  { %v1237_v0 = vsub.f32 %v1225_v15, %v1235_v28  ;;  %v1236_v30 = vmul.f32 0.03125, %v1234_v3 }
 0xc0a   :  { %v1238_v32 = vsub.f32 %v1226_v25, %v1236_v30  ;;  %v1239_v34 = vmul.f32 %v1237_v0, %v1237_v0 }
 0xc0c   :  { %v1241_v37 = vsel %vm285_vm14, %v1239_v34, 0.0  ;;  %v1240_v31 = vmul.f32 %v1238_v32, %v1238_v32 }
 0xc0d   :  { %1242 = vadd.xlane.f32.xlu0 %v1241_v37 }
 0xc0e   :  { %v1244_v2 = vsel %vm285_vm14, %v1240_v31, 0.0 }
 0xc0f   :  { %1245 = vadd.xlane.f32.xlu1 %v1244_v2 }
 0xc9a   :  { %v1243_v39 = vpop.xlane.xlu0 %1242 }
 0xc9b   :  { %v1247_v40 = vmul.f32 0.03125, %v1243_v39 }
 0xc9c   :  { %v1246_v41 = vpop.xlane.xlu1 %1245 }
 0xc9d   :  { %v1249_v63 = vadd.f32 1e-05, %v1247_v40  ;;  %v1248_v38 = vmul.f32 0.03125, %v1246_v41 }
 0xc9f   :  { %5322 = vrsqrt.f32 %v1249_v63  ;;  %v1250_v42 = vadd.f32 1e-05, %v1248_v38 }
 0xca1   :  { %5324 = vrsqrt.f32 %v1250_v42 }
 0xca9   :  { %v5323_v43 = vpop.eup %5322 }
 0xcaa   :  { %v1253_v44 = vmul.f32 %v5323_v43, %v1237_v0 }
 0xcab   :  { %v5325_v45 = vpop.eup %5324 }
 0xcac   :  { %v1261_v47 = vmul.f32 %v4355_v36, %v1253_v44  ;;  %v1254_v49 = vmul.f32 %v5325_v45, %v1238_v32 }
 0xcae   :  { %v1262_v51 = vmul.f32 %v4355_v36, %v1254_v49  ;;  %v6043_v46 = vadd.f32 %v4356_v50, %v1261_v47 }
 0xcb0   :  { %v6045_v54 = vadd.f32 %v4356_v50, %v1262_v51 }
 0xcb2   :  { %v1271_v55 = vpack.c.bf16 %v6045_v54, %v6043_v46 }
 0xcb4   :  { %4818 = vmatmul.mubr.msk.bf16.vlgmr.msra.gmra.mrb[16].mxu0 %vm285_vm14, %v1271_v55 }
 0xcb5   :  { %4823 = vmatprep.mubr.msk.bf16.mxu0 %vm5502_vm15, %v5501_v8 }
 0xd87   :  { %v1334_v56 = vpop.f32.mrb[16].mxu0 }
 0xd88   :  { %v4819_v57 = vpop.f32.mrb[17].mxu0  ;;  %v1335_v58 = vadd.f32 %v4362_v48, %v1334_v56 }
 0xd89   :  { %v1337_v59 = vpop.f32.mrb[18].mxu0 }
 0xd8a   :  { %v1338_v60 = vadd.f32 %v4362_v48, %v1337_v59  ;;  %v4820_v62 = vpop.f32.mrb[19].mxu0 }
 0xd8c   :  { %v6055_v5 = vpack.c.bf16 %v1338_v60, %v1335_v58 }
 0xd8e   :  { %1345 = vrot.lane.b32.xlu1 %v6055_v5, %s5503_s25  ;;  %1343 = vrot.lane.b32.xlu0 %v6055_v5, %s5504_s3 }
 0xd92   :  { %1347 = vrot.lane.b32.xlu1 %v6055_v5, %s6755_s23  ;;  %s4423_s23 = sld [smem:[#allocation3 + $0x84]] }
 0xd96   :  { %1349 = vrot.lane.b32.xlu1 %v6055_v5, %s6753_s12 }
 0xe00   :  { %v6065_v52 = vpop.permute.xlu1 %1345  ;;  %v6067_v53 = vpop.permute.xlu0 %1343 }
 0xe01   :  { %1447 = vrot.lane.b32.xlu1 %v6065_v52, %s6753_s12  ;;  %1398 = vrot.lane.b32.xlu0 %v6067_v53, %s6753_s12 }
 0xe04   :  { %v6073_v6 = vpop.permute.xlu1 %1347 }
 0xe05   :  { %1496 = vrot.lane.b32.xlu0 %v6073_v6, %s6753_s12  ;;  %s4421_s12 = sld [smem:[#allocation3 + $0x83]] }
 0xe08   :  { %v1350_v10 = vpop.permute.xlu1 %1349 }
 0xe09   :  { %v1355_v11 = vsel %vm417_vm3, %v1350_v10, 0 }
 0xe0a   :  { %4822 = vmatpush3.bf16.xpose.msra.mxu0 %v1355_v11 }
 0xe0b   :  { %4833 = vmatprep.subr.bf16.mxu0 %v5501_v8 }
 0xe11   :  { %4824 = vmatmul.mubr.msk.bf16.vlgmr.msra.gmra.mrb[20].mxu0 %vm417_vm3, %v6055_v5 }
 0xe12   :  { %4835 = vmatprep.mubr.msk.bf16.mxu0 %vm5502_vm15, %v5501_v8 }
 0xe73   :  { %v1448_v12 = vpop.permute.xlu1 %1447  ;;  %v1399_v13 = vpop.permute.xlu0 %1398 }
 0xe74   :  { %v1453_v14 = vsel %vm417_vm3, %v1448_v12, 0  ;;  %v1404_v15 = vsel %vm417_vm3, %v1399_v13, 0 }
 0xe75   :  { %4828 = vmatpush3.bf16.xpose.msra.mxu1 %v1404_v15  ;;  %4834 = vmatpush3.bf16.xpose.msra.mxu0 %v1453_v14 }
 0xe76   :  { %4839 = vmatprep.subr.bf16.mxu1 %v5501_v8  ;;  %4845 = vmatprep.subr.bf16.mxu0 %v5501_v8 }
 0xe77   :  { %v1497_v21 = vpop.permute.xlu0 %1496 }
 0xe78   :  { %v1502_v25 = vsel %vm417_vm3, %v1497_v21, 0 }
 0xe7c   :  { %4830 = vmatmul.mubr.msk.bf16.vlgmr.msra.gmra.mrb[36].mxu1 %vm417_vm3, %v6067_v53  ;;  %4836 = vmatmul.mubr.msk.bf16.vlgmr.msra.gmra.mrb[24].mxu0 %vm417_vm3, %v6065_v52 }
 0xe7d   :  { %4840 = vmatpush3.bf16.xpose.msra.mxu1 %v1502_v25  ;;  %4841 = vmatprep.mubr.msk.bf16.mxu1 %vm5502_vm15, %v5501_v8 }
 0xe7e   :  { %4847 = vmatprep.mubr.msk.bf16.mxu0 %vm5502_vm15, %v5501_v8  ;;  %4851 = vmatprep.subr.bf16.mxu1 %v5501_v8 }
 0xe84   :  { %4842 = vmatmul.mubr.msk.bf16.vlgmr.msra.gmra.mrb[40].mxu1 %vm417_vm3, %v6073_v6 }
 0xe85   :  { %4853 = vmatprep.mubr.msk.bf16.mxu1 %vm5502_vm15, %v5501_v8 }
 0xee4   :  { %v1391_v26 = vpop.f32.mrb[20].mxu0 }
 0xee5   :  { %v1545_v27 = vmul.f32 0.35355338, %v1391_v26  ;;  %v4825_v28 = vpop.f32.mrb[21].mxu0 }
 0xee6   :  { %v1394_v3 = vpop.f32.mrb[22].mxu0 }
 0xee7   :  { %v1546_v0 = vmul.f32 0.35355338, %v1394_v3  ;;  %v4826_v30 = vpop.f32.mrb[23].mxu0  ;;  %v1553_v32 = vadd.f32 %v1545_v27, %v5898_v29 }
 0xee9   :  { %v1561_v34 = vsel %vm628_vm10, %v1553_v32, -inf  ;;  %v1554_v37 = vadd.f32 %v1546_v0, %v5900_v33 }
 0xeea   :  { %1562 = vmax.xlane.f32.xlu1 %v1561_v34 }
 0xeeb   :  { %v1564_v31 = vsel %vm628_vm10, %v1554_v37, -inf }
 0xeec   :  { %1565 = vmax.xlane.f32.xlu0 %v1564_v31 }
 0xf4f   :  { %v1440_v2 = vpop.f32.mrb[36].mxu1  ;;  %v1489_v1 = vpop.f32.mrb[24].mxu0 }
 0xf50   :  { %v1547_v35 = vmul.f32 0.35355338, %v1440_v2  ;;  %v1549_v39 = vmul.f32 0.35355338, %v1489_v1  ;;  %v4831_v40 = vpop.f32.mrb[37].mxu1  ;;  %v4837_v41 = vpop.f32.mrb[25].mxu0 }
 0xf51   :  { %v1443_v63 = vpop.f32.mrb[38].mxu1  ;;  %v1492_v38 = vpop.f32.mrb[26].mxu0 }
 0xf52   :  { %v1548_v42 = vmul.f32 0.35355338, %v1443_v63  ;;  %v4832_v43 = vpop.f32.mrb[39].mxu1  ;;  %v4838_v36 = vpop.f32.mrb[27].mxu0  ;;  %v1557_v44 = vadd.f32 %v1549_v39, %v5898_v29  ;;  %v1555_v45 = vadd.f32 %v1547_v35, %v5898_v29  ;;  %v1550_v47 = vmul.f32 0.35355338, %v1492_v38 }
 0xf54   :  { %v1573_v49 = vsel %vm628_vm10, %v1557_v44, -inf  ;;  %v1567_v50 = vsel %vm628_vm10, %v1555_v45, -inf  ;;  %v1556_v51 = vadd.f32 %v1548_v42, %v5900_v33  ;;  %v1558_v59 = vadd.f32 %v1550_v47, %v5900_v33 }
 0xf55   :  { %1574 = vmax.xlane.f32.xlu1 %v1573_v49  ;;  %1568 = vmax.xlane.f32.xlu0 %v1567_v50 }
 0xf56   :  { %v1570_v57 = vsel %vm628_vm10, %v1556_v51, -inf  ;;  %v1576_v11 = vsel %vm628_vm10, %v1558_v59, -inf }
 0xf57   :  { %v1538_v55 = vpop.f32.mrb[40].mxu1 }
 0xf58   :  { %v1551_v48 = vmul.f32 0.35355338, %v1538_v55  ;;  %v4843_v56 = vpop.f32.mrb[41].mxu1 }
 0xf59   :  { %1571 = vmax.xlane.f32.xlu0 %v1570_v57  ;;  %v1541_v58 = vpop.f32.mrb[42].mxu1 }
 0xf5a   :  { %v1552_v60 = vmul.f32 0.35355338, %v1541_v58  ;;  %v4844_v62 = vpop.f32.mrb[43].mxu1  ;;  %v1559_v10 = vadd.f32 %v1551_v48, %v5898_v29 }
 0xf5c   :  { %v1579_v12 = vsel %vm628_vm10, %v1559_v10, -inf  ;;  %v1560_v13 = vadd.f32 %v1552_v60, %v5900_v33 }
 0xf5d   :  { %1577 = vmax.xlane.f32.xlu0 %v1576_v11  ;;  %1580 = vmax.xlane.f32.xlu1 %v1579_v12 }
 0xf5e   :  { %v1582_v14 = vsel %vm628_vm10, %v1560_v13, -inf }
 0xf61   :  { %1583 = vmax.xlane.f32.xlu0 %v1582_v14 }
 0xf6e   :  { %1653 = vrot.lane.b32.xlu1 %v6055_v5, %s6751_s1 }
 0xf77   :  { %v1563_v15 = vpop.xlane.xlu1 %1562 }
 0xf78   :  { %v1585_v26 = vsub.f32 %v1553_v32, %v1563_v15 }
 0xf79   :  { %v1566_v21 = vpop.xlane.xlu0 %1565 }
 0xf7a   :  { %v1586_v25 = vsub.f32 %v1554_v37, %v1566_v21  ;;  %v1593_v29 = vmul.f32 1.442695, %v1585_v26 }
 0xf7c   :  { %v1595_v27 = vmul.f32 1.442695, %v1586_v25 }
 0xf7e   :  { %5326 = vpow2.f32 %v1595_v27 }
 0xf7f   :  { %5328 = vpow2.f32 %v1593_v29 }
 0xf88   :  { %v5327_v28 = vpop.eup %5326 }
 0xf89   :  { %v1612_v3 = vsel %vm628_vm10, %v5327_v28, 0.0  ;;  %v5329_v33 = vpop.eup %5328 }
 0xf8a   :  { %1613 = vadd.xlane.f32.xlu0 %v1612_v3  ;;  %v1609_v0 = vsel %vm628_vm10, %v5329_v33, 0.0 }
 0xf92   :  { %1610 = vadd.xlane.f32.xlu1 %v1609_v0 }
 0xfe2   :  { %v1575_v30 = vpop.xlane.xlu1 %1574  ;;  %v1569_v34 = vpop.xlane.xlu0 %1568 }
 0xfe3   :  { %v1589_v31 = vsub.f32 %v1557_v44, %v1575_v30  ;;  %v1587_v5 = vsub.f32 %v1555_v45, %v1569_v34 }
 0xfe5   :  { %v1597_v2 = vmul.f32 1.442695, %v1587_v5  ;;  %v1601_v1 = vmul.f32 1.442695, %v1589_v31 }
 0xfe6   :  { %v1572_v37 = vpop.xlane.xlu0 %1571 }
 0xfe7   :  { %v1588_v32 = vsub.f32 %v1556_v51, %v1572_v37  ;;  %5330 = vpow2.f32 %v1597_v2 }
 0xfe8   :  { %5332 = vpow2.f32 %v1601_v1 }
 0xfe9   :  { %v1599_v35 = vmul.f32 1.442695, %v1588_v32 }
 0xfea   :  { %v1578_v39 = vpop.xlane.xlu0 %1577  ;;  %v1581_v40 = vpop.xlane.xlu1 %1580 }
 0xfeb   :  { %5334 = vpow2.f32 %v1599_v35  ;;  %v1590_v41 = vsub.f32 %v1558_v59, %v1578_v39  ;;  %v1591_v63 = vsub.f32 %v1559_v10, %v1581_v40 }
 0xfed   :  { %v1603_v38 = vmul.f32 1.442695, %v1590_v41  ;;  %v1605_v42 = vmul.f32 1.442695, %v1591_v63 }
 0xfee   :  { %v1654_v43 = vpop.permute.xlu1 %1653  ;;  %v1584_v36 = vpop.xlane.xlu0 %1583 }
 0xfef   :  { %5336 = vpow2.f32 %v1603_v38  ;;  %v1592_v47 = vsub.f32 %v1560_v13, %v1584_v36  ;;  %4846 = vmatpush3.bf16.msra.mxu0 %v1654_v43 }
 0xff0   :  { %5338 = vpow2.f32 %v1605_v42  ;;  %4857 = vmatprep.subr.bf16.mxu0 %v5501_v8 }
 0xff1   :  { %v1607_v44 = vmul.f32 1.442695, %v1592_v47  ;;  %v5331_v45 = vpop.eup %5330  ;;  %v5250_v47 = vld [vmem:[%s6730_s9 + $0x10] sm:$0xff]  }
 0xff2   :  { %v1615_v49 = vsel %vm628_vm10, %v5331_v45, 0.0  ;;  %v5333_v50 = vpop.eup %5332 }
 0xff3   :  { %5340 = vpow2.f32 %v1607_v44  ;;  %1616 = vadd.xlane.f32.xlu1 %v1615_v49  ;;  %v1621_v48 = vsel %vm628_vm10, %v5333_v50, 0.0  ;;  %v5251_v49 = vld [vmem:[%s6730_s9 + $0x18] sm:$0xff]  }
 0xff5   :  { %v5335_v51 = vpop.eup %5334 }
 0xff6   :  { %v1618_v55 = vsel %vm628_vm10, %v5335_v51, 0.0 }
 0xff7   :  { %1619 = vadd.xlane.f32.xlu0 %v1618_v55  ;;  %1622 = vadd.xlane.f32.xlu1 %v1621_v48 }
 0xff9   :  { %v5337_v56 = vpop.eup %5336 }
 0xffa   :  { %v5339_v57 = vpop.eup %5338  ;;  %v1624_v59 = vsel %vm628_vm10, %v5337_v56, 0.0 }
 0xffb   :  { %v1627_v58 = vsel %vm628_vm10, %v5339_v57, 0.0  ;;  %1625 = vadd.xlane.f32.xlu0 %v1624_v59 }
 0xffc   :  { %1628 = vadd.xlane.f32.xlu1 %v1627_v58 }
 0xffd   :  { %v5341_v60 = vpop.eup %5340 }
 0xffe   :  { %v1630_v62 = vsel %vm628_vm10, %v5341_v60, 0.0 }
 0xfff   :  { %1631 = vadd.xlane.f32.xlu0 %v1630_v62 }
0x100d   :  { %1747 = vrot.lane.b32.xlu1 %v6065_v52, %s6751_s1 }
0x1011   :  { %1794 = vrot.lane.b32.xlu1 %v6073_v6, %s6751_s1 }
0x1015   :  { %1700 = vrot.lane.b32.xlu0 %v6067_v53, %s6751_s1  ;;  %s4419_s1 = sld [smem:[#allocation3 + $0x82]] }
0x1017   :  { %v1614_v10 = vpop.xlane.xlu0 %1613 }
0x1018   :  { %5342 = vrcp.f32 %v1614_v10 }
0x101f   :  { %v1611_v11 = vpop.xlane.xlu1 %1610 }
0x1020   :  { %5344 = vrcp.f32 %v1611_v11 }
0x1022   :  { %v5343_v12 = vpop.eup %5342 }
0x1023   :  { %v1642_v14 = vmul.f32 %v5343_v12, %v5327_v28 }
0x102a   :  { %v5345_v13 = vpop.eup %5344 }
0x102b   :  { %v1641_v15 = vmul.f32 %v5345_v13, %v5329_v33 }
0x102d   :  { %v1649_v21 = vpack.c.bf16 %v1642_v14, %v1641_v15 }
0x102f   :  { %4848 = vmatmul.mubr.msk.bf16.vlgmr.msra.gmra.mrb[28].mxu0 %vm628_vm10, %v1649_v21 }
0x1030   :  { %4859 = vmatprep.mubr.msk.bf16.mxu0 %vm5502_vm15, %v5501_v8 }
0x1080   :  { %v1617_v52 = vpop.xlane.xlu1 %1616 }
0x1081   :  { %5346 = vrcp.f32 %v1617_v52 }
0x1084   :  { %v1620_v6 = vpop.xlane.xlu0 %1619  ;;  %v1623_v25 = vpop.xlane.xlu1 %1622 }
0x1085   :  { %5348 = vrcp.f32 %v1620_v6 }
0x1086   :  { %5350 = vrcp.f32 %v1623_v25 }
0x1088   :  { %v1626_v53 = vpop.xlane.xlu0 %1625 }
0x1089   :  { %v1629_v26 = vpop.xlane.xlu1 %1628  ;;  %5352 = vrcp.f32 %v1626_v53 }
0x108a   :  { %5354 = vrcp.f32 %v1629_v26 }
0x108b   :  { %v5347_v29 = vpop.eup %5346 }
0x108c   :  { %v1632_v27 = vpop.xlane.xlu0 %1631  ;;  %v1643_v33 = vmul.f32 %v5347_v29, %v5331_v45 }
0x108d   :  { %v1748_v28 = vpop.permute.xlu1 %1747  ;;  %5356 = vrcp.f32 %v1632_v27 }
0x108e   :  { %4858 = vmatpush3.bf16.msra.mxu0 %v1748_v28 }
0x108f   :  { %v5349_v3 = vpop.eup %5348  ;;  %4869 = vmatprep.subr.bf16.mxu0 %v5501_v8 }
0x1090   :  { %v1644_v0 = vmul.f32 %v5349_v3, %v5335_v51  ;;  %v1701_v30 = vpop.permute.xlu0 %1700  ;;  %v5351_v34 = vpop.eup %5350 }
0x1091   :  { %4852 = vmatpush3.bf16.msra.mxu1 %v1701_v30  ;;  %v1645_v2 = vmul.f32 %v5351_v34, %v5333_v50  ;;  %v1795_v37 = vpop.permute.xlu1 %1794  ;;  %v4379_v34 = vld [vmem:[%s6731_s10 + $0x1] ss:$0 sm:$0xff] }
0x1092   :  { %v1650_v31 = vpack.c.bf16 %v1644_v0, %v1643_v33  ;;  %4863 = vmatprep.subr.bf16.mxu1 %v5501_v8 }
0x1093   :  { %v5353_v5 = vpop.eup %5352 }
0x1094   :  { %v1646_v1 = vmul.f32 %v5353_v5, %v5337_v56  ;;  %4854 = vmatmul.mubr.msk.bf16.vlgmr.msra.gmra.mrb[44].mxu1 %vm628_vm10, %v1650_v31  ;;  %v5355_v32 = vpop.eup %5354 }
0x1095   :  { %4864 = vmatpush3.bf16.msra.mxu1 %v1795_v37  ;;  %4865 = vmatprep.mubr.msk.bf16.mxu1 %vm5502_vm15, %v5501_v8  ;;  %v1647_v40 = vmul.f32 %v5355_v32, %v5339_v57 }
0x1096   :  { %v1651_v35 = vpack.c.bf16 %v1646_v1, %v1645_v2  ;;  %4877 = vmatprep.subr.bf16.mxu1 %v5501_v8 }
0x1097   :  { %v5357_v39 = vpop.eup %5356 }
0x1098   :  { %v1648_v41 = vmul.f32 %v5357_v39, %v5341_v60  ;;  %4860 = vmatmul.mubr.msk.bf16.vlgmr.msra.gmra.mrb[32].mxu0 %vm628_vm10, %v1651_v35 }
0x1099   :  { %4873 = vmatprep.mubr.msk.bf16.mxu0 %vm5502_vm15, %v5501_v8  ;;  %4870 = vmatpush3.bf16.msra.mxu0 %v5250_v47 }
0x109a   :  { %v1652_v63 = vpack.c.bf16 %v1648_v41, %v1647_v40  ;;  %4871 = vmatprep.subr.bf16.mxu0 %v5501_v8 }
0x109c   :  { %4866 = vmatmul.mubr.msk.bf16.vlgmr.msra.gmra.mrb[48].mxu1 %vm628_vm10, %v1652_v63 }
0x109d   :  { %4881 = vmatprep.mubr.msk.bf16.mxu1 %vm5502_vm15, %v5501_v8  ;;  %4872 = vmatpush3.bf16.msra.mxu0 %v5251_v49 }
0x109e   :  { %4885 = vmatprep.subr.bf16.mxu0 %v5501_v8 }
0x1102   :  { %v1693_v38 = vpop.f32.mrb[28].mxu0 }
0x1103   :  { %v4849_v42 = vpop.f32.mrb[29].mxu0 }
0x1104   :  { %v1696_v43 = vpop.f32.mrb[30].mxu0 }
0x1105   :  { %v4850_v36 = vpop.f32.mrb[31].mxu0 }
0x1167   :  { %v1740_v44 = vpop.f32.mrb[44].mxu1 }
0x1168   :  { %v4855_v45 = vpop.f32.mrb[45].mxu1 }
0x1169   :  { %v1743_v50 = vpop.f32.mrb[46].mxu1 }
0x116a   :  { %v5193_v51 = vpack.i.bf16 %v1743_v50, %v1740_v44  ;;  %v4856_v55 = vpop.f32.mrb[47].mxu1  ;;  %v5253_v50 = vld [vmem:[%s6734_s13 + $0x18] sm:$0xff]  }
0x116b   :  { %v1787_v48 = vpop.f32.mrb[32].mxu0 }
0x116c   :  { %v4861_v56 = vpop.f32.mrb[33].mxu0  ;;  %5194 = vrot.lane.b32.xlu1 %v5193_v51, %s6749_s27  ;;  %s4417_s27 = sld [smem:[#allocation3 + $0x81]]  ;;  %v2199_v51 = vstv %s4415_s28 }
0x116d   :  { %v1790_v57 = vpop.f32.mrb[34].mxu0  ;;  %vm2200_vm13 = vcmp.eq.s32.totalorder %v5666_v16, %v2199_v51  ;;  %s4433_s28 = sld [smem:[#allocation3 + $0x89]] }
0x116e   :  { %v5198_v59 = vpack.i.bf16 %v1790_v57, %v1787_v48  ;;  %v4862_v58 = vpop.f32.mrb[35].mxu0  ;;  %v2211_v57 = vstv %s4419_s1  ;;  %s4429_s1 = sld [smem:[#allocation3 + $0x87]] }
0x116f   :  { %v1834_v60 = vpop.f32.mrb[48].mxu1  ;;  %vm2212_vm8 = vcmp.eq.s32.totalorder %v5666_v16, %v2211_v57 }
0x1170   :  { %5199 = vrot.lane.b32.xlu0 %v5198_v59, %s6768_s22  ;;  %v4867_v62 = vpop.f32.mrb[49].mxu1 }
0x1171   :  { %v1837_v10 = vpop.f32.mrb[50].mxu1 }
0x1172   :  { %v5203_v11 = vpack.i.bf16 %v1837_v10, %v1834_v60  ;;  %v4868_v12 = vpop.f32.mrb[51].mxu1  ;;  %v2205_v55 = vstv %s4417_s27  ;;  %v4416_v60 = vsel %vm2200_vm13, 1.0, %v5501_v8  ;;  %s4427_s27 = sld [smem:[#allocation3 + $0x86]] }
0x1173   :  { %vm2206_vm6 = vcmp.eq.s32.totalorder %v5666_v16, %v2205_v55  ;;  %v2289_v55 = vstv %s4445_s21 }
0x1174   :  { %5204 = vrot.lane.b32.xlu1 %v5203_v11, %s6769_s2  ;;  %v4418_v62 = vsel %vm2206_vm6, 1.0, %v5501_v8  ;;  %v2217_v11 = vstv %s4421_s12  ;;  %s4443_s12 = sld [smem:[#allocation3 + $0x8e]] }
0x11de   :  { %v5195_v13 = vpop.permute.xlu1 %5194 }
0x11df   :  { %v5197_v15 = vunpack.i.h.bf16 %v5195_v13  ;;  %v5196_v21 = vunpack.i.l.bf16 %v5195_v13  ;;  %v4420_v13 = vsel %vm2212_vm8, 1.0, %v5501_v8 }
0x11e1   :  { %v1866_v53 = vsel %vm417_vm3, %v1696_v43, %v5197_v15  ;;  %v1865_v26 = vsel %vm417_vm3, %v1693_v38, %v5196_v21  ;;  %v2293_v15 = vsel %vm187_vm0, %v4416_v60, %v4418_v62  ;;  %v4392_v60 = vld [vmem:[%s6735_s14 + $0x1] ss:$0 sm:$0xff] }
0x11e2   :  { %v5200_v14 = vpop.permute.xlu0 %5199 }
0x11e3   :  { %v5202_v52 = vunpack.i.h.bf16 %v5200_v14  ;;  %v5201_v6 = vunpack.i.l.bf16 %v5200_v14  ;;  %v2223_v14 = vstv %s4423_s23  ;;  %s4441_s23 = sld [smem:[#allocation3 + $0x8d]] }
0x11e4   :  { %vm2224_vm13 = vcmp.eq.s32.totalorder %v5666_v16, %v2223_v14 }
0x11e5   :  { %v1867_v28 = vsel %vm628_vm10, %v1865_v26, %v5201_v6  ;;  %v1868_v3 = vsel %vm628_vm10, %v1866_v53, %v5202_v52  ;;  %v2229_v52 = vstv %s4425_s30  ;;  %v2294_v6 = vsel %vm189_vm1, %v2293_v15, %v4420_v13  ;;  %s4435_s30 = sld [smem:[#allocation3 + $0x8a]] }
0x11e6   :  { %v5205_v25 = vpop.permute.xlu1 %5204  ;;  %v4424_v53 = vsel %vm2224_vm13, 1.0, %v5501_v8  ;;  %vm2230_vm6 = vcmp.eq.s32.totalorder %v5666_v16, %v2229_v52 }
0x11e7   :  { %v5207_v27 = vunpack.i.h.bf16 %v5205_v25  ;;  %v5206_v29 = vunpack.i.l.bf16 %v5205_v25  ;;  %v2235_v25 = vstv %s4427_s27  ;;  %s4437_s27 = sld [smem:[#allocation3 + $0x8b]] }
0x11e8   :  { %vm2236_vm8 = vcmp.eq.s32.totalorder %v5666_v16, %v2235_v25 }
0x11e9   :  { %v1870_v33 = vsel %vm6757_vm11, %v1868_v3, %v5207_v27  ;;  %v1869_v0 = vsel %vm6757_vm11, %v1867_v28, %v5206_v29  ;;  %vm2218_vm11 = vcmp.eq.s32.totalorder %v5666_v16, %v2217_v11  ;;  %v4385_v28 = vld [vmem:[%s6732_s11 + $0x1] ss:$0 sm:$0xff]  ;;  %v4426_v3 = vsel %vm2230_vm6, 1.0, %v5501_v8 }
0x11ea   :  { %v1871_v30 = vpack.c.bf16 %v1870_v33, %v1869_v0  ;;  %v4422_v21 = vsel %vm2218_vm11, 1.0, %v5501_v8  ;;  %v2241_v33 = vstv %s4429_s1  ;;  %s4439_s1 = sld [smem:[#allocation3 + $0x8c]] }
0x11eb   :  { %v2295_v26 = vsel %vm191_vm2, %v2294_v6, %v4422_v21  ;;  %vm2242_vm11 = vcmp.eq.s32.totalorder %v5666_v16, %v2241_v33 }
0x11ec   :  { %4874 = vmatmul.mubr.msk.bf16.vlgmr.msra.gmra.mrb[36].mxu0 %vm285_vm14, %v1871_v30  ;;  %v2296_v0 = vsel %vm193_vm4, %v2295_v26, %v4424_v53 }
0x11ed   :  { %4893 = vmatprep.mubr.msk.bf16.mxu0 %vm5502_vm15, %v5501_v8 }
0x12bf   :  { %v1934_v31 = vpop.f32.mrb[36].mxu0 }
0x12c0   :  { %v1935_v5 = vadd.f32 %v4379_v34, %v1934_v31  ;;  %v4875_v2 = vpop.f32.mrb[37].mxu0 }
0x12c1   :  { %v1937_v1 = vpop.f32.mrb[38].mxu0  ;;  %v2297_v2 = vsel %vm195_vm5, %v2296_v0, %v4426_v3 }
0x12c2   :  { %v1938_v37 = vadd.f32 %v4379_v34, %v1937_v1  ;;  %v4876_v32 = vpop.f32.mrb[39].mxu0  ;;  %v1941_v35 = vadd.f32 %v1935_v5, %v6043_v46  ;;  %v4428_v34 = vsel %vm2236_vm8, 1.0, %v5501_v8  ;;  %v4386_v1 = vld [vmem:[%s6767_s24 + $0x1] ss:$0 sm:$0xff] }
0x12c3   :  { %v4430_v32 = vsel %vm2242_vm11, 1.0, %v5501_v8 }
0x12c4   :  { %v1947_v39 = vsel %vm285_vm14, %v1941_v35, 0.0  ;;  %v1942_v40 = vadd.f32 %v1938_v37, %v6045_v54  ;;  %v5252_v54 = vld [vmem:[%s6734_s13 + $0x10] sm:$0xff]  }
0x12c5   :  { %1948 = vadd.xlane.f32.xlu0 %v1947_v39  ;;  %4878 = vmatpush3.bf16.msra.mxu1 %v5252_v54 }
0x12c6   :  { %v1950_v41 = vsel %vm285_vm14, %v1942_v40, 0.0  ;;  %4879 = vmatprep.subr.bf16.mxu1 %v5501_v8 }
0x12c7   :  { %1951 = vadd.xlane.f32.xlu1 %v1950_v41 }
0x12c9   :  { %4880 = vmatpush3.bf16.msra.mxu1 %v5253_v50  ;;  %v2283_v50 = vstv %s4443_s12 }
0x12ca   :  { %5133 = vmatprep.subr.bf16.mxu1 %v5628_v4 }
0x1352   :  { %v1949_v63 = vpop.xlane.xlu0 %1948 }
0x1353   :  { %v1953_v38 = vmul.f32 0.03125, %v1949_v63 }
0x1354   :  { %v1952_v42 = vpop.xlane.xlu1 %1951 }
0x1355   :  { %v1955_v43 = vsub.f32 %v1941_v35, %v1953_v38  ;;  %v1954_v36 = vmul.f32 0.03125, %v1952_v42  ;;  %v2298_v35 = vsel %vm197_vm7, %v2297_v2, %v4428_v34  ;;  %v2247_v38 = vstv %s4431_s0 }
0x1356   :  { %v2299_v63 = vsel %vm199_vm9, %v2298_v35, %v4430_v32  ;;  %v2253_v42 = vstv %s4433_s28  ;;  %vm2248_vm13 = vcmp.eq.s32.totalorder %v5666_v16, %v2247_v38  ;;  %v5458_v32 = vld [vmem:[%s6725_s4 + $0x8] sm:$0xff] }
0x1357   :  { %v1956_v47 = vsub.f32 %v1942_v40, %v1954_v36  ;;  %v1957_v44 = vmul.f32 %v1955_v43, %v1955_v43  ;;  %vm2254_vm6 = vcmp.eq.s32.totalorder %v5666_v16, %v2253_v42  ;;  %v4432_v36 = vsel %vm2248_vm13, 1.0, %v5501_v8 }
0x1359   :  { %v1959_v45 = vsel %vm285_vm14, %v1957_v44, 0.0  ;;  %v1958_v49 = vmul.f32 %v1956_v47, %v1956_v47  ;;  %v2271_v44 = vstv %s4439_s1 }
0x135a   :  { %1960 = vadd.xlane.f32.xlu0 %v1959_v45  ;;  %vm2272_vm13 = vcmp.eq.s32.totalorder %v5666_v16, %v2271_v44 }
0x135b   :  { %v1962_v46 = vsel %vm285_vm14, %v1958_v49, 0.0  ;;  %v4440_v54 = vsel %vm2272_vm13, 1.0, %v5501_v8 }
0x135e   :  { %1963 = vadd.xlane.f32.xlu0 %v1962_v46 }
0x13e7   :  { %v1961_v48 = vpop.xlane.xlu0 %1960 }
0x13e8   :  { %v1965_v56 = vmul.f32 0.03125, %v1961_v48 }
0x13ea   :  { %v1967_v59 = vadd.f32 1e-05, %v1965_v56 }
0x13eb   :  { %v1964_v58 = vpop.xlane.xlu0 %1963 }
0x13ec   :  { %5358 = vrsqrt.f32 %v1967_v59  ;;  %v1966_v10 = vmul.f32 0.03125, %v1964_v58  ;;  %v5257_v58 = vld [vmem:[%s6736_s15 + $0x38] sm:$0xff]  }
0x13ee   :  { %v1968_v12 = vadd.f32 1e-05, %v1966_v10 }
0x13f0   :  { %5360 = vrsqrt.f32 %v1968_v12 }
0x13f6   :  { %v5359_v27 = vpop.eup %5358 }
0x13f7   :  { %v1971_v29 = vmul.f32 %v5359_v27, %v1955_v43  ;;  %v2259_v43 = vstv %s4435_s30  ;;  %s6773_s30 = smov 8  }
0x13f8   :  { %vm2260_vm8 = vcmp.eq.s32.totalorder %v5666_v16, %v2259_v43 }
0x13f9   :  { %v1979_v31 = vmul.f32 %v4385_v28, %v1971_v29 }
0x13fa   :  { %v5361_v30 = vpop.eup %5360 }
0x13fb   :  { %v1972_v5 = vmul.f32 %v5361_v30, %v1956_v47  ;;  %v6214_v39 = vadd.f32 %v4386_v1, %v1979_v31  ;;  %v2265_v47 = vstv %s4437_s27  ;;  %s6771_s27 = smov 96  }
0x13fc   :  { %vm2266_vm11 = vcmp.eq.s32.totalorder %v5666_v16, %v2265_v47 }
0x13fd   :  { %v1980_v37 = vmul.f32 %v4385_v28, %v1972_v5  ;;  %v4438_v49 = vsel %vm2266_vm11, 1.0, %v5501_v8 }
0x13ff   :  { %v1988_v40 = vadd.f32 %v4386_v1, %v1980_v37 }
0x1401   :  { %v1989_v41 = vpack.c.bf16 %v1988_v40, %v6214_v39 }
0x1403   :  { %4882 = vmatmul.mubr.msk.bf16.vlgmr.msra.gmra.mrb[52].mxu1 %vm285_vm14, %v1989_v41  ;;  %v5459_v41 = vld [vmem:[%s6725_s4] sm:$0xff] }
0x1404   :  { %5135 = vmatpush3.bf16.msra.mxu1 %v5628_v4  ;;  %4929 = vmatprep.mubr.f32.mxu1 %v2299_v63  ;;  %v4434_v4 = vsel %vm2254_vm6, 1.0, %v5501_v8 }
0x1405   :  { %5137 = vmatprep.subr.bf16.mxu1 %v5642_v9  ;;  %v2300_v45 = vsel %vm187_vm0, %v4432_v36, %v4434_v4  ;;  %vm2284_vm0 = vcmp.eq.s32.totalorder %v5666_v16, %v2283_v50  ;;  %v5259_v50 = vld [vmem:[%s6728_s7 + $0x8] sm:$0xff]  }
0x1408   :  { %5139 = vmatpush3.bf16.msra.mxu1 %v5642_v9  ;;  %v4436_v9 = vsel %vm2260_vm8, 1.0, %v5501_v8 }
0x1409   :  { %5141 = vmatprep.subr.bf16.mxu1 %v5674_v17  ;;  %v2301_v46 = vsel %vm189_vm1, %v2300_v45, %v4436_v9  ;;  %vm2290_vm1 = vcmp.eq.s32.totalorder %v5666_v16, %v2289_v55 }
0x140a   :  { %v2302_v51 = vsel %vm191_vm2, %v2301_v46, %v4438_v49  ;;  %v4446_v57 = vsel %vm2290_vm1, 1.0, %v5501_v8 }
0x140b   :  { %v2303_v48 = vsel %vm193_vm4, %v2302_v51, %v4440_v54  ;;  %v5258_v54 = vld [vmem:[%s6728_s7] sm:$0xff]  }
0x140c   :  { %5143 = vmatpush3.bf16.msra.mxu1 %v5674_v17  ;;  %v2277_v17 = vstv %s4441_s23 }
0x140d   :  { %5145 = vmatprep.subr.bf16.mxu1 %v5676_v18  ;;  %vm2278_vm6 = vcmp.eq.s32.totalorder %v5666_v16, %v2277_v17  ;;  %v5254_v16 = vld [vmem:[%s6736_s15 + $0x20] sm:$0xff]  }
0x140e   :  { %4886 = vmatpush3.bf16.msra.mxu0 %v5254_v16 }
0x140f   :  { %4887 = vmatprep.subr.bf16.mxu0 %v5501_v8 }
0x1410   :  { %5147 = vmatpush3.bf16.msra.mxu1 %v5676_v18  ;;  %v4442_v18 = vsel %vm2278_vm6, 1.0, %v5501_v8 }
0x1411   :  { %5149 = vmatprep.subr.bf16.mxu1 %v5682_v19  ;;  %v2304_v56 = vsel %vm195_vm5, %v2303_v48, %v4442_v18  ;;  %vm6774_vm5 = vcmask 195584  }
0x1412   :  { %vm6777_vm8 = vmmov %vm6774_vm5 }
0x1414   :  { %5151 = vmatpush3.bf16.msra.mxu1 %v5682_v19  ;;  %v4444_v19 = vsel %vm2284_vm0, 1.0, %v5501_v8 }
0x1415   :  { %5153 = vmatprep.subr.bf16.mxu1 %v5684_v20  ;;  %v2305_v59 = vsel %vm197_vm7, %v2304_v56, %v4444_v19  ;;  %vm6775_vm7 = vmmov %vm6774_vm5 }
0x1418   :  { %5155 = vmatpush3.bf16.msra.mxu1 %v5684_v20  ;;  %v2306_v20 = vsel %vm199_vm9, %v2305_v59, %v4446_v57  ;;  %vm6776_vm9 = vmmov %vm6774_vm5 }
0x1419   :  { %5157 = vmatprep.subr.bf16.mxu1 %v5773_v61 }
0x141c   :  { %5159 = vmatpush3.bf16.msra.mxu1 %v5773_v61  ;;  %v5255_v61 = vld [vmem:[%s6736_s15 + $0x28] sm:$0xff]  }
0x141d   :  { %5161 = vmatprep.subr.bf16.mxu1 %v5787_v7  ;;  %4888 = vmatpush3.bf16.msra.mxu0 %v5255_v61 }
0x141e   :  { %4889 = vmatprep.subr.bf16.mxu0 %v5501_v8 }
0x1420   :  { %5163 = vmatpush3.bf16.msra.mxu1 %v5787_v7  ;;  %v5256_v7 = vld [vmem:[%s6736_s15 + $0x30] sm:$0xff]  }
0x1421   :  { %4952 = vmatprep.subr.bf16.mxu1 %v5501_v8  ;;  %4890 = vmatpush3.bf16.msra.mxu0 %v5256_v7  ;;  %v4447_v7 = vld [vmem:[%s6726_s5] ss:$0 sm:$0xff] }
0x1422   :  { %4891 = vmatprep.subr.bf16.mxu0 %v5501_v8 }
0x1423   :  { %4930 = vmatmul.mubr.f32.vlgmr.msra.gmra.mrb[56].mxu1 %v2306_v20 }
0x1424   :  { %4954 = vmatprep.mubr.msk.bf16.mxu1 %vm5502_vm15, %v5501_v8 }
0x1425   :  { %4892 = vmatpush3.bf16.msra.mxu0 %v5257_v58 }
0x1426   :  { %4932 = vmatprep.subr.bf16.mxu0 %v5501_v8 }
0x14d6   :  { %v2052_v62 = vpop.f32.mrb[52].mxu1 }
0x14d7   :  { %v2053_v10 = vadd.f32 %v4392_v60, %v2052_v62  ;;  %v4883_v11 = vpop.f32.mrb[53].mxu1 }
0x14d8   :  { %v2055_v12 = vpop.f32.mrb[54].mxu1 }
0x14d9   :  { %v2059_v13 = vmul.f32 %v2053_v10, %v2053_v10  ;;  %v2056_v14 = vadd.f32 %v4392_v60, %v2055_v12  ;;  %v4884_v15 = vpop.f32.mrb[55].mxu1 }
0x14db   :  { %v2061_v21 = vmul.f32 %v2059_v13, %v2053_v10  ;;  %v2060_v52 = vmul.f32 %v2056_v14, %v2056_v14 }
0x14dd   :  { %v2063_v6 = vmul.f32 0.044715, %v2061_v21  ;;  %v2062_v25 = vmul.f32 %v2060_v52, %v2056_v14  ;;  %v4450_v21 = vld [vmem:[%s6729_s8] ss:$0 sm:$0xff] }
0x14df   :  { %v2065_v53 = vadd.f32 %v2063_v6, %v2053_v10  ;;  %v2064_v26 = vmul.f32 0.044715, %v2062_v25 }
0x14e1   :  { %v2067_v27 = vmul.f32 0.7978846, %v2065_v53  ;;  %v2066_v29 = vadd.f32 %v2064_v26, %v2056_v14 }
0x14e3   :  { %5362 = vtanh.f32 %v2067_v27  ;;  %v2068_v28 = vmul.f32 0.7978846, %v2066_v29 }
0x14e5   :  { %5364 = vtanh.f32 %v2068_v28 }
0x14ed   :  { %v5363_v3 = vpop.eup %5362 }
0x14ee   :  { %v2071_v33 = vadd.f32 1.0, %v5363_v3 }
0x14ef   :  { %v5365_v0 = vpop.eup %5364 }
0x14f0   :  { %v2073_v30 = vmul.f32 0.5, %v2071_v33  ;;  %v2072_v34 = vadd.f32 1.0, %v5365_v0 }
0x14f2   :  { %v2074_v31 = vmul.f32 0.5, %v2072_v34  ;;  %v2075_v5 = vmul.f32 %v2073_v30, %v2053_v10  ;;  %v4448_v10 = vld [vmem:[%s6727_s6] ss:$0 sm:$0xff]  ;;  %s6770_s6 = smov 104  }
0x14f4   :  { %v2076_v2 = vmul.f32 %v2074_v31, %v2056_v14 }
0x14f6   :  { %v2077_v1 = vpack.c.bf16 %v2076_v2, %v2075_v5  ;;  %v4931_v37 = vpop.f32.mrb[56].mxu1 }
0x14f7   :  { %v2379_v35 = vadd.f32 %v5458_v32, %v4931_v37  ;;  %v2373_v40 = vpop.f32.mrb[57].mxu1  ;;  %v4449_v32 = vld [vmem:[%s6765_s29 + $0x1] sm:$0x1]  ;;  %s6772_s29 = smov 64  }
0x14f8   :  { %v2374_v63 = vadd.f32 %v5459_v41, %v2373_v40  ;;  %4894 = vmatmul.mubr.msk.bf16.vlgmr.msra.gmra.mrb[40].mxu0 %vm1180_vm12, %v2077_v1  ;;  %vm2428_vm2 = vcmp.gt.f32.partialorder %v4449_v32, 0.0 }
0x14f9   :  { %v2387_v38 = vsel %vm285_vm14, %v2379_v35, 0.0  ;;  %4936 = vmatprep.mubr.msk.bf16.mxu0 %vm5502_vm15, %v5501_v8  ;;  %4933 = vmatpush3.bf16.msra.mxu0 %v5258_v54 }
0x14fa   :  { %2388 = vadd.xlane.f32.xlu1 %v2387_v38  ;;  %v2384_v42 = vsel %vm285_vm14, %v2374_v63, 0.0  ;;  %4934 = vmatprep.subr.bf16.mxu0 %v5501_v8 }
0x14fb   :  { %2385 = vadd.xlane.f32.xlu0 %v2384_v42 }
0x14fd   :  { %4935 = vmatpush3.bf16.msra.mxu0 %v5259_v50 }
0x14fe   :  { %4940 = vmatprep.subr.bf16.mxu0 %v5501_v8 }
0x1587   :  { %v2389_v43 = vpop.xlane.xlu1 %2388 }
0x1588   :  { %v2391_v36 = vmul.f32 0.03125, %v2389_v43  ;;  %v2386_v4 = vpop.xlane.xlu0 %2385 }
0x1589   :  { %v2390_v47 = vmul.f32 0.03125, %v2386_v4  ;;  %v5461_v4 = vld [vmem:[%s6766_s26 + $0x8] sm:$0xff] }
0x158a   :  { %v2393_v9 = vsub.f32 %v2379_v35, %v2391_v36  ;;  %v2429_v35 = vsel %vm2428_vm2, 1, %v5507_v24 }
0x158b   :  { %v2392_v44 = vsub.f32 %v2374_v63, %v2390_v47  ;;  %v2433_v40 = vrot.slane %v2429_v35, %v334_v23  ;;  %v5460_v63 = vld [vmem:[%s6766_s26] sm:$0xff] }
0x158c   :  { %v2395_v45 = vmul.f32 %v2393_v9, %v2393_v9 }
0x158d   :  { %v2394_v49 = vmul.f32 %v2392_v44, %v2392_v44  ;;  %vm2434_vm4 = vcmp.eq.s32.totalorder %v2433_v40, 1 }
0x158e   :  { %v2399_v17 = vsel %vm285_vm14, %v2395_v45, 0.0  ;;  %v6375_v38 = vsel %vm2434_vm4, %v5460_v63, -1e+09  ;;  %v6380_v47 = vsel %vm2434_vm4, %v5461_v4, -1e+09 }
0x158f   :  { %2400 = vadd.xlane.f32.xlu1 %v2399_v17  ;;  %v2396_v46 = vsel %vm285_vm14, %v2394_v49, 0.0 }
0x1590   :  { %2397 = vadd.xlane.f32.xlu0 %v2396_v46 }
0x15cb   :  { %v6300_v51 = vpop.f32.mrb[40].mxu0 }
0x15cc   :  { %v4895_v18 = vpop.f32.mrb[41].mxu0 }
0x15cd   :  { %v2159_v55 = vpop.f32.mrb[42].mxu0 }
0x15ce   :  { %v4896_v48 = vpop.f32.mrb[43].mxu0 }
0x161c   :  { %v2401_v19 = vpop.xlane.xlu1 %2400 }
0x161d   :  { %v2403_v56 = vmul.f32 0.03125, %v2401_v19  ;;  %v2398_v57 = vpop.xlane.xlu0 %2397 }
0x161e   :  { %v2402_v59 = vmul.f32 0.03125, %v2398_v57 }
0x161f   :  { %v2405_v20 = vadd.f32 1e-05, %v2403_v56 }
0x1620   :  { %v2404_v16 = vadd.f32 1e-05, %v2402_v59 }
0x1621   :  { %5366 = vrsqrt.f32 %v2405_v20 }
0x1622   :  { %5368 = vrsqrt.f32 %v2404_v16 }
0x162b   :  { %v5367_v61 = vpop.eup %5366 }
0x162c   :  { %v5369_v58 = vpop.eup %5368  ;;  %v2409_v60 = vmul.f32 %v5367_v61, %v2393_v9 }
0x162d   :  { %v2408_v62 = vmul.f32 %v5369_v58, %v2392_v44 }
0x162e   :  { %v2417_v11 = vmul.f32 %v4447_v7, %v2409_v60 }
0x162f   :  { %v2416_v12 = vmul.f32 %v4447_v7, %v2408_v62 }
0x1630   :  { %v6308_v13 = vadd.f32 %v4448_v10, %v2417_v11 }
0x1631   :  { %v6310_v14 = vadd.f32 %v4448_v10, %v2416_v12 }
0x1633   :  { %v2437_v15 = vpack.c.bf16 %v6308_v13, %v6310_v14 }
0x1635   :  { %4937 = vmatmul.mubr.msk.bf16.vlgmr.msra.gmra.mrb[44].mxu0 %vm285_vm14, %v2437_v15 }
0x1636   :  { %4942 = vmatprep.mubr.msk.bf16.mxu0 %vm5502_vm15, %v5501_v8 }
0x1708   :  { %v2498_v52 = vpop.f32.mrb[44].mxu0 }
0x1709   :  { %v4938_v6 = vpop.f32.mrb[45].mxu0  ;;  %v2499_v53 = vadd.f32 %v4450_v21, %v2498_v52 }
0x170a   :  { %v2501_v25 = vpop.f32.mrb[46].mxu0 }
0x170b   :  { %v2502_v26 = vadd.f32 %v4450_v21, %v2501_v25  ;;  %v4939_v27 = vpop.f32.mrb[47].mxu0 }
0x170d   :  { %v6320_v29 = vpack.c.bf16 %v2502_v26, %v2499_v53 }
0x170f   :  { %2509 = vrot.lane.b32.xlu1 %v6320_v29, %s5503_s25  ;;  %2507 = vrot.lane.b32.xlu0 %v6320_v29, %s5504_s3 }
0x1713   :  { %2511 = vrot.lane.b32.xlu1 %v6320_v29, %s6770_s6 }
0x1717   :  { %2513 = vrot.lane.b32.xlu1 %v6320_v29, %s6771_s27 }
0x1781   :  { %v6330_v28 = vpop.permute.xlu1 %2509  ;;  %v6332_v3 = vpop.permute.xlu0 %2507 }
0x1782   :  { %2611 = vrot.lane.b32.xlu1 %v6330_v28, %s6771_s27  ;;  %2562 = vrot.lane.b32.xlu0 %v6332_v3, %s6771_s27 }
0x1785   :  { %v6338_v33 = vpop.permute.xlu1 %2511 }
0x1786   :  { %2660 = vrot.lane.b32.xlu0 %v6338_v33, %s6771_s27 }
0x1789   :  { %v2514_v0 = vpop.permute.xlu1 %2513 }
0x178a   :  { %v2519_v30 = vsel %vm417_vm3, %v2514_v0, 0 }
0x178b   :  { %4941 = vmatpush3.bf16.xpose.msra.mxu0 %v2519_v30 }
0x178c   :  { %4946 = vmatprep.subr.bf16.mxu0 %v5501_v8 }
0x1792   :  { %4943 = vmatmul.mubr.msk.bf16.vlgmr.msra.gmra.mrb[48].mxu0 %vm417_vm3, %v6320_v29 }
0x1793   :  { %4948 = vmatprep.mubr.msk.bf16.mxu0 %vm5502_vm15, %v5501_v8 }
0x17f4   :  { %v2612_v34 = vpop.permute.xlu1 %2611  ;;  %v2563_v31 = vpop.permute.xlu0 %2562 }
0x17f5   :  { %v2617_v5 = vsel %vm417_vm3, %v2612_v34, 0  ;;  %v2568_v2 = vsel %vm417_vm3, %v2563_v31, 0 }
0x17f6   :  { %4947 = vmatpush3.bf16.xpose.msra.mxu0 %v2568_v2  ;;  %4953 = vmatpush3.bf16.xpose.msra.mxu1 %v2617_v5 }
0x17f7   :  { %4958 = vmatprep.subr.bf16.mxu0 %v5501_v8  ;;  %4964 = vmatprep.subr.bf16.mxu1 %v5501_v8 }
0x17f8   :  { %v2661_v1 = vpop.permute.xlu0 %2660 }
0x17f9   :  { %v2666_v37 = vsel %vm417_vm3, %v2661_v1, 0 }
0x17fd   :  { %4949 = vmatmul.mubr.msk.bf16.vlgmr.msra.gmra.mrb[52].mxu0 %vm417_vm3, %v6332_v3  ;;  %4955 = vmatmul.mubr.msk.bf16.vlgmr.msra.gmra.mrb[60].mxu1 %vm417_vm3, %v6330_v28 }
0x17fe   :  { %4959 = vmatpush3.bf16.xpose.msra.mxu0 %v2666_v37  ;;  %4960 = vmatprep.mubr.msk.bf16.mxu0 %vm5502_vm15, %v5501_v8 }
0x17ff   :  { %4966 = vmatprep.mubr.msk.bf16.mxu1 %vm5502_vm15, %v5501_v8  ;;  %4970 = vmatprep.subr.bf16.mxu0 %v5501_v8 }
0x1805   :  { %4961 = vmatmul.mubr.msk.bf16.vlgmr.msra.gmra.mrb[56].mxu0 %vm417_vm3, %v6338_v33 }
0x1806   :  { %4972 = vmatprep.mubr.msk.bf16.mxu0 %vm5502_vm15, %v5501_v8 }
0x1865   :  { %v2555_v41 = vpop.f32.mrb[48].mxu0 }
0x1866   :  { %v2709_v42 = vmul.f32 0.35355338, %v2555_v41  ;;  %v4944_v43 = vpop.f32.mrb[49].mxu0 }
0x1867   :  { %v2558_v36 = vpop.f32.mrb[50].mxu0 }
0x1868   :  { %v2710_v24 = vmul.f32 0.35355338, %v2558_v36  ;;  %v4945_v22 = vpop.f32.mrb[51].mxu0  ;;  %v2717_v23 = vadd.f32 %v2709_v42, %v6375_v38 }
0x186a   :  { %v2725_v9 = vsel %vm628_vm10, %v2717_v23, -inf  ;;  %v2718_v44 = vadd.f32 %v2710_v24, %v6380_v47 }
0x186b   :  { %2726 = vmax.xlane.f32.xlu1 %v2725_v9 }
0x186c   :  { %v2728_v45 = vsel %vm628_vm10, %v2718_v44, -inf }
0x186d   :  { %2729 = vmax.xlane.f32.xlu0 %v2728_v45 }
0x18d0   :  { %v2604_v49 = vpop.f32.mrb[52].mxu0  ;;  %v2653_v17 = vpop.f32.mrb[60].mxu1 }
0x18d1   :  { %v2711_v46 = vmul.f32 0.35355338, %v2604_v49  ;;  %v2713_v54 = vmul.f32 0.35355338, %v2653_v17  ;;  %v4950_v50 = vpop.f32.mrb[53].mxu0  ;;  %v4956_v18 = vpop.f32.mrb[61].mxu1 }
0x18d2   :  { %v2607_v55 = vpop.f32.mrb[54].mxu0  ;;  %v2656_v48 = vpop.f32.mrb[62].mxu1 }
0x18d3   :  { %v2712_v19 = vmul.f32 0.35355338, %v2607_v55  ;;  %v4951_v56 = vpop.f32.mrb[55].mxu0  ;;  %v4957_v57 = vpop.f32.mrb[63].mxu1  ;;  %v2721_v59 = vadd.f32 %v2713_v54, %v6375_v38  ;;  %v2719_v20 = vadd.f32 %v2711_v46, %v6375_v38  ;;  %v2714_v16 = vmul.f32 0.35355338, %v2656_v48 }
0x18d5   :  { %v2737_v61 = vsel %vm628_vm10, %v2721_v59, -inf  ;;  %v2731_v7 = vsel %vm628_vm10, %v2719_v20, -inf  ;;  %v2720_v58 = vadd.f32 %v2712_v19, %v6380_v47  ;;  %v2722_v12 = vadd.f32 %v2714_v16, %v6380_v47 }
0x18d6   :  { %2738 = vmax.xlane.f32.xlu1 %v2737_v61  ;;  %2732 = vmax.xlane.f32.xlu0 %v2731_v7 }
0x18d7   :  { %v2734_v11 = vsel %vm628_vm10, %v2720_v58, -inf  ;;  %v2740_v25 = vsel %vm628_vm10, %v2722_v12, -inf }
0x18d8   :  { %v2702_v60 = vpop.f32.mrb[56].mxu0 }
0x18d9   :  { %v2715_v62 = vmul.f32 0.35355338, %v2702_v60  ;;  %v4962_v10 = vpop.f32.mrb[57].mxu0 }
0x18da   :  { %2735 = vmax.xlane.f32.xlu0 %v2734_v11  ;;  %v2705_v15 = vpop.f32.mrb[58].mxu0 }
0x18db   :  { %v2716_v21 = vmul.f32 0.35355338, %v2705_v15  ;;  %v4963_v52 = vpop.f32.mrb[59].mxu0  ;;  %v2723_v6 = vadd.f32 %v2715_v62, %v6375_v38 }
0x18dd   :  { %v2743_v53 = vsel %vm628_vm10, %v2723_v6, -inf  ;;  %v2724_v26 = vadd.f32 %v2716_v21, %v6380_v47 }
0x18de   :  { %2741 = vmax.xlane.f32.xlu0 %v2740_v25  ;;  %2744 = vmax.xlane.f32.xlu1 %v2743_v53 }
0x18df   :  { %v2746_v27 = vsel %vm628_vm10, %v2724_v26, -inf }
0x18e2   :  { %2747 = vmax.xlane.f32.xlu0 %v2746_v27 }
0x18ef   :  { %2817 = vrot.lane.b32.xlu1 %v6320_v29, %s6772_s29 }
0x18f8   :  { %v2727_v0 = vpop.xlane.xlu1 %2726 }
0x18f9   :  { %v2749_v31 = vsub.f32 %v2717_v23, %v2727_v0 }
0x18fa   :  { %v2730_v30 = vpop.xlane.xlu0 %2729 }
0x18fb   :  { %v2750_v34 = vsub.f32 %v2718_v44, %v2730_v30  ;;  %v2757_v2 = vmul.f32 1.442695, %v2749_v31 }
0x18fd   :  { %v2759_v5 = vmul.f32 1.442695, %v2750_v34 }
0x18ff   :  { %5370 = vpow2.f32 %v2759_v5 }
0x1900   :  { %5372 = vpow2.f32 %v2757_v2 }
0x1909   :  { %v5371_v1 = vpop.eup %5370 }
0x190a   :  { %v2776_v37 = vsel %vm628_vm10, %v5371_v1, 0.0  ;;  %v5373_v32 = vpop.eup %5372 }
0x190b   :  { %2777 = vadd.xlane.f32.xlu0 %v2776_v37  ;;  %v2773_v35 = vsel %vm628_vm10, %v5373_v32, 0.0 }
0x1913   :  { %2774 = vadd.xlane.f32.xlu1 %v2773_v35 }
0x1963   :  { %v2739_v40 = vpop.xlane.xlu1 %2738  ;;  %v2733_v41 = vpop.xlane.xlu0 %2732 }
0x1964   :  { %v2753_v63 = vsub.f32 %v2721_v59, %v2739_v40  ;;  %v2751_v29 = vsub.f32 %v2719_v20, %v2733_v41 }
0x1966   :  { %v2761_v42 = vmul.f32 1.442695, %v2751_v29  ;;  %v2765_v43 = vmul.f32 1.442695, %v2753_v63 }
0x1967   :  { %v2736_v36 = vpop.xlane.xlu0 %2735 }
0x1968   :  { %v2752_v4 = vsub.f32 %v2720_v58, %v2736_v36  ;;  %5374 = vpow2.f32 %v2761_v42 }
0x1969   :  { %5376 = vpow2.f32 %v2765_v43 }
0x196a   :  { %v2763_v24 = vmul.f32 1.442695, %v2752_v4 }
0x196b   :  { %v2742_v22 = vpop.xlane.xlu0 %2741  ;;  %v2745_v23 = vpop.xlane.xlu1 %2744 }
0x196c   :  { %5378 = vpow2.f32 %v2763_v24  ;;  %v2754_v9 = vsub.f32 %v2722_v12, %v2742_v22  ;;  %v2755_v44 = vsub.f32 %v2723_v6, %v2745_v23  ;;  %v5260_v22 = vld [vmem:[%s6730_s9] sm:$0xff]  }
0x196e   :  { %v2767_v45 = vmul.f32 1.442695, %v2754_v9  ;;  %v2769_v49 = vmul.f32 1.442695, %v2755_v44  ;;  %v5261_v44 = vld [vmem:[%s6730_s9 + $0x8] sm:$0xff]  }
0x196f   :  { %v2818_v17 = vpop.permute.xlu1 %2817  ;;  %v2748_v46 = vpop.xlane.xlu0 %2747 }
0x1970   :  { %5380 = vpow2.f32 %v2767_v45  ;;  %v2756_v54 = vsub.f32 %v2724_v26, %v2748_v46  ;;  %4965 = vmatpush3.bf16.msra.mxu1 %v2818_v17 }
0x1971   :  { %5382 = vpow2.f32 %v2769_v49  ;;  %4976 = vmatprep.subr.bf16.mxu1 %v5501_v8 }
0x1972   :  { %v2771_v50 = vmul.f32 1.442695, %v2756_v54  ;;  %v5375_v18 = vpop.eup %5374 }
0x1973   :  { %v2779_v55 = vsel %vm628_vm10, %v5375_v18, 0.0  ;;  %v5377_v48 = vpop.eup %5376 }
0x1974   :  { %5384 = vpow2.f32 %v2771_v50  ;;  %2780 = vadd.xlane.f32.xlu1 %v2779_v55  ;;  %v2785_v57 = vsel %vm628_vm10, %v5377_v48, 0.0 }
0x1976   :  { %v5379_v19 = vpop.eup %5378 }
0x1977   :  { %v2782_v56 = vsel %vm628_vm10, %v5379_v19, 0.0 }
0x1978   :  { %2783 = vadd.xlane.f32.xlu0 %v2782_v56  ;;  %2786 = vadd.xlane.f32.xlu1 %v2785_v57 }
0x197a   :  { %v5381_v59 = vpop.eup %5380 }
0x197b   :  { %v5383_v20 = vpop.eup %5382  ;;  %v2788_v16 = vsel %vm628_vm10, %v5381_v59, 0.0 }
0x197c   :  { %v2791_v61 = vsel %vm628_vm10, %v5383_v20, 0.0  ;;  %2789 = vadd.xlane.f32.xlu0 %v2788_v16 }
0x197d   :  { %2792 = vadd.xlane.f32.xlu1 %v2791_v61 }
0x197e   :  { %v5385_v7 = vpop.eup %5384 }
0x197f   :  { %v2794_v58 = vsel %vm628_vm10, %v5385_v7, 0.0 }
0x1980   :  { %2795 = vadd.xlane.f32.xlu0 %v2794_v58 }
0x198e   :  { %2911 = vrot.lane.b32.xlu1 %v6330_v28, %s6772_s29 }
0x1992   :  { %2958 = vrot.lane.b32.xlu1 %v6338_v33, %s6772_s29 }
0x1996   :  { %2864 = vrot.lane.b32.xlu0 %v6332_v3, %s6772_s29 }
0x1998   :  { %v2778_v60 = vpop.xlane.xlu0 %2777 }
0x1999   :  { %5386 = vrcp.f32 %v2778_v60 }
0x19a0   :  { %v2775_v62 = vpop.xlane.xlu1 %2774 }
0x19a1   :  { %5388 = vrcp.f32 %v2775_v62 }
0x19a3   :  { %v5387_v10 = vpop.eup %5386 }
0x19a4   :  { %v2806_v12 = vmul.f32 %v5387_v10, %v5371_v1 }
0x19ab   :  { %v5389_v11 = vpop.eup %5388 }
0x19ac   :  { %v2805_v15 = vmul.f32 %v5389_v11, %v5373_v32 }
0x19ae   :  { %v2813_v21 = vpack.c.bf16 %v2806_v12, %v2805_v15 }
0x19b0   :  { %4967 = vmatmul.mubr.msk.bf16.vlgmr.msra.gmra.mrb[64].mxu1 %vm628_vm10, %v2813_v21 }
0x19b1   :  { %4978 = vmatprep.mubr.msk.bf16.mxu1 %vm5502_vm15, %v5501_v8 }
0x1a01   :  { %v2781_v28 = vpop.xlane.xlu1 %2780 }
0x1a02   :  { %5390 = vrcp.f32 %v2781_v28 }
0x1a05   :  { %v2784_v33 = vpop.xlane.xlu0 %2783  ;;  %v2787_v52 = vpop.xlane.xlu1 %2786 }
0x1a06   :  { %5392 = vrcp.f32 %v2784_v33 }
0x1a07   :  { %5394 = vrcp.f32 %v2787_v52 }
0x1a09   :  { %v2790_v3 = vpop.xlane.xlu0 %2789 }
0x1a0a   :  { %v2793_v6 = vpop.xlane.xlu1 %2792  ;;  %5396 = vrcp.f32 %v2790_v3 }
0x1a0b   :  { %5398 = vrcp.f32 %v2793_v6  ;;  %v4462_v6 = vld [vmem:[%s6731_s10] ss:$0 sm:$0xff] }
0x1a0c   :  { %v5391_v53 = vpop.eup %5390 }
0x1a0d   :  { %v2796_v25 = vpop.xlane.xlu0 %2795  ;;  %v2807_v0 = vmul.f32 %v5391_v53, %v5375_v18 }
0x1a0e   :  { %v2912_v26 = vpop.permute.xlu1 %2911  ;;  %5400 = vrcp.f32 %v2796_v25 }
0x1a0f   :  { %4977 = vmatpush3.bf16.msra.mxu1 %v2912_v26 }
0x1a10   :  { %v5393_v27 = vpop.eup %5392  ;;  %4988 = vmatprep.subr.bf16.mxu1 %v5501_v8 }
0x1a11   :  { %v2808_v30 = vmul.f32 %v5393_v27, %v5379_v19  ;;  %v2865_v34 = vpop.permute.xlu0 %2864  ;;  %v5395_v31 = vpop.eup %5394 }
0x1a12   :  { %4971 = vmatpush3.bf16.msra.mxu0 %v2865_v34  ;;  %v2809_v1 = vmul.f32 %v5395_v31, %v5377_v48  ;;  %v2959_v32 = vpop.permute.xlu1 %2958 }
0x1a13   :  { %v2814_v5 = vpack.c.bf16 %v2808_v30, %v2807_v0  ;;  %4982 = vmatprep.subr.bf16.mxu0 %v5501_v8 }
0x1a14   :  { %v5397_v2 = vpop.eup %5396 }
0x1a15   :  { %v2810_v37 = vmul.f32 %v5397_v2, %v5381_v59  ;;  %4973 = vmatmul.mubr.msk.bf16.vlgmr.msra.gmra.mrb[60].mxu0 %vm628_vm10, %v2814_v5  ;;  %v5399_v35 = vpop.eup %5398 }
0x1a16   :  { %4983 = vmatpush3.bf16.msra.mxu0 %v2959_v32  ;;  %4984 = vmatprep.mubr.msk.bf16.mxu0 %vm5502_vm15, %v5501_v8  ;;  %v2811_v63 = vmul.f32 %v5399_v35, %v5383_v20 }
0x1a17   :  { %v2815_v40 = vpack.c.bf16 %v2810_v37, %v2809_v1  ;;  %4996 = vmatprep.subr.bf16.mxu0 %v5501_v8 }
0x1a18   :  { %v5401_v41 = vpop.eup %5400 }
0x1a19   :  { %v2812_v29 = vmul.f32 %v5401_v41, %v5385_v7  ;;  %4979 = vmatmul.mubr.msk.bf16.vlgmr.msra.gmra.mrb[68].mxu1 %vm628_vm10, %v2815_v40 }
0x1a1a   :  { %4992 = vmatprep.mubr.msk.bf16.mxu1 %vm5502_vm15, %v5501_v8  ;;  %4989 = vmatpush3.bf16.msra.mxu1 %v5260_v22 }
0x1a1b   :  { %v2816_v42 = vpack.c.bf16 %v2812_v29, %v2811_v63  ;;  %4990 = vmatprep.subr.bf16.mxu1 %v5501_v8 }
0x1a1d   :  { %4985 = vmatmul.mubr.msk.bf16.vlgmr.msra.gmra.mrb[64].mxu0 %vm628_vm10, %v2816_v42 }
0x1a1e   :  { %5000 = vmatprep.mubr.msk.bf16.mxu0 %vm5502_vm15, %v5501_v8  ;;  %4991 = vmatpush3.bf16.msra.mxu1 %v5261_v44 }
0x1a1f   :  { %5004 = vmatprep.subr.bf16.mxu1 %v5501_v8 }
0x1a83   :  { %v2857_v43 = vpop.f32.mrb[64].mxu1 }
0x1a84   :  { %v4968_v36 = vpop.f32.mrb[65].mxu1 }
0x1a85   :  { %v2860_v4 = vpop.f32.mrb[66].mxu1 }
0x1a86   :  { %v4969_v24 = vpop.f32.mrb[67].mxu1 }
0x1ae8   :  { %v2904_v23 = vpop.f32.mrb[60].mxu0 }
0x1ae9   :  { %v4974_v9 = vpop.f32.mrb[61].mxu0 }
0x1aea   :  { %v2907_v45 = vpop.f32.mrb[62].mxu0 }
0x1aeb   :  { %v5208_v49 = vpack.i.bf16 %v2907_v45, %v2904_v23  ;;  %v4975_v17 = vpop.f32.mrb[63].mxu0 }
0x1aec   :  { %v2951_v46 = vpop.f32.mrb[68].mxu1 }
0x1aed   :  { %v4980_v54 = vpop.f32.mrb[69].mxu1  ;;  %5209 = vrot.lane.b32.xlu1 %v5208_v49, %s6773_s30  ;;  %v4466_v49 = vld [vmem:[%s6732_s11] ss:$0 sm:$0xff] }
0x1aee   :  { %v2954_v50 = vpop.f32.mrb[70].mxu1 }
0x1aef   :  { %v5213_v18 = vpack.i.bf16 %v2954_v50, %v2951_v46  ;;  %v4981_v55 = vpop.f32.mrb[71].mxu1  ;;  %v4467_v50 = vld [vmem:[%s6767_s24] ss:$0 sm:$0xff] }
0x1af0   :  { %v2998_v48 = vpop.f32.mrb[64].mxu0 }
0x1af1   :  { %5214 = vrot.lane.b32.xlu0 %v5213_v18, %s6768_s22  ;;  %v4986_v19 = vpop.f32.mrb[65].mxu0 }
0x1af2   :  { %v3001_v56 = vpop.f32.mrb[66].mxu0 }
0x1af3   :  { %v5218_v57 = vpack.i.bf16 %v3001_v56, %v2998_v48  ;;  %v4987_v59 = vpop.f32.mrb[67].mxu0  ;;  %v5264_v56 = vld [vmem:[%s6736_s15] sm:$0xff]  }
0x1af4   :  { %v5266_v59 = vld [vmem:[%s6736_s15 + $0x10] sm:$0xff]  }
0x1af5   :  { %5219 = vrot.lane.b32.xlu1 %v5218_v57, %s6769_s2  ;;  %v5265_v57 = vld [vmem:[%s6736_s15 + $0x8] sm:$0xff]  }
0x1b5f   :  { %v5210_v20 = vpop.permute.xlu1 %5209 }
0x1b60   :  { %v5212_v61 = vunpack.i.h.bf16 %v5210_v20  ;;  %v5211_v7 = vunpack.i.l.bf16 %v5210_v20  ;;  %v5267_v20 = vld [vmem:[%s6736_s15 + $0x18] sm:$0xff]  }
0x1b62   :  { %v3030_v10 = vsel %vm417_vm3, %v2860_v4, %v5212_v61  ;;  %v3029_v11 = vsel %vm417_vm3, %v2857_v43, %v5211_v7  ;;  %v5263_v43 = vld [vmem:[%s6734_s13 + $0x8] sm:$0xff]  }
0x1b63   :  { %v5215_v16 = vpop.permute.xlu0 %5214 }
0x1b64   :  { %v5217_v58 = vunpack.i.h.bf16 %v5215_v16  ;;  %v5216_v60 = vunpack.i.l.bf16 %v5215_v16  ;;  %v4468_v16 = vld [vmem:[%s6735_s14] ss:$0 sm:$0xff] }
0x1b66   :  { %v3031_v21 = vsel %vm628_vm10, %v3029_v11, %v5216_v60  ;;  %v3032_v28 = vsel %vm628_vm10, %v3030_v10, %v5217_v58 }
0x1b67   :  { %v5220_v62 = vpop.permute.xlu1 %5219 }
0x1b68   :  { %v5222_v12 = vunpack.i.h.bf16 %v5220_v62  ;;  %v5221_v15 = vunpack.i.l.bf16 %v5220_v62 }
0x1b6a   :  { %v3034_v33 = vsel %vm6774_vm5, %v3032_v28, %v5222_v12  ;;  %v3033_v52 = vsel %vm6775_vm7, %v3031_v21, %v5221_v15 }
0x1b6b   :  { %v3035_v3 = vpack.c.bf16 %v3034_v33, %v3033_v52 }
0x1b6d   :  { %4993 = vmatmul.mubr.msk.bf16.vlgmr.msra.gmra.mrb[72].mxu1 %vm285_vm14, %v3035_v3 }
0x1b6e   :  { %5012 = vmatprep.mubr.msk.bf16.mxu1 %vm5502_vm15, %v5501_v8  ;;  %5005 = vmatpush3.bf16.msra.mxu1 %v5264_v56 }
0x1b6f   :  { %5006 = vmatprep.subr.bf16.mxu1 %v5501_v8 }
0x1b72   :  { %5007 = vmatpush3.bf16.msra.mxu1 %v5265_v57  ;;  %v4478_v57 = vld [vmem:[%s6738_s17] ss:$0 sm:$0xff] }
0x1b73   :  { %5008 = vmatprep.subr.bf16.mxu1 %v5501_v8 }
0x1b76   :  { %5009 = vmatpush3.bf16.msra.mxu1 %v5266_v59 }
0x1b77   :  { %5010 = vmatprep.subr.bf16.mxu1 %v5501_v8 }
0x1b7a   :  { %5011 = vmatpush3.bf16.msra.mxu1 %v5267_v20 }
0x1b7b   :  { %5030 = vmatprep.subr.bf16.mxu1 %v5501_v8 }
0x1c40   :  { %v3096_v25 = vpop.f32.mrb[72].mxu1 }
0x1c41   :  { %v3097_v53 = vadd.f32 %v4462_v6, %v3096_v25  ;;  %v4994_v26 = vpop.f32.mrb[73].mxu1 }
0x1c42   :  { %v3099_v27 = vpop.f32.mrb[74].mxu1 }
0x1c43   :  { %v3103_v0 = vadd.f32 %v3097_v53, %v6310_v14  ;;  %v3100_v30 = vadd.f32 %v4462_v6, %v3099_v27  ;;  %v4995_v34 = vpop.f32.mrb[75].mxu1 }
0x1c45   :  { %v3104_v31 = vadd.f32 %v3100_v30, %v6308_v13  ;;  %v3107_v5 = vsel %vm285_vm14, %v3103_v0, 0.0  ;;  %v5262_v13 = vld [vmem:[%s6734_s13] sm:$0xff]  }
0x1c46   :  { %3108 = vadd.xlane.f32.xlu0 %v3107_v5  ;;  %4997 = vmatpush3.bf16.msra.mxu0 %v5262_v13 }
0x1c47   :  { %v3110_v2 = vsel %vm285_vm14, %v3104_v31, 0.0  ;;  %4998 = vmatprep.subr.bf16.mxu0 %v5501_v8 }
0x1c48   :  { %3111 = vadd.xlane.f32.xlu1 %v3110_v2 }
0x1c4a   :  { %4999 = vmatpush3.bf16.msra.mxu0 %v5263_v43 }
0x1c4b   :  { %5016 = vmatprep.subr.bf16.mxu0 %v5501_v8 }
0x1cd3   :  { %v3109_v1 = vpop.xlane.xlu0 %3108 }
0x1cd4   :  { %v3113_v37 = vmul.f32 0.03125, %v3109_v1  ;;  %v4472_v1 = vld [vmem:[%s6737_s16] ss:$0 sm:$0xff] }
0x1cd5   :  { %v3112_v32 = vpop.xlane.xlu1 %3111 }
0x1cd6   :  { %v3115_v35 = vsub.f32 %v3103_v0, %v3113_v37  ;;  %v3114_v40 = vmul.f32 0.03125, %v3112_v32 }
0x1cd8   :  { %v3116_v41 = vsub.f32 %v3104_v31, %v3114_v40  ;;  %v3117_v63 = vmul.f32 %v3115_v35, %v3115_v35 }
0x1cda   :  { %v3119_v29 = vsel %vm285_vm14, %v3117_v63, 0.0  ;;  %v3118_v14 = vmul.f32 %v3116_v41, %v3116_v41 }
0x1cdb   :  { %3120 = vadd.xlane.f32.xlu0 %v3119_v29 }
0x1cdc   :  { %v3122_v42 = vsel %vm285_vm14, %v3118_v14, 0.0 }
0x1cdf   :  { %3123 = vadd.xlane.f32.xlu0 %v3122_v42 }
0x1d68   :  { %v3121_v36 = vpop.xlane.xlu0 %3120 }
0x1d69   :  { %v3125_v4 = vmul.f32 0.03125, %v3121_v36 }
0x1d6b   :  { %v3127_v24 = vadd.f32 1e-05, %v3125_v4 }
0x1d6c   :  { %v3124_v22 = vpop.xlane.xlu0 %3123 }
0x1d6d   :  { %5402 = vrsqrt.f32 %v3127_v24  ;;  %v3126_v23 = vmul.f32 0.03125, %v3124_v22 }
0x1d6f   :  { %v3128_v9 = vadd.f32 1e-05, %v3126_v23 }
0x1d71   :  { %5404 = vrsqrt.f32 %v3128_v9 }
0x1d77   :  { %v5403_v44 = vpop.eup %5402 }
0x1d78   :  { %v3131_v45 = vmul.f32 %v5403_v44, %v3115_v35 }
0x1d7a   :  { %v3139_v46 = vmul.f32 %v4466_v49, %v3131_v45 }
0x1d7b   :  { %v5405_v17 = vpop.eup %5404 }
0x1d7c   :  { %v3132_v54 = vmul.f32 %v5405_v17, %v3116_v41  ;;  %v3147_v55 = vadd.f32 %v4467_v50, %v3139_v46  ;;  %v5268_v17 = vld [vmem:[%s6728_s7 + $0x10] sm:$0xff]   ;;  %v5269_v46 = vld [vmem:[%s6728_s7 + $0x18] sm:$0xff]  }
0x1d7e   :  { %v3140_v18 = vmul.f32 %v4466_v49, %v3132_v54 }
0x1d80   :  { %v3148_v48 = vadd.f32 %v4467_v50, %v3140_v18 }
0x1d82   :  { %v3149_v19 = vpack.c.bf16 %v3148_v48, %v3147_v55 }
0x1d84   :  { %5001 = vmatmul.mubr.msk.bf16.vlgmr.msra.gmra.mrb[68].mxu0 %vm285_vm14, %v3149_v19 }
0x1d85   :  { %5020 = vmatprep.mubr.msk.bf16.mxu0 %vm5502_vm15, %v5501_v8  ;;  %5017 = vmatpush3.bf16.msra.mxu0 %v5268_v17 }
0x1d86   :  { %5018 = vmatprep.subr.bf16.mxu0 %v5501_v8 }
0x1d89   :  { %5019 = vmatpush3.bf16.msra.mxu0 %v5269_v46 }
0x1d8a   :  { %5024 = vmatprep.subr.bf16.mxu0 %v5501_v8 }
0x1e57   :  { %v3210_v61 = vpop.f32.mrb[68].mxu0 }
0x1e58   :  { %v3211_v7 = vadd.f32 %v4468_v16, %v3210_v61  ;;  %v5002_v58 = vpop.f32.mrb[69].mxu0 }
0x1e59   :  { %v3213_v60 = vpop.f32.mrb[70].mxu0 }
0x1e5a   :  { %v3217_v62 = vmul.f32 %v3211_v7, %v3211_v7  ;;  %v3214_v10 = vadd.f32 %v4468_v16, %v3213_v60  ;;  %v5003_v11 = vpop.f32.mrb[71].mxu0 }
0x1e5b   :  { %v4485_v11 = vld [vmem:[%s6729_s8 + $0x1] ss:$0 sm:$0xff] }
0x1e5c   :  { %v3219_v12 = vmul.f32 %v3217_v62, %v3211_v7  ;;  %v3218_v15 = vmul.f32 %v3214_v10, %v3214_v10 }
0x1e5e   :  { %v3221_v21 = vmul.f32 0.044715, %v3219_v12  ;;  %v3220_v28 = vmul.f32 %v3218_v15, %v3214_v10 }
0x1e60   :  { %v3223_v33 = vadd.f32 %v3221_v21, %v3211_v7  ;;  %v3222_v52 = vmul.f32 0.044715, %v3220_v28 }
0x1e62   :  { %v3225_v3 = vmul.f32 0.7978846, %v3223_v33  ;;  %v3224_v6 = vadd.f32 %v3222_v52, %v3214_v10 }
0x1e64   :  { %5406 = vtanh.f32 %v3225_v3  ;;  %v3226_v25 = vmul.f32 0.7978846, %v3224_v6 }
0x1e66   :  { %5408 = vtanh.f32 %v3226_v25 }
0x1e6e   :  { %v5407_v53 = vpop.eup %5406 }
0x1e6f   :  { %v3229_v26 = vadd.f32 1.0, %v5407_v53 }
0x1e70   :  { %v5409_v27 = vpop.eup %5408 }
0x1e71   :  { %v3231_v0 = vmul.f32 0.5, %v3229_v26  ;;  %v3230_v30 = vadd.f32 1.0, %v5409_v27 }
0x1e73   :  { %v3232_v34 = vmul.f32 0.5, %v3230_v30  ;;  %v3233_v31 = vmul.f32 %v3231_v0, %v3211_v7  ;;  %v4479_v7 = vld [vmem:[%s6739_s18] ss:$0 sm:$0xff] }
0x1e75   :  { %v3234_v5 = vmul.f32 %v3232_v34, %v3214_v10 }
0x1e77   :  { %v3235_v2 = vpack.c.bf16 %v3234_v5, %v3233_v31 }
0x1e79   :  { %5013 = vmatmul.mubr.msk.bf16.vlgmr.msra.gmra.mrb[76].mxu1 %vm1180_vm12, %v3235_v2 }
0x1e7a   :  { %5032 = vmatprep.mubr.msk.bf16.mxu1 %vm5502_vm15, %v5501_v8 }
0x1f4c   :  { %v3312_v37 = vpop.f32.mrb[76].mxu1 }
0x1f4d   :  { %v3313_v32 = vadd.f32 %v4472_v1, %v3312_v37  ;;  %v5014_v35 = vpop.f32.mrb[77].mxu1 }
0x1f4e   :  { %v3315_v40 = vpop.f32.mrb[78].mxu1 }
0x1f4f   :  { %v3319_v41 = vadd.f32 %v3313_v32, %v3147_v55  ;;  %v3316_v63 = vadd.f32 %v4472_v1, %v3315_v40  ;;  %v5015_v29 = vpop.f32.mrb[79].mxu1 }
0x1f51   :  { %v3320_v14 = vadd.f32 %v3316_v63, %v3148_v48  ;;  %v3323_v42 = vsel %vm285_vm14, %v3319_v41, 0.0 }
0x1f52   :  { %3324 = vadd.xlane.f32.xlu0 %v3323_v42 }
0x1f53   :  { %v3326_v13 = vsel %vm285_vm14, %v3320_v14, 0.0 }
0x1f54   :  { %3327 = vadd.xlane.f32.xlu1 %v3326_v13 }
0x1fdf   :  { %v3325_v43 = vpop.xlane.xlu0 %3324 }
0x1fe0   :  { %v3329_v36 = vmul.f32 0.03125, %v3325_v43 }
0x1fe1   :  { %v3328_v4 = vpop.xlane.xlu1 %3327 }
0x1fe2   :  { %v3331_v24 = vsub.f32 %v3319_v41, %v3329_v36  ;;  %v3330_v22 = vmul.f32 0.03125, %v3328_v4 }
0x1fe4   :  { %v3332_v23 = vsub.f32 %v3320_v14, %v3330_v22  ;;  %v3333_v9 = vmul.f32 %v3331_v24, %v3331_v24 }
0x1fe6   :  { %v3335_v44 = vsel %vm285_vm14, %v3333_v9, 0.0  ;;  %v3334_v45 = vmul.f32 %v3332_v23, %v3332_v23 }
0x1fe7   :  { %3336 = vadd.xlane.f32.xlu0 %v3335_v44 }
0x1fe8   :  { %v3338_v49 = vsel %vm285_vm14, %v3334_v45, 0.0 }
0x1fe9   :  { %3339 = vadd.xlane.f32.xlu1 %v3338_v49 }
0x2074   :  { %v3337_v54 = vpop.xlane.xlu0 %3336 }
0x2075   :  { %v3341_v50 = vmul.f32 0.03125, %v3337_v54 }
0x2076   :  { %v3340_v18 = vpop.xlane.xlu1 %3339 }
0x2077   :  { %v3343_v55 = vadd.f32 1e-05, %v3341_v50  ;;  %v3342_v48 = vmul.f32 0.03125, %v3340_v18 }
0x2079   :  { %5410 = vrsqrt.f32 %v3343_v55  ;;  %v3344_v19 = vadd.f32 1e-05, %v3342_v48 }
0x207b   :  { %5412 = vrsqrt.f32 %v3344_v19 }
0x2083   :  { %v5411_v56 = vpop.eup %5410 }
0x2084   :  { %v3347_v59 = vmul.f32 %v5411_v56, %v3331_v24 }
0x2085   :  { %v5413_v20 = vpop.eup %5412 }
0x2086   :  { %v3355_v16 = vmul.f32 %v4478_v57, %v3347_v59  ;;  %v3348_v61 = vmul.f32 %v5413_v20, %v3332_v23 }
0x2088   :  { %v3356_v58 = vmul.f32 %v4478_v57, %v3348_v61  ;;  %v6519_v60 = vadd.f32 %v4479_v7, %v3355_v16 }
0x208a   :  { %v6521_v62 = vadd.f32 %v4479_v7, %v3356_v58 }
0x208c   :  { %v3365_v10 = vpack.c.bf16 %v6521_v62, %v6519_v60 }
0x208e   :  { %5021 = vmatmul.mubr.msk.bf16.vlgmr.msra.gmra.mrb[72].mxu0 %vm285_vm14, %v3365_v10 }
0x208f   :  { %5026 = vmatprep.mubr.msk.bf16.mxu0 %vm5502_vm15, %v5501_v8 }
0x2161   :  { %v3426_v12 = vpop.f32.mrb[72].mxu0 }
0x2162   :  { %v5022_v15 = vpop.f32.mrb[73].mxu0  ;;  %v3427_v28 = vadd.f32 %v4485_v11, %v3426_v12 }
0x2163   :  { %v3429_v21 = vpop.f32.mrb[74].mxu0 }
0x2164   :  { %v3430_v33 = vadd.f32 %v4485_v11, %v3429_v21  ;;  %v5023_v52 = vpop.f32.mrb[75].mxu0 }
0x2166   :  { %v6531_v3 = vpack.c.bf16 %v3430_v33, %v3427_v28 }
0x2168   :  { %3437 = vrot.lane.b32.xlu1 %v6531_v3, %s5503_s25  ;;  %3435 = vrot.lane.b32.xlu0 %v6531_v3, %s5504_s3 }
0x216c   :  { %3439 = vrot.lane.b32.xlu1 %v6531_v3, %s6770_s6 }
0x2170   :  { %3441 = vrot.lane.b32.xlu1 %v6531_v3, %s6771_s27 }
0x21da   :  { %v6541_v6 = vpop.permute.xlu1 %3437  ;;  %v6543_v25 = vpop.permute.xlu0 %3435 }
0x21db   :  { %3539 = vrot.lane.b32.xlu1 %v6541_v6, %s6771_s27  ;;  %3490 = vrot.lane.b32.xlu0 %v6543_v25, %s6771_s27 }
0x21de   :  { %v6549_v53 = vpop.permute.xlu1 %3439 }
0x21df   :  { %3588 = vrot.lane.b32.xlu0 %v6549_v53, %s6771_s27 }
0x21e2   :  { %v3442_v26 = vpop.permute.xlu1 %3441 }
0x21e3   :  { %v3447_v27 = vsel %vm417_vm3, %v3442_v26, 0 }
0x21e4   :  { %5025 = vmatpush3.bf16.xpose.msra.mxu0 %v3447_v27 }
0x21e5   :  { %5036 = vmatprep.subr.bf16.mxu0 %v5501_v8 }
0x21eb   :  { %5027 = vmatmul.mubr.msk.bf16.vlgmr.msra.gmra.mrb[76].mxu0 %vm417_vm3, %v6531_v3 }
0x21ec   :  { %5038 = vmatprep.mubr.msk.bf16.mxu0 %vm5502_vm15, %v5501_v8 }
0x224d   :  { %v3540_v0 = vpop.permute.xlu1 %3539  ;;  %v3491_v30 = vpop.permute.xlu0 %3490 }
0x224e   :  { %v3545_v34 = vsel %vm417_vm3, %v3540_v0, 0  ;;  %v3496_v31 = vsel %vm417_vm3, %v3491_v30, 0 }
0x224f   :  { %5031 = vmatpush3.bf16.xpose.msra.mxu1 %v3496_v31  ;;  %5037 = vmatpush3.bf16.xpose.msra.mxu0 %v3545_v34 }
0x2250   :  { %5042 = vmatprep.subr.bf16.mxu1 %v5501_v8  ;;  %5048 = vmatprep.subr.bf16.mxu0 %v5501_v8 }
0x2251   :  { %v3589_v5 = vpop.permute.xlu0 %3588 }
0x2252   :  { %v3594_v2 = vsel %vm417_vm3, %v3589_v5, 0 }
0x2256   :  { %5033 = vmatmul.mubr.msk.bf16.vlgmr.msra.gmra.mrb[80].mxu1 %vm417_vm3, %v6543_v25  ;;  %5039 = vmatmul.mubr.msk.bf16.vlgmr.msra.gmra.mrb[80].mxu0 %vm417_vm3, %v6541_v6 }
0x2257   :  { %5043 = vmatpush3.bf16.xpose.msra.mxu1 %v3594_v2  ;;  %5044 = vmatprep.mubr.msk.bf16.mxu1 %vm5502_vm15, %v5501_v8 }
0x2258   :  { %5050 = vmatprep.mubr.msk.bf16.mxu0 %vm5502_vm15, %v5501_v8  ;;  %5054 = vmatprep.subr.bf16.mxu1 %v5501_v8 }
0x225e   :  { %5045 = vmatmul.mubr.msk.bf16.vlgmr.msra.gmra.mrb[84].mxu1 %vm417_vm3, %v6549_v53 }
0x225f   :  { %5056 = vmatprep.mubr.msk.bf16.mxu1 %vm5502_vm15, %v5501_v8 }
0x22be   :  { %v3483_v1 = vpop.f32.mrb[76].mxu0 }
0x22bf   :  { %v3637_v37 = vmul.f32 0.35355338, %v3483_v1  ;;  %v5028_v32 = vpop.f32.mrb[77].mxu0 }
0x22c0   :  { %v3486_v35 = vpop.f32.mrb[78].mxu0 }
0x22c1   :  { %v3645_v40 = vadd.f32 %v3637_v37, %v6375_v38  ;;  %v3638_v41 = vmul.f32 0.35355338, %v3486_v35  ;;  %v5029_v63 = vpop.f32.mrb[79].mxu0 }
0x22c3   :  { %v3646_v29 = vadd.f32 %v3638_v41, %v6380_v47  ;;  %v3653_v14 = vsel %vm628_vm10, %v3645_v40, -inf }
0x22c4   :  { %3654 = vmax.xlane.f32.xlu1 %v3653_v14 }
0x22c5   :  { %v3656_v42 = vsel %vm628_vm10, %v3646_v29, -inf }
0x22c6   :  { %3657 = vmax.xlane.f32.xlu0 %v3656_v42 }
0x2329   :  { %v3532_v13 = vpop.f32.mrb[80].mxu1  ;;  %v3581_v43 = vpop.f32.mrb[80].mxu0 }
0x232a   :  { %v3639_v36 = vmul.f32 0.35355338, %v3532_v13  ;;  %v3641_v4 = vmul.f32 0.35355338, %v3581_v43  ;;  %v5034_v24 = vpop.f32.mrb[81].mxu1  ;;  %v5040_v22 = vpop.f32.mrb[81].mxu0 }
0x232b   :  { %v3535_v23 = vpop.f32.mrb[82].mxu1  ;;  %v3584_v9 = vpop.f32.mrb[82].mxu0 }
0x232c   :  { %v3647_v44 = vadd.f32 %v3639_v36, %v6375_v38  ;;  %v3649_v45 = vadd.f32 %v3641_v4, %v6375_v38  ;;  %v3640_v49 = vmul.f32 0.35355338, %v3535_v23  ;;  %v5035_v17 = vpop.f32.mrb[83].mxu1  ;;  %v5041_v46 = vpop.f32.mrb[83].mxu0  ;;  %v3642_v50 = vmul.f32 0.35355338, %v3584_v9 }
0x232e   :  { %v3648_v54 = vadd.f32 %v3640_v49, %v6380_v47  ;;  %v3659_v18 = vsel %vm628_vm10, %v3647_v44, -inf  ;;  %v3665_v55 = vsel %vm628_vm10, %v3649_v45, -inf  ;;  %v3650_v19 = vadd.f32 %v3642_v50, %v6380_v47 }
0x232f   :  { %3660 = vmax.xlane.f32.xlu0 %v3659_v18  ;;  %3666 = vmax.xlane.f32.xlu1 %v3665_v55 }
0x2330   :  { %v3662_v59 = vsel %vm628_vm10, %v3648_v54, -inf  ;;  %v3668_v11 = vsel %vm628_vm10, %v3650_v19, -inf }
0x2331   :  { %v3630_v48 = vpop.f32.mrb[84].mxu1 }
0x2332   :  { %v3643_v56 = vmul.f32 0.35355338, %v3630_v48  ;;  %v5046_v57 = vpop.f32.mrb[85].mxu1 }
0x2333   :  { %v3633_v20 = vpop.f32.mrb[86].mxu1  ;;  %3663 = vmax.xlane.f32.xlu0 %v3662_v59 }
0x2334   :  { %v3651_v16 = vadd.f32 %v3643_v56, %v6375_v38  ;;  %v3644_v61 = vmul.f32 0.35355338, %v3633_v20  ;;  %v5047_v7 = vpop.f32.mrb[87].mxu1 }
0x2336   :  { %v3652_v58 = vadd.f32 %v3644_v61, %v6380_v47  ;;  %v3671_v10 = vsel %vm628_vm10, %v3651_v16, -inf }
0x2337   :  { %3672 = vmax.xlane.f32.xlu1 %v3671_v10  ;;  %3669 = vmax.xlane.f32.xlu0 %v3668_v11 }
0x2338   :  { %v3674_v12 = vsel %vm628_vm10, %v3652_v58, -inf }
0x233b   :  { %3675 = vmax.xlane.f32.xlu0 %v3674_v12 }
0x2348   :  { %3745 = vrot.lane.b32.xlu1 %v6531_v3, %s6772_s29 }
0x2351   :  { %v3655_v15 = vpop.xlane.xlu1 %3654 }
0x2352   :  { %v3677_v38 = vsub.f32 %v3645_v40, %v3655_v15 }
0x2353   :  { %v3658_v21 = vpop.xlane.xlu0 %3657 }
0x2354   :  { %v3678_v28 = vsub.f32 %v3646_v29, %v3658_v21  ;;  %v3685_v52 = vmul.f32 1.442695, %v3677_v38 }
0x2356   :  { %v3687_v33 = vmul.f32 1.442695, %v3678_v28 }
0x2358   :  { %5414 = vpow2.f32 %v3687_v33 }
0x2359   :  { %5416 = vpow2.f32 %v3685_v52 }
0x2362   :  { %v5415_v47 = vpop.eup %5414 }
0x2363   :  { %v3704_v26 = vsel %vm628_vm10, %v5415_v47, 0.0  ;;  %v5417_v27 = vpop.eup %5416 }
0x2364   :  { %3705 = vadd.xlane.f32.xlu0 %v3704_v26  ;;  %v3701_v0 = vsel %vm628_vm10, %v5417_v27, 0.0 }
0x236c   :  { %3702 = vadd.xlane.f32.xlu1 %v3701_v0 }
0x23bc   :  { %v3661_v30 = vpop.xlane.xlu0 %3660  ;;  %v3667_v34 = vpop.xlane.xlu1 %3666 }
0x23bd   :  { %v3679_v31 = vsub.f32 %v3647_v44, %v3661_v30  ;;  %v3681_v3 = vsub.f32 %v3649_v45, %v3667_v34 }
0x23bf   :  { %v3689_v5 = vmul.f32 1.442695, %v3679_v31  ;;  %v3693_v2 = vmul.f32 1.442695, %v3681_v3 }
0x23c0   :  { %v3664_v1 = vpop.xlane.xlu0 %3663 }
0x23c1   :  { %5418 = vpow2.f32 %v3689_v5  ;;  %v3680_v37 = vsub.f32 %v3648_v54, %v3664_v1 }
0x23c2   :  { %5420 = vpow2.f32 %v3693_v2 }
0x23c3   :  { %v3691_v32 = vmul.f32 1.442695, %v3680_v37  ;;  %v5270_v37 = vld [vmem:[%s6730_s9 + $0x10] sm:$0xff]  }
0x23c4   :  { %v3673_v35 = vpop.xlane.xlu1 %3672  ;;  %v3670_v40 = vpop.xlane.xlu0 %3669 }
0x23c5   :  { %5422 = vpow2.f32 %v3691_v32  ;;  %v3683_v41 = vsub.f32 %v3651_v16, %v3673_v35  ;;  %v3682_v63 = vsub.f32 %v3650_v19, %v3670_v40  ;;  %v5271_v35 = vld [vmem:[%s6730_s9 + $0x18] sm:$0xff]  }
0x23c7   :  { %v3697_v29 = vmul.f32 1.442695, %v3683_v41  ;;  %v3695_v14 = vmul.f32 1.442695, %v3682_v63 }
0x23c8   :  { %v3746_v42 = vpop.permute.xlu1 %3745  ;;  %v3676_v13 = vpop.xlane.xlu0 %3675 }
0x23c9   :  { %5424 = vpow2.f32 %v3697_v29  ;;  %v3684_v43 = vsub.f32 %v3652_v58, %v3676_v13  ;;  %5049 = vmatpush3.bf16.msra.mxu0 %v3746_v42 }
0x23ca   :  { %5426 = vpow2.f32 %v3695_v14  ;;  %5060 = vmatprep.subr.bf16.mxu0 %v5501_v8 }
0x23cb   :  { %v5419_v36 = vpop.eup %5418  ;;  %v3699_v4 = vmul.f32 1.442695, %v3684_v43 }
0x23cc   :  { %v3707_v24 = vsel %vm628_vm10, %v5419_v36, 0.0  ;;  %v5421_v22 = vpop.eup %5420 }
0x23cd   :  { %5428 = vpow2.f32 %v3699_v4  ;;  %3708 = vadd.xlane.f32.xlu1 %v3707_v24  ;;  %v3713_v9 = vsel %vm628_vm10, %v5421_v22, 0.0 }
0x23cf   :  { %v5423_v23 = vpop.eup %5422 }
0x23d0   :  { %v3710_v44 = vsel %vm628_vm10, %v5423_v23, 0.0 }
0x23d1   :  { %3714 = vadd.xlane.f32.xlu1 %v3713_v9  ;;  %3711 = vadd.xlane.f32.xlu0 %v3710_v44 }
0x23d3   :  { %v5425_v45 = vpop.eup %5424 }
0x23d4   :  { %v5427_v49 = vpop.eup %5426  ;;  %v3719_v17 = vsel %vm628_vm10, %v5425_v45, 0.0 }
0x23d5   :  { %3720 = vadd.xlane.f32.xlu1 %v3719_v17  ;;  %v3716_v46 = vsel %vm628_vm10, %v5427_v49, 0.0 }
0x23d6   :  { %3717 = vadd.xlane.f32.xlu0 %v3716_v46 }
0x23d7   :  { %v5429_v54 = vpop.eup %5428 }
0x23d8   :  { %v3722_v50 = vsel %vm628_vm10, %v5429_v54, 0.0 }
0x23da   :  { %3723 = vadd.xlane.f32.xlu0 %v3722_v50 }
0x23e6   :  { %3839 = vrot.lane.b32.xlu1 %v6541_v6, %s6772_s29 }
0x23ea   :  { %3886 = vrot.lane.b32.xlu1 %v6549_v53, %s6772_s29 }
0x23f0   :  { %3792 = vrot.lane.b32.xlu0 %v6543_v25, %s6772_s29 }
0x23f1   :  { %v3706_v18 = vpop.xlane.xlu0 %3705 }
0x23f2   :  { %5430 = vrcp.f32 %v3706_v18 }
0x23f9   :  { %v3703_v55 = vpop.xlane.xlu1 %3702 }
0x23fa   :  { %5432 = vrcp.f32 %v3703_v55 }
0x23fc   :  { %v5431_v48 = vpop.eup %5430 }
0x23fd   :  { %v3734_v56 = vmul.f32 %v5431_v48, %v5415_v47 }
0x2404   :  { %v5433_v19 = vpop.eup %5432 }
0x2405   :  { %v3733_v57 = vmul.f32 %v5433_v19, %v5417_v27 }
0x2407   :  { %v3741_v59 = vpack.c.bf16 %v3734_v56, %v3733_v57 }
0x2409   :  { %5051 = vmatmul.mubr.msk.bf16.vlgmr.msra.gmra.mrb[84].mxu0 %vm628_vm10, %v3741_v59 }
0x240a   :  { %5062 = vmatprep.mubr.msk.bf16.mxu0 %vm5502_vm15, %v5501_v8 }
0x245a   :  { %v3709_v6 = vpop.xlane.xlu1 %3708 }
0x245b   :  { %5434 = vrcp.f32 %v3709_v6 }
0x245e   :  { %v3715_v53 = vpop.xlane.xlu1 %3714  ;;  %v3712_v20 = vpop.xlane.xlu0 %3711 }
0x245f   :  { %5436 = vrcp.f32 %v3712_v20  ;;  %v4502_v20 = vld [vmem:[%s6731_s10 + $0x1] ss:$0 sm:$0xff] }
0x2460   :  { %5438 = vrcp.f32 %v3715_v53 }
0x2462   :  { %v3721_v25 = vpop.xlane.xlu1 %3720 }
0x2463   :  { %v3718_v16 = vpop.xlane.xlu0 %3717 }
0x2464   :  { %5440 = vrcp.f32 %v3718_v16 }
0x2465   :  { %5442 = vrcp.f32 %v3721_v25  ;;  %v5435_v58 = vpop.eup %5434 }
0x2466   :  { %v3840_v61 = vpop.permute.xlu1 %3839  ;;  %v3735_v11 = vmul.f32 %v5435_v58, %v5419_v36 }
0x2467   :  { %v3724_v7 = vpop.xlane.xlu0 %3723  ;;  %5061 = vmatpush3.bf16.msra.mxu0 %v3840_v61 }
0x2468   :  { %5444 = vrcp.f32 %v3724_v7  ;;  %5072 = vmatprep.subr.bf16.mxu0 %v5501_v8 }
0x2469   :  { %v5437_v10 = vpop.eup %5436 }
0x246a   :  { %v3736_v12 = vmul.f32 %v5437_v10, %v5423_v23  ;;  %v5439_v21 = vpop.eup %5438  ;;  %v3887_v47 = vpop.permute.xlu1 %3886 }
0x246b   :  { %v3793_v15 = vpop.permute.xlu0 %3792  ;;  %v3737_v33 = vmul.f32 %v5439_v21, %v5421_v22 }
0x246c   :  { %5055 = vmatpush3.bf16.msra.mxu1 %v3793_v15  ;;  %v3742_v28 = vpack.c.bf16 %v3736_v12, %v3735_v11 }
0x246d   :  { %5066 = vmatprep.subr.bf16.mxu1 %v5501_v8 }
0x246e   :  { %v5441_v38 = vpop.eup %5440 }
0x246f   :  { %v3738_v52 = vmul.f32 %v5441_v38, %v5427_v49  ;;  %5057 = vmatmul.mubr.msk.bf16.vlgmr.msra.gmra.mrb[88].mxu1 %vm628_vm10, %v3742_v28  ;;  %v5443_v26 = vpop.eup %5442 }
0x2470   :  { %5067 = vmatpush3.bf16.msra.mxu1 %v3887_v47  ;;  %5068 = vmatprep.mubr.msk.bf16.mxu1 %vm5502_vm15, %v5501_v8  ;;  %v3739_v30 = vmul.f32 %v5443_v26, %v5425_v45  ;;  %v4405_v26 = vld [vmem:[%s6737_s16 + $0x1] ss:$0 sm:$0xff] }
0x2471   :  { %v3743_v27 = vpack.c.bf16 %v3738_v52, %v3737_v33  ;;  %5080 = vmatprep.subr.bf16.mxu1 %v5501_v8 }
0x2472   :  { %v5445_v0 = vpop.eup %5444 }
0x2473   :  { %v3740_v34 = vmul.f32 %v5445_v0, %v5429_v54  ;;  %5063 = vmatmul.mubr.msk.bf16.vlgmr.msra.gmra.mrb[88].mxu0 %vm628_vm10, %v3743_v27  ;;  %v2157_v0 = vadd.f32 %v4405_v26, %v6300_v51  ;;  %v5273_v51 = vld [vmem:[%s6734_s13 + $0x18] sm:$0xff]  }
0x2474   :  { %5076 = vmatprep.mubr.msk.bf16.mxu0 %vm5502_vm15, %v5501_v8  ;;  %5073 = vmatpush3.bf16.msra.mxu0 %v5270_v37 }
0x2475   :  { %v3744_v31 = vpack.c.bf16 %v3740_v34, %v3739_v30  ;;  %5074 = vmatprep.subr.bf16.mxu0 %v5501_v8  ;;  %v2162_v34 = vadd.f32 %v2157_v0, %v6214_v39 }
0x2477   :  { %5069 = vmatmul.mubr.msk.bf16.vlgmr.msra.gmra.mrb[92].mxu1 %vm628_vm10, %v3744_v31 }
0x2478   :  { %5084 = vmatprep.mubr.msk.bf16.mxu1 %vm5502_vm15, %v5501_v8  ;;  %5075 = vmatpush3.bf16.msra.mxu0 %v5271_v35 }
0x2479   :  { %5088 = vmatprep.subr.bf16.mxu0 %v5501_v8 }
0x24dc   :  { %v3785_v3 = vpop.f32.mrb[84].mxu0 }
0x24dd   :  { %v5052_v5 = vpop.f32.mrb[85].mxu0 }
0x24de   :  { %v3788_v2 = vpop.f32.mrb[86].mxu0  ;;  %v5272_v5 = vld [vmem:[%s6734_s13 + $0x10] sm:$0xff]  }
0x24df   :  { %v5053_v1 = vpop.f32.mrb[87].mxu0  ;;  %5081 = vmatpush3.bf16.msra.mxu1 %v5272_v5 }
0x24e0   :  { %5082 = vmatprep.subr.bf16.mxu1 %v5501_v8 }
0x24e3   :  { %5083 = vmatpush3.bf16.msra.mxu1 %v5273_v51 }
0x2542   :  { %v3832_v32 = vpop.f32.mrb[88].mxu1 }
0x2543   :  { %v5058_v40 = vpop.f32.mrb[89].mxu1 }
0x2544   :  { %v3835_v41 = vpop.f32.mrb[90].mxu1 }
0x2545   :  { %v5223_v63 = vpack.i.bf16 %v3835_v41, %v3832_v32  ;;  %v5059_v29 = vpop.f32.mrb[91].mxu1 }
0x2546   :  { %v3879_v14 = vpop.f32.mrb[88].mxu0 }
0x2547   :  { %5224 = vrot.lane.b32.xlu1 %v5223_v63, %s6773_s30  ;;  %v5064_v42 = vpop.f32.mrb[89].mxu0 }
0x2548   :  { %v3882_v13 = vpop.f32.mrb[90].mxu0 }
0x2549   :  { %v5228_v43 = vpack.i.bf16 %v3882_v13, %v3879_v14  ;;  %v5065_v36 = vpop.f32.mrb[91].mxu0 }
0x254a   :  { %v3926_v4 = vpop.f32.mrb[92].mxu1 }
0x254b   :  { %v5070_v24 = vpop.f32.mrb[93].mxu1  ;;  %5229 = vrot.lane.b32.xlu0 %v5228_v43, %s6768_s22  ;;  %v4508_v43 = vld [vmem:[%s6732_s11 + $0x1] ss:$0 sm:$0xff] }
0x254c   :  { %v3929_v22 = vpop.f32.mrb[94].mxu1 }
0x254d   :  { %v5233_v23 = vpack.i.bf16 %v3929_v22, %v3926_v4  ;;  %v5071_v9 = vpop.f32.mrb[95].mxu1  ;;  %v4509_v22 = vld [vmem:[%s6767_s24 + $0x1] ss:$0 sm:$0xff] }
0x254f   :  { %5234 = vrot.lane.b32.xlu1 %v5233_v23, %s6769_s2 }
0x25b9   :  { %v5225_v44 = vpop.permute.xlu1 %5224 }
0x25ba   :  { %v5227_v49 = vunpack.i.h.bf16 %v5225_v44  ;;  %v5226_v17 = vunpack.i.l.bf16 %v5225_v44 }
0x25bc   :  { %v3957_v18 = vsel %vm417_vm3, %v3785_v3, %v5226_v17  ;;  %v3958_v55 = vsel %vm417_vm3, %v3788_v2, %v5227_v49  ;;  %v2167_v3 = vsel %vm285_vm14, %v2162_v34, 0.0  ;;  %v5274_v49 = vld [vmem:[%s6736_s15 + $0x20] sm:$0xff]   ;;  %v5275_v17 = vld [vmem:[%s6736_s15 + $0x28] sm:$0xff]  }
0x25bd   :  { %v5230_v45 = vpop.permute.xlu0 %5229 }
0x25be   :  { %v5232_v46 = vunpack.i.h.bf16 %v5230_v45  ;;  %v5231_v54 = vunpack.i.l.bf16 %v5230_v45 }
0x25c0   :  { %v3960_v56 = vsel %vm628_vm10, %v3958_v55, %v5232_v46  ;;  %v3959_v57 = vsel %vm628_vm10, %v3957_v18, %v5231_v54  ;;  %v5276_v46 = vld [vmem:[%s6736_s15 + $0x30] sm:$0xff]   ;;  %v5277_v54 = vld [vmem:[%s6736_s15 + $0x38] sm:$0xff]  }
0x25c1   :  { %v5235_v50 = vpop.permute.xlu1 %5234 }
0x25c2   :  { %v5237_v48 = vunpack.i.h.bf16 %v5235_v50  ;;  %v5236_v19 = vunpack.i.l.bf16 %v5235_v50 }
0x25c4   :  { %v3961_v59 = vsel %vm6776_vm9, %v3959_v57, %v5236_v19  ;;  %v3962_v6 = vsel %vm6777_vm8, %v3960_v56, %v5237_v48  ;;  %v4413_v19 = vld [vmem:[%s6738_s17 + $0x1] ss:$0 sm:$0xff] }
0x25c5   :  { %v3963_v53 = vpack.c.bf16 %v3962_v6, %v3961_v59  ;;  %v4414_v57 = vld [vmem:[%s6739_s18 + $0x1] ss:$0 sm:$0xff] }
0x25c6   :  { %v4515_v6 = vld [vmem:[%s6735_s14 + $0x1] ss:$0 sm:$0xff] }
0x25c7   :  { %5077 = vmatmul.mubr.msk.bf16.vlgmr.msra.gmra.mrb[92].mxu0 %vm285_vm14, %v3963_v53 }
0x25c8   :  { %5096 = vmatprep.mubr.msk.bf16.mxu0 %vm5502_vm15, %v5501_v8  ;;  %5089 = vmatpush3.bf16.msra.mxu0 %v5274_v49  ;;  %vm2194_vm15 = vcmask 253952  }
0x25c9   :  { %5090 = vmatprep.subr.bf16.mxu0 %v5501_v8 }
0x25cc   :  { %5091 = vmatpush3.bf16.msra.mxu0 %v5275_v17 }
0x25cd   :  { %5092 = vmatprep.subr.bf16.mxu0 %v5501_v8 }
0x25d0   :  { %5093 = vmatpush3.bf16.msra.mxu0 %v5276_v46 }
0x25d1   :  { %5094 = vmatprep.subr.bf16.mxu0 %v5501_v8 }
0x25d4   :  { %5095 = vmatpush3.bf16.msra.mxu0 %v5277_v54 }
0x269a   :  { %v4024_v25 = vpop.f32.mrb[92].mxu0 }
0x269b   :  { %v4025_v16 = vadd.f32 %v4502_v20, %v4024_v25  ;;  %v5078_v61 = vpop.f32.mrb[93].mxu0 }
0x269c   :  { %v4027_v7 = vpop.f32.mrb[94].mxu0 }
0x269d   :  { %v4031_v58 = vadd.f32 %v4025_v16, %v6519_v60  ;;  %v4028_v10 = vadd.f32 %v4502_v20, %v4027_v7  ;;  %v5079_v11 = vpop.f32.mrb[95].mxu0 }
0x269f   :  { %v4032_v12 = vadd.f32 %v4028_v10, %v6521_v62  ;;  %v4035_v15 = vsel %vm285_vm14, %v4031_v58, 0.0 }
0x26a0   :  { %4036 = vadd.xlane.f32.xlu0 %v4035_v15 }
0x26a1   :  { %v4038_v21 = vsel %vm285_vm14, %v4032_v12, 0.0 }
0x26a2   :  { %4039 = vadd.xlane.f32.xlu1 %v4038_v21 }
0x272d   :  { %v4037_v28 = vpop.xlane.xlu0 %4036 }
0x272e   :  { %v4041_v38 = vmul.f32 0.03125, %v4037_v28 }
0x272f   :  { %v4040_v33 = vpop.xlane.xlu1 %4039 }
0x2730   :  { %v4043_v52 = vsub.f32 %v4031_v58, %v4041_v38  ;;  %v4042_v47 = vmul.f32 0.03125, %v4040_v33 }
0x2732   :  { %v4044_v60 = vsub.f32 %v4032_v12, %v4042_v47  ;;  %v4045_v27 = vmul.f32 %v4043_v52, %v4043_v52 }
0x2734   :  { %v4047_v62 = vsel %vm285_vm14, %v4045_v27, 0.0  ;;  %v4046_v30 = vmul.f32 %v4044_v60, %v4044_v60 }
0x2735   :  { %4048 = vadd.xlane.f32.xlu0 %v4047_v62 }
0x2736   :  { %v4050_v31 = vsel %vm285_vm14, %v4046_v30, 0.0 }
0x2739   :  { %4051 = vadd.xlane.f32.xlu0 %v4050_v31 }
0x273d   :  { %2168 = vadd.xlane.f32.xlu0 %v2167_v3  ;;  %v4528_v3 = vld [vmem:[%s6737_s16 + $0x1] ss:$0 sm:$0xff]  ;;  %s5512_s16 = smov [#allocation4]  }
0x273e   :  { %s4283_s18 = sshll.u32 %s5512_s16, 4  ;;  %s4284_s18 = int_to_ptr.vmem [resolvable:$true] %s4283_s18 }
0x273f   :  { %s5474_s2 = scalar_lea.vmem %s4284_s18, 32  ;;  %p5479_p6 = scmp.lt.s32.totalorder %s4284_s18, %s4284_s18 }
0x2740   :  { %p5475_p5 = scmp.ne.s32.totalorder %s4284_s18, %s5474_s2  ;;  %p5480_p7 = scmp.lt.s32.totalorder %s5474_s2, %s5474_s2 }
0x2742   :  { %p5481_p8 = por %p5480_p7, %p5479_p6 }
0x2744   :  { %p5482_p9 = pnand %p5481_p8, %p5475_p5 }
0x27c2   :  { %v4049_v2 = vpop.xlane.xlu0 %4048 }
0x27c3   :  { %v4053_v39 = vmul.f32 0.03125, %v4049_v2 }
0x27c5   :  { %v4055_v1 = vadd.f32 1e-05, %v4053_v39 }
0x27c6   :  { %v4052_v37 = vpop.xlane.xlu0 %4051 }
0x27c7   :  { %5446 = vrsqrt.f32 %v4055_v1  ;;  %v4054_v32 = vmul.f32 0.03125, %v4052_v37 }
0x27c9   :  { %v4056_v35 = vadd.f32 1e-05, %v4054_v32 }
0x27ca   :  { %v2169_v40 = vpop.xlane.xlu0 %2168 }
0x27cb   :  { %5448 = vrsqrt.f32 %v4056_v35  ;;  %v2170_v41 = vmul.f32 0.03125, %v2169_v40 }
0x27cd   :  { %v2171_v63 = vsub.f32 %v2162_v34, %v2170_v41 }
0x27cf   :  { %v2172_v29 = vmul.f32 %v2171_v63, %v2171_v63 }
0x27d1   :  { %v5447_v14 = vpop.eup %5446  ;;  %v2173_v42 = vsel %vm285_vm14, %v2172_v29, 0.0 }
0x27d2   :  { %v4059_v13 = vmul.f32 %v5447_v14, %v4043_v52  ;;  %2174 = vadd.xlane.f32.xlu0 %v2173_v42 }
0x27d4   :  { %v4067_v4 = vmul.f32 %v4508_v43, %v4059_v13 }
0x27d5   :  { %v5449_v36 = vpop.eup %5448 }
0x27d6   :  { %v4060_v24 = vmul.f32 %v5449_v36, %v4044_v60  ;;  %v4075_v9 = vadd.f32 %v4509_v22, %v4067_v4 }
0x27d8   :  { %v4068_v23 = vmul.f32 %v4508_v43, %v4060_v24 }
0x27da   :  { %v4076_v44 = vadd.f32 %v4509_v22, %v4068_v23 }
0x27dc   :  { %v4077_v45 = vpack.c.bf16 %v4076_v44, %v4075_v9 }
0x27de   :  { %5085 = vmatmul.mubr.msk.bf16.vlgmr.msra.gmra.mrb[96].mxu1 %vm285_vm14, %v4077_v45 }
0x285f   :  { %v2175_v50 = vpop.xlane.xlu0 %2174 }
0x2860   :  { %v2176_v18 = vmul.f32 0.03125, %v2175_v50 }
0x2862   :  { %v2177_v55 = vadd.f32 1e-05, %v2176_v18 }
0x2864   :  { %5450 = vrsqrt.f32 %v2177_v55 }
0x286e   :  { %v5451_v48 = vpop.eup %5450 }
0x286f   :  { %v2179_v56 = vmul.f32 %v5451_v48, %v2171_v63 }
0x2871   :  { %v2186_v8 = vmul.f32 %v4413_v19, %v2179_v56 }
0x2873   :  { %v2193_v59 = vadd.f32 %v4414_v57, %v2186_v8 }
0x2875   :  { %2195 = vst.msk [vmem:[#allocation4] sm:$0x1] %vm2194_vm15, %v2193_v59 }
0x28b1   :  { %v4138_v53 = vpop.f32.mrb[96].mxu1 }
0x28b2   :  { %v4139_v20 = vadd.f32 %v4515_v6, %v4138_v53  ;;  %v5086_v25 = vpop.f32.mrb[97].mxu1 }
0x28b3   :  { %v4141_v16 = vpop.f32.mrb[98].mxu1 }
0x28b4   :  { %v4145_v61 = vmul.f32 %v4139_v20, %v4139_v20  ;;  %v4142_v7 = vadd.f32 %v4515_v6, %v4141_v16  ;;  %v5087_v58 = vpop.f32.mrb[99].mxu1 }
0x28b6   :  { %v4147_v10 = vmul.f32 %v4145_v61, %v4139_v20  ;;  %v4146_v11 = vmul.f32 %v4142_v7, %v4142_v7 }
0x28b8   :  { %v4149_v12 = vmul.f32 0.044715, %v4147_v10  ;;  %v4148_v15 = vmul.f32 %v4146_v11, %v4142_v7 }
0x28ba   :  { %v4151_v21 = vadd.f32 %v4149_v12, %v4139_v20  ;;  %v4150_v28 = vmul.f32 0.044715, %v4148_v15 }
0x28bc   :  { %v4153_v38 = vmul.f32 0.7978846, %v4151_v21  ;;  %v4152_v33 = vadd.f32 %v4150_v28, %v4142_v7 }
0x28be   :  { %5452 = vtanh.f32 %v4153_v38  ;;  %v4154_v52 = vmul.f32 0.7978846, %v4152_v33 }
0x28c0   :  { %5454 = vtanh.f32 %v4154_v52 }
0x28c8   :  { %v5453_v47 = vpop.eup %5452 }
0x28c9   :  { %v4157_v26 = vadd.f32 1.0, %v5453_v47 }
0x28ca   :  { %v5455_v60 = vpop.eup %5454 }
0x28cb   :  { %v4159_v27 = vmul.f32 0.5, %v4157_v26  ;;  %v4158_v0 = vadd.f32 1.0, %v5455_v60 }
0x28cd   :  { %v4160_v62 = vmul.f32 0.5, %v4158_v0  ;;  %v4161_v30 = vmul.f32 %v4159_v27, %v4139_v20 }
0x28cf   :  { %v4162_v34 = vmul.f32 %v4160_v62, %v4142_v7 }
0x28d1   :  { %v4163_v31 = vpack.c.bf16 %v4162_v34, %v4161_v30 }
0x28d3   :  { %5097 = vmatmul.mubr.msk.bf16.vlgmr.msra.gmra.mrb[96].mxu0 %vm1180_vm12, %v4163_v31 }
0x29a6   :  { %v4240_v5 = vpop.f32.mrb[96].mxu0 }
0x29a7   :  { %v4241_v51 = vadd.f32 %v4528_v3, %v4240_v5  ;;  %v5098_v2 = vpop.f32.mrb[97].mxu0 }
0x29a8   :  { %v4243_v39 = vpop.f32.mrb[98].mxu0 }
0x29a9   :  { %v4246_v1 = vadd.f32 %v4241_v51, %v4075_v9  ;;  %v5099_v37 = vpop.f32.mrb[99].mxu0 }
0x29ab   :  { %v4249_v32 = vsel %vm285_vm14, %v4246_v1, 0.0 }
0x29ac   :  { %4250 = vadd.xlane.f32.xlu1 %v4249_v32 }
0x2a39   :  { %v4251_v35 = vpop.xlane.xlu1 %4250 }
0x2a3a   :  { %v4252_v40 = vmul.f32 0.03125, %v4251_v35 }
0x2a3c   :  { %v4253_v41 = vsub.f32 %v4246_v1, %v4252_v40 }
0x2a3e   :  { %v4254_v63 = vmul.f32 %v4253_v41, %v4253_v41 }
0x2a40   :  { %v4255_v29 = vsel %vm285_vm14, %v4254_v63, 0.0 }
0x2a41   :  { %4256 = vadd.xlane.f32.xlu1 %v4255_v29 }
0x2ace   :  { %v4257_v14 = vpop.xlane.xlu1 %4256 }
0x2acf   :  { %v4258_v42 = vmul.f32 0.03125, %v4257_v14 }
0x2ad1   :  { %v4259_v13 = vadd.f32 1e-05, %v4258_v42 }
0x2ad3   :  { %5456 = vrsqrt.f32 %v4259_v13 }
0x2add   :  { %v5457_v43 = vpop.eup %5456 }
0x2ade   :  { %v4261_v36 = vmul.f32 %v5457_v43, %v4253_v41 }
0x2ae0   :  { %v4268_v4 = vmul.f32 %v4413_v19, %v4261_v36 }
0x2ae2   :  { %v4275_v24 = vadd.f32 %v4414_v57, %v4268_v4 }
0x2ae4   :  { %4277 = vst.msk [vmem:[#allocation4 + $0x1] sm:$0x1] %vm2194_vm15, %v4275_v24 }
0x2ae5   :  { %5485 = shalt.err (!%p5482_p9)
}
0x2ae6   :  { %s5486_s29 = scalar_lea.hbm %s6740_s19, 32 }
0x2ae7   :  { %p5487_p10 = scmp.ne.s32.totalorder %s6740_s19, %s5486_s29  ;;  %p5490_p11 = scmp.lt.u32.totalorder %s5486_s29, %s6740_s19 }
0x2ae9   :  { %p5492_p12 = pnand %p5490_p11, %p5487_p10 }
0x2aeb   :  { %5495 = shalt.err (!%p5492_p12)
}
0x2aec   :  { %s5513_s13 = smov 1  }
0x2aed   :  { %4289 = dma.vmem_to_hbm [thread:$0]  %s4284_s18, 32, %s6740_s19, [#allocation5], %s6768_s22, %s6768_s22, %s5513_s13  }
0x2aee   :  { %5498 = dma.done.wait [#allocation5], 32  }
0x2aef   :  { %5499 = vsyncadd [#allocation5], 4294967264 }
0x2af0   :  { %4293 = vsyncpa [#allocation5], 1 }

</bundles_post_ra>
